<compile_context>
chip_gen: v7x
topology: tpu7x:2x2x1
jax: 0.10.0
libtpu: 0.0.40
codegen_flags: <defaults>
</compile_context>

<pallas_src>
import functools

import jax
import jax.numpy as jnp
from jax import lax
from jax.experimental import pallas as pl
from jax.experimental.pallas import tpu as pltpu


def _im2col(x, patch):
    """[B, C, Hp*P, Wp*P] -> [B, Hp*Wp, C*P*P] with (c, i, j) fastest ordering."""
    B, C, H, W = x.shape
    Hp, Wp = H // patch, W // patch
    x = x.reshape(B, C, Hp, patch, Wp, patch)
    x = x.transpose(0, 2, 4, 1, 3, 5)                  # B, Hp, Wp, C, P, P
    return x.reshape(B, Hp * Wp, C * patch * patch)


def _fused_kernel(x_cols_ref, hm_cols_ref,
                  wp_ref, bp_ref,
                  wq_ref, bq_ref, wk_ref, bk_ref, wv_ref, bv_ref,
                  wo_ref, bo_ref, who_ref, bho_ref,
                  wt_ref, bt_ref,
                  out_ref, *, num_heads):
    bblk, n, kin = x_cols_ref.shape
    m = bblk * n
    cdt = wp_ref.dtype                                  # bf16 MXU operand dtype

    # Flatten Bblk*N into the matmul M dimension (free leading-dim merge, N % 8 == 0).
    xc = x_cols_ref[...].reshape(m, kin)                # (M, Kin)
    hm = hm_cols_ref[...].reshape(m, hm_cols_ref.shape[2])
    rep = kin // hm.shape[1]
    if rep > 1:
        # 1-channel heatmap replicated across the per-channel im2col blocks
        # (each piece is a lane-aligned multiple of 128).
        hm = jnp.concatenate([hm] * rep, axis=-1)
    masked = (xc * hm).astype(cdt)                      # elementwise heatmap*x, patch-local

    wp = wp_ref[...]
    bp = bp_ref[...]
    # Patchify conv == matmul (kernel == stride); accumulate f32 on the MXU.
    emb_x = jnp.dot(xc, wp, preferred_element_type=jnp.float32) + bp       # key/value source
    emb_h = jnp.dot(masked, wp, preferred_element_type=jnp.float32) + bp   # query source

    e = wp_ref.shape[1]
    dh = e // num_heads
    emb_xc = emb_x.astype(cdt)
    emb_hc = emb_h.astype(cdt)

    # QKV projections (nn.MultiheadAttention in_proj); 1/sqrt(dh) folded into wq/bq.
    q = jnp.dot(emb_hc, wq_ref[...], preferred_element_type=jnp.float32) + bq_ref[...]
    k = jnp.dot(emb_xc, wk_ref[...], preferred_element_type=jnp.float32) + bk_ref[...]
    v = jnp.dot(emb_xc, wv_ref[...], preferred_element_type=jnp.float32) + bv_ref[...]

    # Attention stays strictly per-image: batch dim = image index within the block.
    qb = q.reshape(bblk, n, e).astype(cdt)
    kb = k.reshape(bblk, n, e).astype(cdt)
    vb = v.reshape(bblk, n, e).astype(cdt)

    wo = wo_ref[...]
    attn = jnp.zeros((m, e), jnp.float32)
    for h in range(num_heads):                          # static unroll over heads
        lo = h * dh
        qh = qb[:, :, lo:lo + dh]
        kh = kb[:, :, lo:lo + dh]
        vh = vb[:, :, lo:lo + dh]
        s = lax.dot_general(qh, kh, (((2,), (2,)), ((0,), (0,))),
                            preferred_element_type=jnp.float32)            # (Bblk, N, N)
        s = s - jnp.max(s, axis=-1, keepdims=True)
        p = jnp.exp(s)                                                      # EUP
        denom = jnp.sum(p, axis=-1, keepdims=True)                          # (Bblk, N, 1)
        ctx = lax.dot_general(p.astype(cdt), vh, (((2,), (1,)), ((0,), (0,))),
                              preferred_element_type=jnp.float32)           # (Bblk, N, dh)
        # Normalize after P@V (N*dh multiplies, EUP reciprocal off the VPU critical path).
        ctx = ctx * pl.reciprocal(denom, approx=True)
        # Fold this head directly into the MHA out_proj (no concat / relayout).
        attn = attn + jnp.dot(ctx.reshape(m, dh).astype(cdt), wo[lo:lo + dh, :],
                              preferred_element_type=jnp.float32)
    attn = attn + bo_ref[...]

    # HeatmapAttention.out_proj, then unpatchify (ConvTranspose with k==s is patch-local).
    hout = jnp.dot(attn.astype(cdt), who_ref[...], preferred_element_type=jnp.float32) + bho_ref[...]
    out = jnp.dot(hout.astype(cdt), wt_ref[...], preferred_element_type=jnp.float32) + bt_ref[...]
    out_ref[...] = out.reshape(bblk, n, out_ref.shape[2]).astype(out_ref.dtype)


def _pick_block_batch(B, N, target_rows=256):
    """Largest divisor of B that (a) keeps >= 2 grid steps when B > 1 (so the
    ("parallel",) grid axis can shard across TensorCores) and (b) feeds roughly
    target_rows rows into each matmul's M dimension (128 suffices on v5e,
    256+ fills v6e/v7x)."""
    cap = max(1, B // 2) if B > 1 else 1
    want = max(1, min(cap, max(1, target_rows // max(N, 1))))
    bblk = 1
    for cand in range(1, want + 1):
        if B % cand == 0:
            bblk = cand
    return bblk


@functools.partial(jax.jit, static_argnames=("patch_size", "num_heads", "compute_dtype"))
def alpha_mask_encoder_mha_with_heatmap(x, expert_heatmap, params, *,
                                        patch_size, num_heads,
                                        compute_dtype=jnp.bfloat16):
    """x: [B, 3, H, W]; expert_heatmap: [B, 1|3, H, W]; params: PyTorch-layout weights."""
    B, C_in, H_img, W_img = x.shape
    P = patch_size
    Hp, Wp = H_img // P, W_img // P
    N = Hp * Wp
    E = params["w_patch"].shape[0]
    C_out = params["w_deconv"].shape[1]
    C_hm = expert_heatmap.shape[1]
    Kin = C_in * P * P
    Khm = C_hm * P * P
    Kout = C_out * P * P
    assert E % num_heads == 0
    assert Kin % Khm == 0

    cdt = compute_dtype
    f32 = jnp.float32

    # im2col inputs in bf16 (halves input DMA). Heatmap stays 1-channel here;
    # the kernel replicates it across channel blocks.
    x_cols = _im2col(x, P).astype(cdt)                              # (B, N, Kin)
    hm_cols = _im2col(expert_heatmap.astype(x.dtype), P).astype(cdt)  # (B, N, Khm)

    # Pre-transpose / flatten weights (bf16) so the kernel does plain row-major matmuls;
    # biases stay f32 (added to f32 accumulators). Attention scale folded into Wq/bq.
    scale = 1.0 / ((E // num_heads) ** 0.5)
    wp_t = params["w_patch"].reshape(E, Kin).T.astype(cdt)
    bp = params["b_patch"].reshape(1, E).astype(f32)
    wq_t = (params["wq"].T * scale).astype(cdt)
    bq = (params["bq"] * scale).reshape(1, E).astype(f32)
    wk_t = params["wk"].T.astype(cdt)
    bk = params["bk"].reshape(1, E).astype(f32)
    wv_t = params["wv"].T.astype(cdt)
    bv = params["bv"].reshape(1, E).astype(f32)
    wo_t = params["w_mha_out"].T.astype(cdt)
    bo = params["b_mha_out"].reshape(1, E).astype(f32)
    who_t = params["w_out_proj"].T.astype(cdt)
    bho = params["b_out_proj"].reshape(1, E).astype(f32)
    wt_flat = params["w_deconv"].reshape(E, Kout).astype(cdt)
    bt_flat = jnp.repeat(params["b_deconv"], P * P).reshape(1, Kout).astype(f32)

    bblk = _pick_block_batch(B, N)
    assert B % bblk == 0
    grid = (B // bblk,)

    flops = 2 * B * N * (2 * Kin * E + 5 * E * E + 2 * N * E + E * Kout)
    transcendentals = B * num_heads * N * (N + 1)
    bytes_accessed = (2 * (B * N * Kin + B * N * Khm + Kin * E + 5 * E * E + E * Kout)
                      + 4 * (B * N * Kout + 7 * E + Kout))
    cost = pl.CostEstimate(flops=flops, transcendentals=transcendentals,
                           bytes_accessed=bytes_accessed)

    # Grid-invariant weights/biases: single-buffered (their block index never changes).
    def wspec(shape):
        return pl.BlockSpec(shape, lambda b: (0, 0), pipeline_mode=pl.Buffered(1))

    out_cols = pl.pallas_call(
        functools.partial(_fused_kernel, num_heads=num_heads),
        out_shape=jax.ShapeDtypeStruct((B, N, Kout), x.dtype),
        grid=grid,
        in_specs=[
            pl.BlockSpec((bblk, N, Kin), lambda b: (b, 0, 0)),   # x_cols
            pl.BlockSpec((bblk, N, Khm), lambda b: (b, 0, 0)),   # 1-channel heatmap cols
            wspec((Kin, E)), wspec((1, E)),        # patchify
            wspec((E, E)), wspec((1, E)),          # Wq, bq (scale folded)
            wspec((E, E)), wspec((1, E)),          # Wk, bk
            wspec((E, E)), wspec((1, E)),          # Wv, bv
            wspec((E, E)), wspec((1, E)),          # MHA out_proj
            wspec((E, E)), wspec((1, E)),          # HeatmapAttention.out_proj
            wspec((E, Kout)), wspec((1, Kout)),    # unpatchify
        ],
        out_specs=pl.BlockSpec((bblk, N, Kout), lambda b: (b, 0, 0)),
        compiler_params=pltpu.CompilerParams(
            dimension_semantics=("parallel",),
            vmem_limit_bytes=64 * 1024 * 1024),
        cost_estimate=cost,
    )(x_cols, hm_cols, wp_t, bp, wq_t, bq, wk_t, bk, wv_t, bv,
      wo_t, bo, who_t, bho, wt_flat, bt_flat)

    # col2im: [B, N, C_out*P*P] -> [B, C_out, H, W]  (pure layout plumbing)
    img = out_cols.reshape(B, Hp, Wp, C_out, P, P)
    img = img.transpose(0, 3, 1, 4, 2, 5).reshape(B, C_out, Hp * P, Wp * P)
    return img


def _reference(x, expert_heatmap, params, *, patch_size, num_heads):
    """Pure-JAX reference following the PyTorch module op-for-op (f32)."""
    P = patch_size
    hm = jnp.broadcast_to(expert_heatmap, x.shape).astype(x.dtype)

    def patchify(inp):
        out = lax.conv_general_dilated(
            inp, params["w_patch"], window_strides=(P, P), padding="VALID",
            dimension_numbers=("NCHW", "OIHW", "NCHW"))
        return out + params["b_patch"][None, :, None, None]

    patches = patchify(x)                                # [B, E, Hp, Wp]
    B, E, Hp, Wp = patches.shape
    N = Hp * Wp
    patches = patches.transpose(0, 2, 3, 1).reshape(B, N, E)
    hpatches = patchify(hm * x).transpose(0, 2, 3, 1).reshape(B, N, E)

    def lin(z, w, b):
        return jnp.einsum("bnd,ed->bne", z, w) + b

    q = lin(hpatches, params["wq"], params["bq"])
    k = lin(patches, params["wk"], params["bk"])
    v = lin(patches, params["wv"], params["bv"])
    dh = E // num_heads

    def split(z):
        return z.reshape(B, N, num_heads, dh).transpose(0, 2, 1, 3)

    qh, kh, vh = split(q), split(k), split(v)
    s = jnp.einsum("bhqd,bhkd->bhqk", qh, kh) / (dh ** 0.5)
    a = jax.nn.softmax(s, axis=-1)
    ctx = jnp.einsum("bhqk,bhkd->bhqd", a, vh).transpose(0, 2, 1, 3).reshape(B, N, E)
    attn_out = lin(ctx, params["w_mha_out"], params["b_mha_out"])
    hout = lin(attn_out, params["w_out_proj"], params["b_out_proj"])

    # ConvTranspose2d(E, C_out, k=P, s=P): each patch expands independently.
    t = hout.transpose(0, 2, 1).reshape(B, E, Hp, Wp)
    C_out = params["w_deconv"].shape[1]
    y = jnp.einsum("behw,eoij->bohiwj", t, params["w_deconv"])
    y = y.reshape(B, C_out, Hp * P, Wp * P)
    return y + params["b_deconv"][None, :, None, None]


if __name__ == "__main__":
    key = jax.random.PRNGKey(0)
    # Small but representative: 64x64 image, 16x16 patches -> N=16, embed_dim=128
    # (lane-dense), 4 heads -> head_dim=32, batch 4 -> Bblk=2, grid=(2,).
    B, C_IN, IMG, P = 4, 3, 64, 16
    E, HEADS, C_OUT = 128, 4, 3

    keys = jax.random.split(key, 16)
    x = jax.random.normal(keys[0], (B, C_IN, IMG, IMG), dtype=jnp.float32)
    expert_heatmap = jax.random.uniform(keys[1], (B, 1, IMG, IMG), dtype=jnp.float32)

    def unif(k, shape, fan_in):
        lim = 1.0 / (fan_in ** 0.5)
        return jax.random.uniform(k, shape, jnp.float32, minval=-lim, maxval=lim)

    params = dict(
        w_patch=unif(keys[2], (E, C_IN, P, P), C_IN * P * P),    # Conv2d.weight
        b_patch=unif(keys[3], (E,), C_IN * P * P),               # Conv2d.bias
        wq=unif(keys[4], (E, E), E), bq=unif(keys[5], (E,), E),  # in_proj (q)
        wk=unif(keys[6], (E, E), E), bk=unif(keys[7], (E,), E),  # in_proj (k)
        wv=unif(keys[8], (E, E), E), bv=unif(keys[9], (E,), E),  # in_proj (v)
        w_mha_out=unif(keys[10], (E, E), E), b_mha_out=unif(keys[11], (E,), E),
        w_out_proj=unif(keys[12], (E, E), E), b_out_proj=unif(keys[13], (E,), E),
        w_deconv=unif(keys[14], (E, C_OUT, P, P), E),            # ConvTranspose2d.weight
        b_deconv=unif(keys[15], (C_OUT,), E),                    # ConvTranspose2d.bias
    )

    out = alpha_mask_encoder_mha_with_heatmap(
        x, expert_heatmap, params, patch_size=P, num_heads=HEADS)
    jax.block_until_ready(out)

    with jax.default_matmul_precision("float32"):
        ref = _reference(x, expert_heatmap, params, patch_size=P, num_heads=HEADS)

    assert out.shape == (B, C_OUT, IMG, IMG)
    # bf16 operands / f32 accumulation vs the f32 reference: tolerance re-validated.
    assert jnp.allclose(out, ref, atol=2e-2, rtol=2e-2), (
        f"mismatch vs reference, max abs diff = {jnp.max(jnp.abs(out - ref))}")

    print("KERNEL_OK")
</pallas_src>

<mosaic_0001>
module attributes {stable_mosaic.version = 11 : i64} {
  func.func @_fused_kernel(%arg0: i32, %arg1: memref<2x16x768xbf16, #tpu.memory_space<vmem>>, %arg2: memref<2x16x256xbf16, #tpu.memory_space<vmem>>, %arg3: memref<768x128xbf16, #tpu.memory_space<vmem>>, %arg4: memref<1x128xf32, #tpu.memory_space<vmem>>, %arg5: memref<128x128xbf16, #tpu.memory_space<vmem>>, %arg6: memref<1x128xf32, #tpu.memory_space<vmem>>, %arg7: memref<128x128xbf16, #tpu.memory_space<vmem>>, %arg8: memref<1x128xf32, #tpu.memory_space<vmem>>, %arg9: memref<128x128xbf16, #tpu.memory_space<vmem>>, %arg10: memref<1x128xf32, #tpu.memory_space<vmem>>, %arg11: memref<128x128xbf16, #tpu.memory_space<vmem>>, %arg12: memref<1x128xf32, #tpu.memory_space<vmem>>, %arg13: memref<128x128xbf16, #tpu.memory_space<vmem>>, %arg14: memref<1x128xf32, #tpu.memory_space<vmem>>, %arg15: memref<128x768xbf16, #tpu.memory_space<vmem>>, %arg16: memref<1x768xf32, #tpu.memory_space<vmem>>, %arg17: memref<2x16x768xf32, #tpu.memory_space<vmem>>) attributes {dimension_semantics = [#tpu.dimension_semantics<parallel>], iteration_bounds = array<i64: 2>, scalar_prefetch = 0 : i64, scratch_operands = 0 : i64, tpu.core_type = #tpu.core_type<tc>, window_params = [{transform_indices = @transform_0, window_bounds = array<i64: 2, 16, 768>}, {transform_indices = @transform_1, window_bounds = array<i64: 2, 16, 256>}, {pipeline_mode = #tpu.pipeline_mode<synchronous>, transform_indices = @transform_2, window_bounds = array<i64: 768, 128>}, {pipeline_mode = #tpu.pipeline_mode<synchronous>, transform_indices = @transform_3, window_bounds = array<i64: 1, 128>}, {pipeline_mode = #tpu.pipeline_mode<synchronous>, transform_indices = @transform_4, window_bounds = array<i64: 128, 128>}, {pipeline_mode = #tpu.pipeline_mode<synchronous>, transform_indices = @transform_5, window_bounds = array<i64: 1, 128>}, {pipeline_mode = #tpu.pipeline_mode<synchronous>, transform_indices = @transform_6, window_bounds = array<i64: 128, 128>}, {pipeline_mode = #tpu.pipeline_mode<synchronous>, transform_indices = @transform_7, window_bounds = array<i64: 1, 128>}, {pipeline_mode = #tpu.pipeline_mode<synchronous>, transform_indices = @transform_8, window_bounds = array<i64: 128, 128>}, {pipeline_mode = #tpu.pipeline_mode<synchronous>, transform_indices = @transform_9, window_bounds = array<i64: 1, 128>}, {pipeline_mode = #tpu.pipeline_mode<synchronous>, transform_indices = @transform_10, window_bounds = array<i64: 128, 128>}, {pipeline_mode = #tpu.pipeline_mode<synchronous>, transform_indices = @transform_11, window_bounds = array<i64: 1, 128>}, {pipeline_mode = #tpu.pipeline_mode<synchronous>, transform_indices = @transform_12, window_bounds = array<i64: 128, 128>}, {pipeline_mode = #tpu.pipeline_mode<synchronous>, transform_indices = @transform_13, window_bounds = array<i64: 1, 128>}, {pipeline_mode = #tpu.pipeline_mode<synchronous>, transform_indices = @transform_14, window_bounds = array<i64: 128, 768>}, {pipeline_mode = #tpu.pipeline_mode<synchronous>, transform_indices = @transform_15, window_bounds = array<i64: 1, 768>}, {transform_indices = @transform_16, window_bounds = array<i64: 2, 16, 768>}]} {
    %c0 = arith.constant 0 : index
    %c0_0 = arith.constant 0 : index
    %c0_1 = arith.constant 0 : index
    %0 = vector.load %arg1[%c0, %c0_0, %c0_1] : memref<2x16x768xbf16, #tpu.memory_space<vmem>>, vector<2x16x768xbf16>
    %1 = vector.shape_cast %0 : vector<2x16x768xbf16> to vector<32x768xbf16>
    %c0_2 = arith.constant 0 : index
    %c0_3 = arith.constant 0 : index
    %c0_4 = arith.constant 0 : index
    %2 = vector.load %arg2[%c0_2, %c0_3, %c0_4] : memref<2x16x256xbf16, #tpu.memory_space<vmem>>, vector<2x16x256xbf16>
    %3 = vector.shape_cast %2 : vector<2x16x256xbf16> to vector<32x256xbf16>
    %4 = tpu.concatenate %3, %3, %3 in 1 : vector<32x256xbf16>, vector<32x256xbf16>, vector<32x256xbf16> -> vector<32x768xbf16>
    %5 = arith.mulf %1, %4 : vector<32x768xbf16>
    %c0_5 = arith.constant 0 : index
    %c0_6 = arith.constant 0 : index
    %6 = vector.load %arg3[%c0_5, %c0_6] : memref<768x128xbf16, #tpu.memory_space<vmem>>, vector<768x128xbf16>
    %c0_7 = arith.constant 0 : index
    %c0_8 = arith.constant 0 : index
    %7 = vector.load %arg4[%c0_7, %c0_8] : memref<1x128xf32, #tpu.memory_space<vmem>>, vector<1x128xf32>
    %cst = arith.constant dense<0.000000e+00> : vector<32x128xf32>
    %8 = tpu.matmul %1, %6, %cst {dimension_numbers = #tpu.dot_dimension_numbers<[1], [0], [0], [1], [0, 0, 1, 1], [], []>} : vector<32x768xbf16>, vector<768x128xbf16>, vector<32x128xf32> -> vector<32x128xf32>
    %9 = vector.broadcast %7 : vector<1x128xf32> to vector<32x128xf32>
    %10 = arith.addf %8, %9 : vector<32x128xf32>
    %cst_9 = arith.constant dense<0.000000e+00> : vector<32x128xf32>
    %11 = tpu.matmul %5, %6, %cst_9 {dimension_numbers = #tpu.dot_dimension_numbers<[1], [0], [0], [1], [0, 0, 1, 1], [], []>} : vector<32x768xbf16>, vector<768x128xbf16>, vector<32x128xf32> -> vector<32x128xf32>
    %12 = vector.broadcast %7 : vector<1x128xf32> to vector<32x128xf32>
    %13 = arith.addf %11, %12 : vector<32x128xf32>
    %14 = arith.truncf %10 : vector<32x128xf32> to vector<32x128xbf16>
    %15 = arith.truncf %13 : vector<32x128xf32> to vector<32x128xbf16>
    %c0_10 = arith.constant 0 : index
    %c0_11 = arith.constant 0 : index
    %16 = vector.load %arg5[%c0_10, %c0_11] : memref<128x128xbf16, #tpu.memory_space<vmem>>, vector<128x128xbf16>
    %cst_12 = arith.constant dense<0.000000e+00> : vector<32x128xf32>
    %17 = tpu.matmul %15, %16, %cst_12 {dimension_numbers = #tpu.dot_dimension_numbers<[1], [0], [0], [1], [0, 0, 1, 1], [], []>} : vector<32x128xbf16>, vector<128x128xbf16>, vector<32x128xf32> -> vector<32x128xf32>
    %c0_13 = arith.constant 0 : index
    %c0_14 = arith.constant 0 : index
    %18 = vector.load %arg6[%c0_13, %c0_14] : memref<1x128xf32, #tpu.memory_space<vmem>>, vector<1x128xf32>
    %19 = vector.broadcast %18 : vector<1x128xf32> to vector<32x128xf32>
    %20 = arith.addf %17, %19 : vector<32x128xf32>
    %c0_15 = arith.constant 0 : index
    %c0_16 = arith.constant 0 : index
    %21 = vector.load %arg7[%c0_15, %c0_16] : memref<128x128xbf16, #tpu.memory_space<vmem>>, vector<128x128xbf16>
    %cst_17 = arith.constant dense<0.000000e+00> : vector<32x128xf32>
    %22 = tpu.matmul %14, %21, %cst_17 {dimension_numbers = #tpu.dot_dimension_numbers<[1], [0], [0], [1], [0, 0, 1, 1], [], []>} : vector<32x128xbf16>, vector<128x128xbf16>, vector<32x128xf32> -> vector<32x128xf32>
    %c0_18 = arith.constant 0 : index
    %c0_19 = arith.constant 0 : index
    %23 = vector.load %arg8[%c0_18, %c0_19] : memref<1x128xf32, #tpu.memory_space<vmem>>, vector<1x128xf32>
    %24 = vector.broadcast %23 : vector<1x128xf32> to vector<32x128xf32>
    %25 = arith.addf %22, %24 : vector<32x128xf32>
    %c0_20 = arith.constant 0 : index
    %c0_21 = arith.constant 0 : index
    %26 = vector.load %arg9[%c0_20, %c0_21] : memref<128x128xbf16, #tpu.memory_space<vmem>>, vector<128x128xbf16>
    %cst_22 = arith.constant dense<0.000000e+00> : vector<32x128xf32>
    %27 = tpu.matmul %14, %26, %cst_22 {dimension_numbers = #tpu.dot_dimension_numbers<[1], [0], [0], [1], [0, 0, 1, 1], [], []>} : vector<32x128xbf16>, vector<128x128xbf16>, vector<32x128xf32> -> vector<32x128xf32>
    %c0_23 = arith.constant 0 : index
    %c0_24 = arith.constant 0 : index
    %28 = vector.load %arg10[%c0_23, %c0_24] : memref<1x128xf32, #tpu.memory_space<vmem>>, vector<1x128xf32>
    %29 = vector.broadcast %28 : vector<1x128xf32> to vector<32x128xf32>
    %30 = arith.addf %27, %29 : vector<32x128xf32>
    %31 = vector.shape_cast %20 : vector<32x128xf32> to vector<2x16x128xf32>
    %32 = arith.truncf %31 : vector<2x16x128xf32> to vector<2x16x128xbf16>
    %33 = vector.shape_cast %25 : vector<32x128xf32> to vector<2x16x128xf32>
    %34 = arith.truncf %33 : vector<2x16x128xf32> to vector<2x16x128xbf16>
    %35 = vector.shape_cast %30 : vector<32x128xf32> to vector<2x16x128xf32>
    %36 = arith.truncf %35 : vector<2x16x128xf32> to vector<2x16x128xbf16>
    %c0_25 = arith.constant 0 : index
    %c0_26 = arith.constant 0 : index
    %37 = vector.load %arg11[%c0_25, %c0_26] : memref<128x128xbf16, #tpu.memory_space<vmem>>, vector<128x128xbf16>
    %cst_27 = arith.constant 0.000000e+00 : f32
    %38 = vector.broadcast %cst_27 : f32 to vector<32x128xf32>
    %39 = vector.extract_strided_slice %32 {offsets = [0, 0, 0], sizes = [2, 16, 32], strides = [1, 1, 1]} : vector<2x16x128xbf16> to vector<2x16x32xbf16>
    %40 = vector.extract_strided_slice %34 {offsets = [0, 0, 0], sizes = [2, 16, 32], strides = [1, 1, 1]} : vector<2x16x128xbf16> to vector<2x16x32xbf16>
    %41 = vector.extract_strided_slice %36 {offsets = [0, 0, 0], sizes = [2, 16, 32], strides = [1, 1, 1]} : vector<2x16x128xbf16> to vector<2x16x32xbf16>
    %cst_28 = arith.constant dense<0.000000e+00> : vector<2x16x16xf32>
    %42 = tpu.matmul %39, %40, %cst_28 {dimension_numbers = #tpu.dot_dimension_numbers<[2], [2], [1], [1], [0, 0, 0, 1, 1, 1], [0], [0]>} : vector<2x16x32xbf16>, vector<2x16x32xbf16>, vector<2x16x16xf32> -> vector<2x16x16xf32>
    %cst_29 = arith.constant dense<0xFF800000> : vector<2x16xf32>
    %43 = vector.multi_reduction <maximumf>, %42, %cst_29 [2] : vector<2x16x16xf32> to vector<2x16xf32>
    %44 = vector.shape_cast %43 : vector<2x16xf32> to vector<2x16x1xf32>
    %45 = vector.broadcast %44 : vector<2x16x1xf32> to vector<2x16x16xf32>
    %46 = arith.subf %42, %45 : vector<2x16x16xf32>
    %47 = math.exp %46 : vector<2x16x16xf32>
    %cst_30 = arith.constant dense<0.000000e+00> : vector<2x16xf32>
    %48 = vector.multi_reduction <add>, %47, %cst_30 [2] : vector<2x16x16xf32> to vector<2x16xf32>
    %49 = vector.shape_cast %48 : vector<2x16xf32> to vector<2x16x1xf32>
    %50 = arith.truncf %47 : vector<2x16x16xf32> to vector<2x16x16xbf16>
    %cst_31 = arith.constant dense<0.000000e+00> : vector<2x16x32xf32>
    %51 = tpu.matmul %50, %41, %cst_31 {dimension_numbers = #tpu.dot_dimension_numbers<[2], [1], [1], [2], [0, 0, 0, 1, 1, 2], [0], [0]>} : vector<2x16x16xbf16>, vector<2x16x32xbf16>, vector<2x16x32xf32> -> vector<2x16x32xf32>
    %52 = tpu.reciprocal %49 {approx = true} : vector<2x16x1xf32> -> vector<2x16x1xf32>
    %53 = vector.broadcast %52 : vector<2x16x1xf32> to vector<2x16x32xf32>
    %54 = arith.mulf %51, %53 : vector<2x16x32xf32>
    %55 = vector.shape_cast %54 : vector<2x16x32xf32> to vector<32x32xf32>
    %56 = arith.truncf %55 : vector<32x32xf32> to vector<32x32xbf16>
    %57 = vector.extract_strided_slice %37 {offsets = [0, 0], sizes = [32, 128], strides = [1, 1]} : vector<128x128xbf16> to vector<32x128xbf16>
    %cst_32 = arith.constant dense<0.000000e+00> : vector<32x128xf32>
    %58 = tpu.matmul %56, %57, %cst_32 {dimension_numbers = #tpu.dot_dimension_numbers<[1], [0], [0], [1], [0, 0, 1, 1], [], []>} : vector<32x32xbf16>, vector<32x128xbf16>, vector<32x128xf32> -> vector<32x128xf32>
    %59 = arith.addf %38, %58 : vector<32x128xf32>
    %60 = vector.extract_strided_slice %32 {offsets = [0, 0, 32], sizes = [2, 16, 32], strides = [1, 1, 1]} : vector<2x16x128xbf16> to vector<2x16x32xbf16>
    %61 = vector.extract_strided_slice %34 {offsets = [0, 0, 32], sizes = [2, 16, 32], strides = [1, 1, 1]} : vector<2x16x128xbf16> to vector<2x16x32xbf16>
    %62 = vector.extract_strided_slice %36 {offsets = [0, 0, 32], sizes = [2, 16, 32], strides = [1, 1, 1]} : vector<2x16x128xbf16> to vector<2x16x32xbf16>
    %cst_33 = arith.constant dense<0.000000e+00> : vector<2x16x16xf32>
    %63 = tpu.matmul %60, %61, %cst_33 {dimension_numbers = #tpu.dot_dimension_numbers<[2], [2], [1], [1], [0, 0, 0, 1, 1, 1], [0], [0]>} : vector<2x16x32xbf16>, vector<2x16x32xbf16>, vector<2x16x16xf32> -> vector<2x16x16xf32>
    %cst_34 = arith.constant dense<0xFF800000> : vector<2x16xf32>
    %64 = vector.multi_reduction <maximumf>, %63, %cst_34 [2] : vector<2x16x16xf32> to vector<2x16xf32>
    %65 = vector.shape_cast %64 : vector<2x16xf32> to vector<2x16x1xf32>
    %66 = vector.broadcast %65 : vector<2x16x1xf32> to vector<2x16x16xf32>
    %67 = arith.subf %63, %66 : vector<2x16x16xf32>
    %68 = math.exp %67 : vector<2x16x16xf32>
    %cst_35 = arith.constant dense<0.000000e+00> : vector<2x16xf32>
    %69 = vector.multi_reduction <add>, %68, %cst_35 [2] : vector<2x16x16xf32> to vector<2x16xf32>
    %70 = vector.shape_cast %69 : vector<2x16xf32> to vector<2x16x1xf32>
    %71 = arith.truncf %68 : vector<2x16x16xf32> to vector<2x16x16xbf16>
    %cst_36 = arith.constant dense<0.000000e+00> : vector<2x16x32xf32>
    %72 = tpu.matmul %71, %62, %cst_36 {dimension_numbers = #tpu.dot_dimension_numbers<[2], [1], [1], [2], [0, 0, 0, 1, 1, 2], [0], [0]>} : vector<2x16x16xbf16>, vector<2x16x32xbf16>, vector<2x16x32xf32> -> vector<2x16x32xf32>
    %73 = tpu.reciprocal %70 {approx = true} : vector<2x16x1xf32> -> vector<2x16x1xf32>
    %74 = vector.broadcast %73 : vector<2x16x1xf32> to vector<2x16x32xf32>
    %75 = arith.mulf %72, %74 : vector<2x16x32xf32>
    %76 = vector.shape_cast %75 : vector<2x16x32xf32> to vector<32x32xf32>
    %77 = arith.truncf %76 : vector<32x32xf32> to vector<32x32xbf16>
    %78 = vector.extract_strided_slice %37 {offsets = [32, 0], sizes = [32, 128], strides = [1, 1]} : vector<128x128xbf16> to vector<32x128xbf16>
    %cst_37 = arith.constant dense<0.000000e+00> : vector<32x128xf32>
    %79 = tpu.matmul %77, %78, %cst_37 {dimension_numbers = #tpu.dot_dimension_numbers<[1], [0], [0], [1], [0, 0, 1, 1], [], []>} : vector<32x32xbf16>, vector<32x128xbf16>, vector<32x128xf32> -> vector<32x128xf32>
    %80 = arith.addf %59, %79 : vector<32x128xf32>
    %81 = vector.extract_strided_slice %32 {offsets = [0, 0, 64], sizes = [2, 16, 32], strides = [1, 1, 1]} : vector<2x16x128xbf16> to vector<2x16x32xbf16>
    %82 = vector.extract_strided_slice %34 {offsets = [0, 0, 64], sizes = [2, 16, 32], strides = [1, 1, 1]} : vector<2x16x128xbf16> to vector<2x16x32xbf16>
    %83 = vector.extract_strided_slice %36 {offsets = [0, 0, 64], sizes = [2, 16, 32], strides = [1, 1, 1]} : vector<2x16x128xbf16> to vector<2x16x32xbf16>
    %cst_38 = arith.constant dense<0.000000e+00> : vector<2x16x16xf32>
    %84 = tpu.matmul %81, %82, %cst_38 {dimension_numbers = #tpu.dot_dimension_numbers<[2], [2], [1], [1], [0, 0, 0, 1, 1, 1], [0], [0]>} : vector<2x16x32xbf16>, vector<2x16x32xbf16>, vector<2x16x16xf32> -> vector<2x16x16xf32>
    %cst_39 = arith.constant dense<0xFF800000> : vector<2x16xf32>
    %85 = vector.multi_reduction <maximumf>, %84, %cst_39 [2] : vector<2x16x16xf32> to vector<2x16xf32>
    %86 = vector.shape_cast %85 : vector<2x16xf32> to vector<2x16x1xf32>
    %87 = vector.broadcast %86 : vector<2x16x1xf32> to vector<2x16x16xf32>
    %88 = arith.subf %84, %87 : vector<2x16x16xf32>
    %89 = math.exp %88 : vector<2x16x16xf32>
    %cst_40 = arith.constant dense<0.000000e+00> : vector<2x16xf32>
    %90 = vector.multi_reduction <add>, %89, %cst_40 [2] : vector<2x16x16xf32> to vector<2x16xf32>
    %91 = vector.shape_cast %90 : vector<2x16xf32> to vector<2x16x1xf32>
    %92 = arith.truncf %89 : vector<2x16x16xf32> to vector<2x16x16xbf16>
    %cst_41 = arith.constant dense<0.000000e+00> : vector<2x16x32xf32>
    %93 = tpu.matmul %92, %83, %cst_41 {dimension_numbers = #tpu.dot_dimension_numbers<[2], [1], [1], [2], [0, 0, 0, 1, 1, 2], [0], [0]>} : vector<2x16x16xbf16>, vector<2x16x32xbf16>, vector<2x16x32xf32> -> vector<2x16x32xf32>
    %94 = tpu.reciprocal %91 {approx = true} : vector<2x16x1xf32> -> vector<2x16x1xf32>
    %95 = vector.broadcast %94 : vector<2x16x1xf32> to vector<2x16x32xf32>
    %96 = arith.mulf %93, %95 : vector<2x16x32xf32>
    %97 = vector.shape_cast %96 : vector<2x16x32xf32> to vector<32x32xf32>
    %98 = arith.truncf %97 : vector<32x32xf32> to vector<32x32xbf16>
    %99 = vector.extract_strided_slice %37 {offsets = [64, 0], sizes = [32, 128], strides = [1, 1]} : vector<128x128xbf16> to vector<32x128xbf16>
    %cst_42 = arith.constant dense<0.000000e+00> : vector<32x128xf32>
    %100 = tpu.matmul %98, %99, %cst_42 {dimension_numbers = #tpu.dot_dimension_numbers<[1], [0], [0], [1], [0, 0, 1, 1], [], []>} : vector<32x32xbf16>, vector<32x128xbf16>, vector<32x128xf32> -> vector<32x128xf32>
    %101 = arith.addf %80, %100 : vector<32x128xf32>
    %102 = vector.extract_strided_slice %32 {offsets = [0, 0, 96], sizes = [2, 16, 32], strides = [1, 1, 1]} : vector<2x16x128xbf16> to vector<2x16x32xbf16>
    %103 = vector.extract_strided_slice %34 {offsets = [0, 0, 96], sizes = [2, 16, 32], strides = [1, 1, 1]} : vector<2x16x128xbf16> to vector<2x16x32xbf16>
    %104 = vector.extract_strided_slice %36 {offsets = [0, 0, 96], sizes = [2, 16, 32], strides = [1, 1, 1]} : vector<2x16x128xbf16> to vector<2x16x32xbf16>
    %cst_43 = arith.constant dense<0.000000e+00> : vector<2x16x16xf32>
    %105 = tpu.matmul %102, %103, %cst_43 {dimension_numbers = #tpu.dot_dimension_numbers<[2], [2], [1], [1], [0, 0, 0, 1, 1, 1], [0], [0]>} : vector<2x16x32xbf16>, vector<2x16x32xbf16>, vector<2x16x16xf32> -> vector<2x16x16xf32>
    %cst_44 = arith.constant dense<0xFF800000> : vector<2x16xf32>
    %106 = vector.multi_reduction <maximumf>, %105, %cst_44 [2] : vector<2x16x16xf32> to vector<2x16xf32>
    %107 = vector.shape_cast %106 : vector<2x16xf32> to vector<2x16x1xf32>
    %108 = vector.broadcast %107 : vector<2x16x1xf32> to vector<2x16x16xf32>
    %109 = arith.subf %105, %108 : vector<2x16x16xf32>
    %110 = math.exp %109 : vector<2x16x16xf32>
    %cst_45 = arith.constant dense<0.000000e+00> : vector<2x16xf32>
    %111 = vector.multi_reduction <add>, %110, %cst_45 [2] : vector<2x16x16xf32> to vector<2x16xf32>
    %112 = vector.shape_cast %111 : vector<2x16xf32> to vector<2x16x1xf32>
    %113 = arith.truncf %110 : vector<2x16x16xf32> to vector<2x16x16xbf16>
    %cst_46 = arith.constant dense<0.000000e+00> : vector<2x16x32xf32>
    %114 = tpu.matmul %113, %104, %cst_46 {dimension_numbers = #tpu.dot_dimension_numbers<[2], [1], [1], [2], [0, 0, 0, 1, 1, 2], [0], [0]>} : vector<2x16x16xbf16>, vector<2x16x32xbf16>, vector<2x16x32xf32> -> vector<2x16x32xf32>
    %115 = tpu.reciprocal %112 {approx = true} : vector<2x16x1xf32> -> vector<2x16x1xf32>
    %116 = vector.broadcast %115 : vector<2x16x1xf32> to vector<2x16x32xf32>
    %117 = arith.mulf %114, %116 : vector<2x16x32xf32>
    %118 = vector.shape_cast %117 : vector<2x16x32xf32> to vector<32x32xf32>
    %119 = arith.truncf %118 : vector<32x32xf32> to vector<32x32xbf16>
    %120 = vector.extract_strided_slice %37 {offsets = [96, 0], sizes = [32, 128], strides = [1, 1]} : vector<128x128xbf16> to vector<32x128xbf16>
    %cst_47 = arith.constant dense<0.000000e+00> : vector<32x128xf32>
    %121 = tpu.matmul %119, %120, %cst_47 {dimension_numbers = #tpu.dot_dimension_numbers<[1], [0], [0], [1], [0, 0, 1, 1], [], []>} : vector<32x32xbf16>, vector<32x128xbf16>, vector<32x128xf32> -> vector<32x128xf32>
    %122 = arith.addf %101, %121 : vector<32x128xf32>
    %c0_48 = arith.constant 0 : index
    %c0_49 = arith.constant 0 : index
    %123 = vector.load %arg12[%c0_48, %c0_49] : memref<1x128xf32, #tpu.memory_space<vmem>>, vector<1x128xf32>
    %124 = vector.broadcast %123 : vector<1x128xf32> to vector<32x128xf32>
    %125 = arith.addf %122, %124 : vector<32x128xf32>
    %126 = arith.truncf %125 : vector<32x128xf32> to vector<32x128xbf16>
    %c0_50 = arith.constant 0 : index
    %c0_51 = arith.constant 0 : index
    %127 = vector.load %arg13[%c0_50, %c0_51] : memref<128x128xbf16, #tpu.memory_space<vmem>>, vector<128x128xbf16>
    %cst_52 = arith.constant dense<0.000000e+00> : vector<32x128xf32>
    %128 = tpu.matmul %126, %127, %cst_52 {dimension_numbers = #tpu.dot_dimension_numbers<[1], [0], [0], [1], [0, 0, 1, 1], [], []>} : vector<32x128xbf16>, vector<128x128xbf16>, vector<32x128xf32> -> vector<32x128xf32>
    %c0_53 = arith.constant 0 : index
    %c0_54 = arith.constant 0 : index
    %129 = vector.load %arg14[%c0_53, %c0_54] : memref<1x128xf32, #tpu.memory_space<vmem>>, vector<1x128xf32>
    %130 = vector.broadcast %129 : vector<1x128xf32> to vector<32x128xf32>
    %131 = arith.addf %128, %130 : vector<32x128xf32>
    %132 = arith.truncf %131 : vector<32x128xf32> to vector<32x128xbf16>
    %c0_55 = arith.constant 0 : index
    %c0_56 = arith.constant 0 : index
    %133 = vector.load %arg15[%c0_55, %c0_56] : memref<128x768xbf16, #tpu.memory_space<vmem>>, vector<128x768xbf16>
    %cst_57 = arith.constant dense<0.000000e+00> : vector<32x768xf32>
    %134 = tpu.matmul %132, %133, %cst_57 {dimension_numbers = #tpu.dot_dimension_numbers<[1], [0], [0], [1], [0, 0, 1, 1], [], []>} : vector<32x128xbf16>, vector<128x768xbf16>, vector<32x768xf32> -> vector<32x768xf32>
    %c0_58 = arith.constant 0 : index
    %c0_59 = arith.constant 0 : index
    %135 = vector.load %arg16[%c0_58, %c0_59] : memref<1x768xf32, #tpu.memory_space<vmem>>, vector<1x768xf32>
    %136 = vector.broadcast %135 : vector<1x768xf32> to vector<32x768xf32>
    %137 = arith.addf %134, %136 : vector<32x768xf32>
    %138 = vector.shape_cast %137 : vector<32x768xf32> to vector<2x16x768xf32>
    %c0_60 = arith.constant 0 : index
    %c0_61 = arith.constant 0 : index
    %c0_62 = arith.constant 0 : index
    %139 = vector.load %arg17[%c0_60, %c0_61, %c0_62] : memref<2x16x768xf32, #tpu.memory_space<vmem>>, vector<2x16x768xf32>
    tpu.vector_store %arg17[%c0_60, %c0_61, %c0_62], %138 {strides = array<i32>} : memref<2x16x768xf32, #tpu.memory_space<vmem>>, vector<2x16x768xf32>,
    return
  }
  func.func @transform_0(%arg0: i32) -> (i32, i32, i32) {
    %c0_i32 = arith.constant 0 : i32
    %c0_i32_0 = arith.constant 0 : i32
    %c0_i32_1 = arith.constant 0 : i32
    return %arg0, %c0_i32, %c0_i32_0 : i32, i32, i32
  }
  func.func @transform_1(%arg0: i32) -> (i32, i32, i32) {
    %c0_i32 = arith.constant 0 : i32
    %c0_i32_0 = arith.constant 0 : i32
    %c0_i32_1 = arith.constant 0 : i32
    return %arg0, %c0_i32, %c0_i32_0 : i32, i32, i32
  }
  func.func @transform_2(%arg0: i32) -> (i32, i32) {
    %c0_i32 = arith.constant 0 : i32
    %c0_i32_0 = arith.constant 0 : i32
    %c0_i32_1 = arith.constant 0 : i32
    return %c0_i32, %c0_i32_0 : i32, i32
  }
  func.func @transform_3(%arg0: i32) -> (i32, i32) {
    %c0_i32 = arith.constant 0 : i32
    %c0_i32_0 = arith.constant 0 : i32
    %c0_i32_1 = arith.constant 0 : i32
    return %c0_i32, %c0_i32_0 : i32, i32
  }
  func.func @transform_4(%arg0: i32) -> (i32, i32) {
    %c0_i32 = arith.constant 0 : i32
    %c0_i32_0 = arith.constant 0 : i32
    %c0_i32_1 = arith.constant 0 : i32
    return %c0_i32, %c0_i32_0 : i32, i32
  }
  func.func @transform_5(%arg0: i32) -> (i32, i32) {
    %c0_i32 = arith.constant 0 : i32
    %c0_i32_0 = arith.constant 0 : i32
    %c0_i32_1 = arith.constant 0 : i32
    return %c0_i32, %c0_i32_0 : i32, i32
  }
  func.func @transform_6(%arg0: i32) -> (i32, i32) {
    %c0_i32 = arith.constant 0 : i32
    %c0_i32_0 = arith.constant 0 : i32
    %c0_i32_1 = arith.constant 0 : i32
    return %c0_i32, %c0_i32_0 : i32, i32
  }
  func.func @transform_7(%arg0: i32) -> (i32, i32) {
    %c0_i32 = arith.constant 0 : i32
    %c0_i32_0 = arith.constant 0 : i32
    %c0_i32_1 = arith.constant 0 : i32
    return %c0_i32, %c0_i32_0 : i32, i32
  }
  func.func @transform_8(%arg0: i32) -> (i32, i32) {
    %c0_i32 = arith.constant 0 : i32
    %c0_i32_0 = arith.constant 0 : i32
    %c0_i32_1 = arith.constant 0 : i32
    return %c0_i32, %c0_i32_0 : i32, i32
  }
  func.func @transform_9(%arg0: i32) -> (i32, i32) {
    %c0_i32 = arith.constant 0 : i32
    %c0_i32_0 = arith.constant 0 : i32
    %c0_i32_1 = arith.constant 0 : i32
    return %c0_i32, %c0_i32_0 : i32, i32
  }
  func.func @transform_10(%arg0: i32) -> (i32, i32) {
    %c0_i32 = arith.constant 0 : i32
    %c0_i32_0 = arith.constant 0 : i32
    %c0_i32_1 = arith.constant 0 : i32
    return %c0_i32, %c0_i32_0 : i32, i32
  }
  func.func @transform_11(%arg0: i32) -> (i32, i32) {
    %c0_i32 = arith.constant 0 : i32
    %c0_i32_0 = arith.constant 0 : i32
    %c0_i32_1 = arith.constant 0 : i32
    return %c0_i32, %c0_i32_0 : i32, i32
  }
  func.func @transform_12(%arg0: i32) -> (i32, i32) {
    %c0_i32 = arith.constant 0 : i32
    %c0_i32_0 = arith.constant 0 : i32
    %c0_i32_1 = arith.constant 0 : i32
    return %c0_i32, %c0_i32_0 : i32, i32
  }
  func.func @transform_13(%arg0: i32) -> (i32, i32) {
    %c0_i32 = arith.constant 0 : i32
    %c0_i32_0 = arith.constant 0 : i32
    %c0_i32_1 = arith.constant 0 : i32
    return %c0_i32, %c0_i32_0 : i32, i32
  }
  func.func @transform_14(%arg0: i32) -> (i32, i32) {
    %c0_i32 = arith.constant 0 : i32
    %c0_i32_0 = arith.constant 0 : i32
    %c0_i32_1 = arith.constant 0 : i32
    return %c0_i32, %c0_i32_0 : i32, i32
  }
  func.func @transform_15(%arg0: i32) -> (i32, i32) {
    %c0_i32 = arith.constant 0 : i32
    %c0_i32_0 = arith.constant 0 : i32
    %c0_i32_1 = arith.constant 0 : i32
    return %c0_i32, %c0_i32_0 : i32, i32
  }
  func.func @transform_16(%arg0: i32) -> (i32, i32, i32) {
    %c0_i32 = arith.constant 0 : i32
    %c0_i32_0 = arith.constant 0 : i32
    %c0_i32_1 = arith.constant 0 : i32
    return %arg0, %c0_i32, %c0_i32_0 : i32, i32, i32
  }
}

</mosaic_0001>

<bundles_post_ra>
// kernel: alpha_mask_encoder_mha_with_heatmap.1
= control target key start
LH: loop header
LB: loop body
LE: loop exit
PB: predicated region body
PF: predicated region fallthrough
CT: control target
= control target key end

     0   :  { %s7031_s0 = inlined_call_operand.hbm [shape: bf16[4,16,768], index: 0, kind: input, shape index: {}]   ;;  %s7032_s1 = inlined_call_operand.hbm [shape: bf16[4,16,256], index: 1, kind: input, shape index: {}]   ;;  %s7033_s2 = inlined_call_operand.hbm [shape: bf16[768,128], index: 2, kind: input, shape index: {}]   ;;  %s7034_s3 = inlined_call_operand.hbm [shape: f32[1,128], index: 3, kind: input, shape index: {}]   ;;  %s7035_s4 = inlined_call_operand.hbm [shape: bf16[128,128], index: 4, kind: input, shape index: {}]   ;;  %s7036_s5 = inlined_call_operand.hbm [shape: f32[1,128], index: 5, kind: input, shape index: {}]   ;;  %s7037_s6 = inlined_call_operand.hbm [shape: bf16[128,128], index: 6, kind: input, shape index: {}]   ;;  %s7038_s7 = inlined_call_operand.hbm [shape: f32[1,128], index: 7, kind: input, shape index: {}]   ;;  %s7039_s8 = inlined_call_operand.hbm [shape: bf16[128,128], index: 8, kind: input, shape index: {}]   ;;  %s7040_s9 = inlined_call_operand.hbm [shape: f32[1,128], index: 9, kind: input, shape index: {}]   ;;  %s7041_s10 = inlined_call_operand.hbm [shape: bf16[128,128], index: 10, kind: input, shape index: {}]   ;;  %s7042_s11 = inlined_call_operand.hbm [shape: f32[1,128], index: 11, kind: input, shape index: {}]   ;;  %s7043_s12 = inlined_call_operand.hbm [shape: bf16[128,128], index: 12, kind: input, shape index: {}]   ;;  %s7044_s13 = inlined_call_operand.hbm [shape: f32[1,128], index: 13, kind: input, shape index: {}]   ;;  %s7045_s14 = inlined_call_operand.hbm [shape: bf16[128,768], index: 14, kind: input, shape index: {}]   ;;  %s7046_s15 = inlined_call_operand.hbm [shape: f32[1,768], index: 15, kind: input, shape index: {}]   ;;  %s7047_s16 = inlined_call_operand.hbm [shape: f32[4,16,768], index: 16, kind: output, shape index: {}]  }
   0x1   :  { %7064 = sst [smem:[#allocation45_spill]] %s7031_s0 }
   0x2   :  { %7065 = sst [smem:[#allocation46_spill]] %s7032_s1 }
   0x3   :  { %7066 = sst [smem:[#allocation47_spill]] %s7033_s2 }
   0x4   :  { %7067 = sst [smem:[#allocation48_spill]] %s7034_s3 }
   0x5   :  { %7068 = sst [smem:[#allocation49_spill]] %s7035_s4 }
   0x6   :  { %7069 = sst [smem:[#allocation50_spill]] %s7036_s5 }
   0x7   :  { %7070 = sst [smem:[#allocation51_spill]] %s7037_s6 }
   0x8   :  { %7071 = sst [smem:[#allocation52_spill]] %s7038_s7 }
   0x9   :  { %7072 = sst [smem:[#allocation53_spill]] %s7039_s8 }
   0xa   :  { %7073 = sst [smem:[#allocation54_spill]] %s7040_s9 }
   0xb   :  { %7074 = sst [smem:[#allocation55_spill]] %s7047_s16 }
   0xc   :  { %21 = vsyncpa [#allocation3], 0 }
   0xd   :  { %23 = vsyncpa [#allocation3 + $0x1], 0 }
   0xe   :  { %24 = vsyncpa [#allocation6], 0 }
   0xf   :  { %26 = vsyncpa [#allocation6 + $0x1], 0 }
  0x10   :  { %27 = vsyncpa [#allocation9], 0 }
  0x11   :  { %28 = vsyncpa [#allocation12], 0 }
  0x12   :  { %29 = vsyncpa [#allocation15], 0 }
  0x13   :  { %30 = vsyncpa [#allocation18], 0 }
  0x14   :  { %31 = vsyncpa [#allocation21], 0 }
  0x15   :  { %32 = vsyncpa [#allocation24], 0 }
  0x16   :  { %33 = vsyncpa [#allocation27], 0 }
  0x17   :  { %34 = vsyncpa [#allocation4], 0 }
  0x18   :  { %36 = vsyncpa [#allocation4 + $0x1], 0  ;;  %s5974_s21 = smov 0   ;;  %s5976_s22 = smov 0  }
  0x19   :  { %s5978_s23 = smov 0   ;;  %s5980_s24 = smov 0  }
  0x1a LB: > { %7075 = sst [smem:[#allocation40_spill]] %s5844_s21  ;;  %s5858_s25 = smov [#allocation7]   ;;  %s5856_s24 = sphi %s5980_s24, %s7134_s24   ;;  %s5852_s23 = sphi %s5978_s23, %s7133_s23   ;;  %s5848_s22 = sphi %s5976_s22, %s7132_s22   ;;  %s5844_s21 = sphi %s5974_s21, %s7131_s21  }
  0x1b   : > { %7076 = sst [smem:[#allocation41_spill]] %s5848_s22  ;;  %s431_s26 = sshll.u32 %s5858_s25, 4  ;;  %s6000_s26 = int_to_ptr.vmem [resolvable:$true] %s431_s26 }
  0x1c   : > { %7077 = sst [smem:[#allocation42_spill]] %s5852_s23  ;;  %s5995_s27 = sadd.s32 4294967295, %s5856_s24  }
  0x1d   : > { %7078 = sst [smem:[#allocation43_spill]] %s5995_s27  ;;  %p4143_p0 = scmp.ge.s32.totalorder %s5856_s24, 1 }
  0x1e   : > { %p7059_p1 = scmp.eq.s32.totalorder %s5995_s27, 0  ;;  %p419_p2 = scmp.lt.s32.totalorder %s5856_s24, 3 }
  0x1f   : > { %s5859_s29 = smov [#allocation8]   ;;  %s5860_s17 = smov [#allocation11]  }
  0x20   : > { %p6002_p3 = pnand %p4143_p0, %p419_p2  ;;  %s445_s30 = sshll.u32 %s5859_s29, 4  ;;  %s6015_s30 = int_to_ptr.vmem [resolvable:$true] %s445_s30 }
  0x21   : > { %s469_s18 = sshll.u32 %s5860_s17, 4  ;;  %s7082_s2 = sld [smem:[#allocation47_spill]]  ;;  %s6017_s18 = int_to_ptr.vmem [resolvable:$true] %s469_s18 }
  0x22   : > { %s7079_s28 = scalar_select %p6002_p3, 1, 0 }
  0x23   : > { %p4922_p5 = pneg %p6002_p3 }
  0x24   : > { %7080 = sst [smem:[#allocation44_spill]] %s7079_s28 }
  0x25   : > { %p6011_p6 = pnand %p4922_p5, %p7059_p1 }
  0x27   : > { %s5302_s25 = scalar_lea.hbm %s7082_s2, 6144  ;;  %p6027_p8 = pneg %p6011_p6 }
  0x28   : > { %p5303_p7 = scmp.ne.s32.totalorder %s7082_s2, %s5302_s25  ;;  %p5309_p11 = scmp.lt.u32.totalorder %s5302_s25, %s7082_s2 }
  0x2a   : > { %p5305_p9 = pnand %p6027_p8, %p5303_p7 }
  0x2c   : > { %p5306_p10 = pneg %p5305_p9 }
  0x2e   : > { %p5311_p12 = pnand %p5309_p11, %p5306_p10 }
  0x30   : > { %5314 = shalt.err (!%p5311_p12)
}
  0x31   : > { %s5315_s16 = scalar_lea.vmem %s6000_s26, 6144  ;;  %p5323_p5 = scmp.lt.s32.totalorder %s6000_s26, %s6000_s26 }
  0x32   : > { %p5316_p13 = scmp.ne.s32.totalorder %s6000_s26, %s5315_s16  ;;  %p5324_p4 = scmp.lt.s32.totalorder %s5315_s16, %s5315_s16 }
  0x34   : > { %p5318_p0 = pnand %p5316_p13, %p6027_p8  ;;  %p5325_p7 = por %p5324_p4, %p5323_p5 }
  0x36   : > { %p5319_p2 = pneg %p5318_p0 }
  0x38   : > { %p5326_p9 = pnand %p5325_p7, %p5319_p2 }
  0x3a   : > { %5329 = shalt.err (!%p5326_p9)
}
  0x3b   : > { %s7057_s28 = smov 64   ;;  %s5862_s1 = smov 4  }
  0x3c   : > { %4925 = dma.hbm_to_vmem [thread:$0]  (!%p6011_p6), %s7082_s2, 6144, %s6000_s26, [#allocation6], %s7057_s28, %s7057_s28, %s5862_s1  }
  0x3d   : > { %s7084_s3 = sld [smem:[#allocation48_spill]] }
  0x43   : > { %s5330_s16 = scalar_lea.hbm %s7084_s3, 16 }
  0x44   : > { %p5331_p4 = scmp.ne.s32.totalorder %s7084_s3, %s5330_s16  ;;  %p5337_p12 = scmp.lt.u32.totalorder %s5330_s16, %s7084_s3 }
  0x46   : > { %p5333_p10 = pnand %p5331_p4, %p6027_p8 }
  0x48   : > { %p5334_p11 = pneg %p5333_p10 }
  0x4a   : > { %p5339_p13 = pnand %p5337_p12, %p5334_p11 }
  0x4c   : > { %5342 = shalt.err (!%p5339_p13)
}
  0x4d   : > { %s5343_s26 = scalar_lea.vmem %s6015_s30, 16  ;;  %s5350_s21 = scalar_lea.vmem %s6015_s30, 32 }
  0x4e   : > { %p5344_p0 = scmp.ne.s32.totalorder %s6015_s30, %s5343_s26  ;;  %p5351_p7 = scmp.lt.s32.totalorder %s6015_s30, %s6015_s30 }
  0x4f   : > { %p5352_p9 = scmp.lt.s32.totalorder %s5350_s21, %s5343_s26 }
  0x50   : > { %p5346_p2 = pnand %p5344_p0, %p6027_p8 }
  0x51   : > { %p5353_p4 = por %p5352_p9, %p5351_p7 }
  0x52   : > { %p5347_p5 = pneg %p5346_p2 }
  0x54   : > { %p5354_p10 = pnand %p5353_p4, %p5347_p5 }
  0x56   : > { %5357 = shalt.err (!%p5354_p10)
}
  0x57   : > { %4928 = dma.hbm_to_vmem [thread:$0]  (!%p6011_p6), %s7084_s3, 16, %s6015_s30, [#allocation9]  }
  0x58   : > { %s7085_s5 = sld [smem:[#allocation50_spill]] }
  0x5e   : > { %s5358_s20 = scalar_lea.hbm %s7085_s5, 16 }
  0x5f   : > { %p5359_p11 = scmp.ne.s32.totalorder %s7085_s5, %s5358_s20  ;;  %p5365_p0 = scmp.lt.u32.totalorder %s5358_s20, %s7085_s5 }
  0x61   : > { %p5361_p12 = pnand %p5359_p11, %p6027_p8 }
  0x63   : > { %p5362_p13 = pneg %p5361_p12 }
  0x65   : > { %p5367_p2 = pnand %p5365_p0, %p5362_p13 }
  0x67   : > { %5370 = shalt.err (!%p5367_p2)
}
  0x68   : > { %s5371_s30 = scalar_lea.vmem %s6017_s18, 16  ;;  %s5378_s21 = scalar_lea.vmem %s6017_s18, 32 }
  0x69   : > { %p5372_p5 = scmp.ne.s32.totalorder %s6017_s18, %s5371_s30  ;;  %p5379_p4 = scmp.lt.s32.totalorder %s6017_s18, %s6017_s18 }
  0x6a   : > { %p5380_p10 = scmp.lt.s32.totalorder %s5378_s21, %s5371_s30 }
  0x6b   : > { %p5374_p7 = pnand %p5372_p5, %p6027_p8 }
  0x6c   : > { %p5381_p11 = por %p5380_p10, %p5379_p4 }
  0x6d   : > { %p5375_p9 = pneg %p5374_p7 }
  0x6f   : > { %p5382_p12 = pnand %p5381_p11, %p5375_p9 }
  0x71   : > { %5385 = shalt.err (!%p5382_p12)
}
  0x72   : > { %4934 = dma.hbm_to_vmem [thread:$0]  (!%p6011_p6), %s7085_s5, 16, %s6017_s18, [#allocation12]  }
  0x73   : > { %s5863_s27 = smov [#allocation14]   ;;  %s5864_s20 = smov [#allocation17]  }
  0x74   : > { %s493_s19 = sshll.u32 %s5863_s27, 4  ;;  %s517_s25 = sshll.u32 %s5864_s20, 4  ;;  %s494_s19 = int_to_ptr.vmem [resolvable:$true] %s493_s19  ;;  %s518_s25 = int_to_ptr.vmem [resolvable:$true] %s517_s25 }
  0x75   : > { %s7086_s7 = sld [smem:[#allocation52_spill]] }
  0x7b   : > { %s5386_s26 = scalar_lea.hbm %s7086_s7, 16 }
  0x7c   : > { %p5387_p13 = scmp.ne.s32.totalorder %s7086_s7, %s5386_s26  ;;  %p5393_p5 = scmp.lt.u32.totalorder %s5386_s26, %s7086_s7 }
  0x7e   : > { %p5389_p0 = pnand %p5387_p13, %p6027_p8 }
  0x80   : > { %p5390_p2 = pneg %p5389_p0 }
  0x82   : > { %p5395_p7 = pnand %p5393_p5, %p5390_p2 }
  0x84   : > { %5398 = shalt.err (!%p5395_p7)
}
  0x85   : > { %s5399_s18 = scalar_lea.vmem %s494_s19, 16  ;;  %s5406_s23 = scalar_lea.vmem %s494_s19, 32 }
  0x86   : > { %p5400_p9 = scmp.ne.s32.totalorder %s494_s19, %s5399_s18  ;;  %p5407_p11 = scmp.lt.s32.totalorder %s494_s19, %s494_s19 }
  0x87   : > { %p5408_p12 = scmp.lt.s32.totalorder %s5406_s23, %s5399_s18 }
  0x88   : > { %p5402_p4 = pnand %p5400_p9, %p6027_p8 }
  0x89   : > { %p5409_p1 = por %p5408_p12, %p5407_p11 }
  0x8a   : > { %p5403_p10 = pneg %p5402_p4 }
  0x8c   : > { %p5410_p3 = pnand %p5409_p1, %p5403_p10 }
  0x8e   : > { %5413 = shalt.err (!%p5410_p3)
}
  0x8f   : > { %4940 = dma.hbm_to_vmem [thread:$0]  (!%p6011_p6), %s7086_s7, 16, %s494_s19, [#allocation15]  }
  0x90   : > { %s7087_s9 = sld [smem:[#allocation54_spill]] }
  0x96   : > { %s5414_s16 = scalar_lea.hbm %s7087_s9, 16 }
  0x97   : > { %p5415_p13 = scmp.ne.s32.totalorder %s7087_s9, %s5414_s16  ;;  %p5421_p3 = scmp.lt.u32.totalorder %s5414_s16, %s7087_s9 }
  0x99   : > { %p5417_p0 = pnand %p5415_p13, %p6027_p8 }
  0x9b   : > { %p5418_p1 = pneg %p5417_p0 }
  0x9d   : > { %p5423_p2 = pnand %p5421_p3, %p5418_p1 }
  0x9f   : > { %5426 = shalt.err (!%p5423_p2)
}
  0xa0   : > { %s5427_s18 = scalar_lea.vmem %s518_s25, 16  ;;  %s5434_s19 = scalar_lea.vmem %s518_s25, 32 }
  0xa1   : > { %p5428_p5 = scmp.ne.s32.totalorder %s518_s25, %s5427_s18  ;;  %p5435_p4 = scmp.lt.s32.totalorder %s518_s25, %s518_s25 }
  0xa2   : > { %p5436_p10 = scmp.lt.s32.totalorder %s5434_s19, %s5427_s18 }
  0xa3   : > { %p5430_p7 = pnand %p5428_p5, %p6027_p8 }
  0xa4   : > { %p5437_p11 = por %p5436_p10, %p5435_p4 }
  0xa5   : > { %p5431_p9 = pneg %p5430_p7 }
  0xa7   : > { %p5438_p12 = pnand %p5437_p11, %p5431_p9 }
  0xa9   : > { %5441 = shalt.err (!%p5438_p12)
}
  0xaa   : > { %4946 = dma.hbm_to_vmem [thread:$0]  (!%p6011_p6), %s7087_s9, 16, %s518_s25, [#allocation18]  }
  0xab   : > { %s5865_s20 = smov [#allocation20]   ;;  %s5866_s17 = smov [#allocation23]  }
  0xac   : > { %s541_s28 = sshll.u32 %s5865_s20, 4  ;;  %s565_s16 = sshll.u32 %s5866_s17, 4  ;;  %s542_s28 = int_to_ptr.vmem [resolvable:$true] %s541_s28  ;;  %s566_s16 = int_to_ptr.vmem [resolvable:$true] %s565_s16 }
  0xad   : > { %s5442_s21 = scalar_lea.hbm %s7042_s11, 16 }
  0xae   : > { %p5443_p13 = scmp.ne.s32.totalorder %s7042_s11, %s5442_s21  ;;  %p5449_p3 = scmp.lt.u32.totalorder %s5442_s21, %s7042_s11 }
  0xb0   : > { %p5445_p0 = pnand %p5443_p13, %p6027_p8 }
  0xb2   : > { %p5446_p1 = pneg %p5445_p0 }
  0xb4   : > { %p5451_p2 = pnand %p5449_p3, %p5446_p1 }
  0xb6   : > { %5454 = shalt.err (!%p5451_p2)
}
  0xb7   : > { %s5455_s25 = scalar_lea.vmem %s542_s28, 16  ;;  %s5462_s27 = scalar_lea.vmem %s542_s28, 32 }
  0xb8   : > { %p5456_p5 = scmp.ne.s32.totalorder %s542_s28, %s5455_s25  ;;  %p5463_p4 = scmp.lt.s32.totalorder %s542_s28, %s542_s28 }
  0xb9   : > { %p5464_p10 = scmp.lt.s32.totalorder %s5462_s27, %s5455_s25 }
  0xba   : > { %p5458_p7 = pnand %p5456_p5, %p6027_p8 }
  0xbb   : > { %p5465_p11 = por %p5464_p10, %p5463_p4 }
  0xbc   : > { %p5459_p9 = pneg %p5458_p7 }
  0xbe   : > { %p5466_p12 = pnand %p5465_p11, %p5459_p9 }
  0xc0   : > { %5469 = shalt.err (!%p5466_p12)
}
  0xc1   : > { %4952 = dma.hbm_to_vmem [thread:$0]  (!%p6011_p6), %s7042_s11, 16, %s542_s28, [#allocation21]  }
  0xc2   : > { %s5470_s21 = scalar_lea.hbm %s7044_s13, 16 }
  0xc3   : > { %p5471_p13 = scmp.ne.s32.totalorder %s7044_s13, %s5470_s21  ;;  %p5477_p3 = scmp.lt.u32.totalorder %s5470_s21, %s7044_s13 }
  0xc5   : > { %p5473_p0 = pnand %p5471_p13, %p6027_p8 }
  0xc7   : > { %p5474_p1 = pneg %p5473_p0 }
  0xc9   : > { %p5479_p2 = pnand %p5477_p3, %p5474_p1 }
  0xcb   : > { %5482 = shalt.err (!%p5479_p2)
}
  0xcc   : > { %s5483_s25 = scalar_lea.vmem %s566_s16, 16  ;;  %s5490_s28 = scalar_lea.vmem %s566_s16, 32 }
  0xcd   : > { %p5484_p5 = scmp.ne.s32.totalorder %s566_s16, %s5483_s25  ;;  %p5491_p4 = scmp.lt.s32.totalorder %s566_s16, %s566_s16 }
  0xce   : > { %p5492_p10 = scmp.lt.s32.totalorder %s5490_s28, %s5483_s25 }
  0xcf   : > { %p5486_p7 = pnand %p5484_p5, %p6027_p8 }
  0xd0   : > { %p5493_p11 = por %p5492_p10, %p5491_p4 }
  0xd1   : > { %p5487_p9 = pneg %p5486_p7 }
  0xd3   : > { %p5494_p12 = pnand %p5493_p11, %p5487_p9 }
  0xd5   : > { %5497 = shalt.err (!%p5494_p12)
}
  0xd6   : > { %4958 = dma.hbm_to_vmem [thread:$0]  (!%p6011_p6), %s7044_s13, 16, %s566_s16, [#allocation24]  }
  0xd7   : > { %s5867_s17 = smov [#allocation10]   ;;  %s5868_s30 = smov [#allocation13]  }
  0xd8   : > { %s455_s26 = sshll.u32 %s5867_s17, 4  ;;  %s479_s21 = sshll.u32 %s5868_s30, 4  ;;  %s456_s26 = int_to_ptr.vmem [resolvable:$true] %s455_s26  ;;  %s480_s21 = int_to_ptr.vmem [resolvable:$true] %s479_s21 }
  0xd9   : > { %s7088_s4 = sld [smem:[#allocation49_spill]] }
  0xdf   : > { %s5498_s19 = scalar_lea.hbm %s7088_s4, 1024 }
  0xe0   : > { %p5499_p13 = scmp.ne.s32.totalorder %s7088_s4, %s5498_s19  ;;  %p5505_p3 = scmp.lt.u32.totalorder %s5498_s19, %s7088_s4 }
  0xe2   : > { %p5501_p0 = pnand %p5499_p13, %p6027_p8 }
  0xe4   : > { %p5502_p1 = pneg %p5501_p0 }
  0xe6   : > { %p5507_p2 = pnand %p5505_p3, %p5502_p1 }
  0xe8   : > { %5510 = shalt.err (!%p5507_p2)
}
  0xe9   : > { %s5511_s16 = scalar_lea.vmem %s456_s26, 1024  ;;  %p5519_p4 = scmp.lt.s32.totalorder %s456_s26, %s456_s26 }
  0xea   : > { %p5512_p5 = scmp.ne.s32.totalorder %s456_s26, %s5511_s16  ;;  %p5520_p10 = scmp.lt.s32.totalorder %s5511_s16, %s5511_s16 }
  0xec   : > { %p5514_p7 = pnand %p5512_p5, %p6027_p8  ;;  %p5521_p11 = por %p5520_p10, %p5519_p4 }
  0xee   : > { %p5515_p9 = pneg %p5514_p7 }
  0xf0   : > { %p5522_p12 = pnand %p5521_p11, %p5515_p9 }
  0xf2   : > { %5525 = shalt.err (!%p5522_p12)
}
  0xf3   : > { %s7089_s20 = smov 64   ;;  %s7090_s6 = sld [smem:[#allocation51_spill]] }
  0xf4   : > { %4931 = dma.hbm_to_vmem [thread:$0]  (!%p6011_p6), %s7088_s4, 1024, %s456_s26, [#allocation9], %s7089_s20, %s7089_s20, %s5862_s1  }
  0xf9   : > { %s5526_s19 = scalar_lea.hbm %s7090_s6, 1024 }
  0xfa   : > { %p5527_p13 = scmp.ne.s32.totalorder %s7090_s6, %s5526_s19  ;;  %p5533_p3 = scmp.lt.u32.totalorder %s5526_s19, %s7090_s6 }
  0xfc   : > { %p5529_p0 = pnand %p5527_p13, %p6027_p8 }
  0xfe   : > { %p5530_p1 = pneg %p5529_p0 }
 0x100   : > { %p5535_p2 = pnand %p5533_p3, %p5530_p1 }
 0x102   : > { %5538 = shalt.err (!%p5535_p2)
}
 0x103   : > { %s5539_s16 = scalar_lea.vmem %s480_s21, 1024  ;;  %p5547_p4 = scmp.lt.s32.totalorder %s480_s21, %s480_s21 }
 0x104   : > { %p5540_p5 = scmp.ne.s32.totalorder %s480_s21, %s5539_s16  ;;  %p5548_p10 = scmp.lt.s32.totalorder %s5539_s16, %s5539_s16 }
 0x106   : > { %p5542_p7 = pnand %p5540_p5, %p6027_p8  ;;  %p5549_p11 = por %p5548_p10, %p5547_p4 }
 0x108   : > { %p5543_p9 = pneg %p5542_p7 }
 0x10a   : > { %p5550_p12 = pnand %p5549_p11, %p5543_p9 }
 0x10c   : > { %5553 = shalt.err (!%p5550_p12)
}
 0x10d   : > { %4937 = dma.hbm_to_vmem [thread:$0]  (!%p6011_p6), %s7090_s6, 1024, %s480_s21, [#allocation12], %s7089_s20, %s7089_s20, %s5862_s1  }
 0x10e   : > { %s5869_s30 = smov [#allocation16]   ;;  %s5870_s18 = smov [#allocation19]  }
 0x10f   : > { %s503_s22 = sshll.u32 %s5869_s30, 4  ;;  %s527_s19 = sshll.u32 %s5870_s18, 4  ;;  %s504_s22 = int_to_ptr.vmem [resolvable:$true] %s503_s22  ;;  %s528_s19 = int_to_ptr.vmem [resolvable:$true] %s527_s19 }
 0x110   : > { %s7091_s8 = sld [smem:[#allocation53_spill]] }
 0x116   : > { %s5554_s28 = scalar_lea.hbm %s7091_s8, 1024 }
 0x117   : > { %p5555_p13 = scmp.ne.s32.totalorder %s7091_s8, %s5554_s28  ;;  %p5561_p3 = scmp.lt.u32.totalorder %s5554_s28, %s7091_s8 }
 0x119   : > { %p5557_p0 = pnand %p5555_p13, %p6027_p8 }
 0x11b   : > { %p5558_p1 = pneg %p5557_p0 }
 0x11d   : > { %p5563_p2 = pnand %p5561_p3, %p5558_p1 }
 0x11f   : > { %5566 = shalt.err (!%p5563_p2)
}
 0x120   : > { %s5567_s21 = scalar_lea.vmem %s504_s22, 1024  ;;  %p5575_p4 = scmp.lt.s32.totalorder %s504_s22, %s504_s22 }
 0x121   : > { %p5568_p5 = scmp.ne.s32.totalorder %s504_s22, %s5567_s21  ;;  %p5576_p10 = scmp.lt.s32.totalorder %s5567_s21, %s5567_s21 }
 0x123   : > { %p5570_p7 = pnand %p5568_p5, %p6027_p8  ;;  %p5577_p11 = por %p5576_p10, %p5575_p4 }
 0x125   : > { %p5571_p9 = pneg %p5570_p7 }
 0x127   : > { %p5578_p12 = pnand %p5577_p11, %p5571_p9 }
 0x129   : > { %5581 = shalt.err (!%p5578_p12)
}
 0x12a   : > { %4943 = dma.hbm_to_vmem [thread:$0]  (!%p6011_p6), %s7091_s8, 1024, %s504_s22, [#allocation15], %s7089_s20, %s7089_s20, %s5862_s1  }
 0x12b   : > { %s5582_s23 = scalar_lea.hbm %s7041_s10, 1024 }
 0x12c   : > { %p5583_p13 = scmp.ne.s32.totalorder %s7041_s10, %s5582_s23  ;;  %p5589_p3 = scmp.lt.u32.totalorder %s5582_s23, %s7041_s10 }
 0x12e   : > { %p5585_p0 = pnand %p5583_p13, %p6027_p8 }
 0x130   : > { %p5586_p1 = pneg %p5585_p0 }
 0x132   : > { %p5591_p2 = pnand %p5589_p3, %p5586_p1 }
 0x134   : > { %5594 = shalt.err (!%p5591_p2)
}
 0x135   : > { %s5595_s26 = scalar_lea.vmem %s528_s19, 1024  ;;  %p5603_p4 = scmp.lt.s32.totalorder %s528_s19, %s528_s19 }
 0x136   : > { %p5596_p5 = scmp.ne.s32.totalorder %s528_s19, %s5595_s26  ;;  %p5604_p10 = scmp.lt.s32.totalorder %s5595_s26, %s5595_s26 }
 0x138   : > { %p5598_p7 = pnand %p5596_p5, %p6027_p8  ;;  %p5605_p11 = por %p5604_p10, %p5603_p4 }
 0x13a   : > { %p5599_p9 = pneg %p5598_p7 }
 0x13c   : > { %p5606_p12 = pnand %p5605_p11, %p5599_p9 }
 0x13e   : > { %5609 = shalt.err (!%p5606_p12)
}
 0x13f   : > { %4949 = dma.hbm_to_vmem [thread:$0]  (!%p6011_p6), %s7041_s10, 1024, %s528_s19, [#allocation18], %s7089_s20, %s7089_s20, %s5862_s1  }
 0x140   : > { %s5871_s2 = smov [#allocation22]   ;;  %s5872_s30 = smov [#allocation25]  }
 0x141   : > { %s551_s17 = sshll.u32 %s5871_s2, 4  ;;  %s575_s18 = sshll.u32 %s5872_s30, 4  ;;  %s552_s17 = int_to_ptr.vmem [resolvable:$true] %s551_s17  ;;  %s576_s18 = int_to_ptr.vmem [resolvable:$true] %s575_s18 }
 0x142   : > { %s5610_s28 = scalar_lea.hbm %s7043_s12, 1024 }
 0x143   : > { %p5611_p13 = scmp.ne.s32.totalorder %s7043_s12, %s5610_s28  ;;  %p5617_p3 = scmp.lt.u32.totalorder %s5610_s28, %s7043_s12 }
 0x145   : > { %p5613_p0 = pnand %p5611_p13, %p6027_p8 }
 0x147   : > { %p5614_p1 = pneg %p5613_p0 }
 0x149   : > { %p5619_p2 = pnand %p5617_p3, %p5614_p1 }
 0x14b   : > { %5622 = shalt.err (!%p5619_p2)
}
 0x14c   : > { %s5623_s19 = scalar_lea.vmem %s552_s17, 1024  ;;  %p5631_p4 = scmp.lt.s32.totalorder %s552_s17, %s552_s17 }
 0x14d   : > { %p5624_p5 = scmp.ne.s32.totalorder %s552_s17, %s5623_s19  ;;  %p5632_p10 = scmp.lt.s32.totalorder %s5623_s19, %s5623_s19 }
 0x14f   : > { %p5626_p7 = pnand %p5624_p5, %p6027_p8  ;;  %p5633_p11 = por %p5632_p10, %p5631_p4 }
 0x151   : > { %p5627_p9 = pneg %p5626_p7 }
 0x153   : > { %p5634_p12 = pnand %p5633_p11, %p5627_p9 }
 0x155   : > { %5637 = shalt.err (!%p5634_p12)
}
 0x156   : > { %4955 = dma.hbm_to_vmem [thread:$0]  (!%p6011_p6), %s7043_s12, 1024, %s552_s17, [#allocation21], %s7089_s20, %s7089_s20, %s5862_s1  }
 0x157   : > { %s5638_s25 = scalar_lea.hbm %s7045_s14, 6144 }
 0x158   : > { %p5639_p13 = scmp.ne.s32.totalorder %s7045_s14, %s5638_s25  ;;  %p5645_p3 = scmp.lt.u32.totalorder %s5638_s25, %s7045_s14 }
 0x15a   : > { %p5641_p0 = pnand %p5639_p13, %p6027_p8 }
 0x15c   : > { %p5642_p1 = pneg %p5641_p0 }
 0x15e   : > { %p5647_p2 = pnand %p5645_p3, %p5642_p1 }
 0x160   : > { %5650 = shalt.err (!%p5647_p2)
}
 0x161   : > { %s5651_s22 = scalar_lea.vmem %s576_s18, 6144  ;;  %p5659_p4 = scmp.lt.s32.totalorder %s576_s18, %s576_s18 }
 0x162   : > { %p5652_p5 = scmp.ne.s32.totalorder %s576_s18, %s5651_s22  ;;  %p5660_p10 = scmp.lt.s32.totalorder %s5651_s22, %s5651_s22 }
 0x164   : > { %p5654_p7 = pnand %p5652_p5, %p6027_p8  ;;  %p5661_p11 = por %p5660_p10, %p5659_p4 }
 0x166   : > { %p5655_p9 = pneg %p5654_p7 }
 0x168   : > { %p5662_p12 = pnand %p5661_p11, %p5655_p9 }
 0x16a   : > { %5665 = shalt.err (!%p5662_p12)
}
 0x16b   : > { %s7061_s1 = smov 384   ;;  %s7062_s20 = smov 24  }
 0x16c   : > { %4961 = dma.hbm_to_vmem [thread:$0]  (!%p6011_p6), %s7045_s14, 6144, %s576_s18, [#allocation24], %s7061_s1, %s7061_s1, %s7062_s20  }
 0x16d   : > { %s5875_s21 = smov [#allocation26]   ;;  %s5666_s25 = scalar_lea.hbm %s7046_s15, 96 }
 0x16e   : > { %s589_s2 = sshll.u32 %s5875_s21, 4  ;;  %p5667_p13 = scmp.ne.s32.totalorder %s7046_s15, %s5666_s25  ;;  %s590_s2 = int_to_ptr.vmem [resolvable:$true] %s589_s2 }
 0x16f   : > { %p5673_p3 = scmp.lt.u32.totalorder %s5666_s25, %s7046_s15 }
 0x170   : > { %p5669_p0 = pnand %p5667_p13, %p6027_p8 }
 0x172   : > { %p5670_p1 = pneg %p5669_p0 }
 0x174   : > { %p5675_p2 = pnand %p5673_p3, %p5670_p1 }
 0x176   : > { %5678 = shalt.err (!%p5675_p2)
}
 0x177   : > { %s5679_s18 = scalar_lea.vmem %s590_s2, 96  ;;  %p5687_p4 = scmp.lt.s32.totalorder %s590_s2, %s590_s2 }
 0x178   : > { %p5680_p5 = scmp.ne.s32.totalorder %s590_s2, %s5679_s18  ;;  %p5688_p10 = scmp.lt.s32.totalorder %s5679_s18, %s5679_s18 }
 0x17a   : > { %p5682_p7 = pnand %p5680_p5, %p6027_p8  ;;  %p5689_p11 = por %p5688_p10, %p5687_p4 }
 0x17c   : > { %p5683_p9 = pneg %p5682_p7 }
 0x17e   : > { %p5690_p12 = pnand %p5689_p11, %p5683_p9 }
 0x180   : > { %5693 = shalt.err (!%p5690_p12)
}
 0x181   : > { %s7092_s19 = sld [smem:[#allocation42_spill]]  ;;  %s7093_s21 = sld [smem:[#allocation41_spill]] }
 0x182   : > { %s7094_s29 = sld [smem:[#allocation40_spill]]  ;;  %s7095_s30 = sld [smem:[#allocation43_spill]] }
 0x183   : > { %4964 = dma.hbm_to_vmem [thread:$0]  (!%p6011_p6), %s7046_s15, 96, %s590_s2, [#allocation27]  }
 0x184   : > { %s4142_s23 = sadd.s32 4294967294, %s5856_s24   ;;  %s6317_s0 = sadd.s32 1, %s5856_s24  }
 0x185   : > { %s46_s25 = ssub.s32 %s5856_s24, %s6317_s0  ;;  %p57_p0 = scmp.eq.s32.totalorder %s5856_s24, 0 }
 0x186   : > { %p47_p8 = scmp.eq.s32.totalorder %s46_s25, 0  ;;  %p412_p7 = scmp.eq.s32.totalorder %s4142_s23, 1 }
 0x187   : > { %s49_s28 = sadd.s32 1, %s7092_s19  ;;  %p56_p13 = scmp.ne.s32.totalorder %s7092_s19, %s7093_s21 }
 0x188   : > { %p62_p1 = scmp.ne.s32.totalorder %s7093_s21, %s7094_s29  ;;  %p7096_p2 = scmp.eq.s32.totalorder %s7095_s30, 0 }
 0x189   : > { %s6328_s27 = scalar_select %p47_p8, %s7092_s19, %s49_s28  }
 0x18a   : > { %p58_p3 = por %p57_p0, %p56_p13  ;;  %p6332_p5 = por %p7096_p2, %p62_p1 }
 0x18b   : > { %p406_p6 = scmp.eq.s32.totalorder %s7095_s30, 1  ;;  %p4990_p9 = scmp.lt.s32.totalorder %s5856_s24, 2 }
 0x18c   : > { %s6339_s2 = sand.u32 1, %s7092_s19   ;;  %p6345_p10 = por %p412_p7, %p62_p1 }
 0x18d   : > { %p6341_p4 = por %p406_p6, %p56_p13  ;;  %s4855_s22 = smul.u32 96, %s6339_s2 }
 0x18e   : > { %s7099_s18 = scalar_select %p6345_p10, 1, 0 }
 0x18f   : > { %s7098_s26 = scalar_select %p6341_p4, 1, 0 }
 0x190   : > { %s4856_s17 = smul.u32 1536, %s5856_s24  ;;  %p6351_p11 = pnand %p4990_p9, %p58_p3 }
 0x191   : > { %s7101_s23 = sld [smem:[#allocation45_spill]]  ;;  %s604_s1 = scalar_lea.vmem [#allocation2], %s4855_s22 }
 0x192   : > { %s612_s20 = sshll.u32 %s604_s1, 4  ;;  %s601_s3 = scalar_lea.sflag [#allocation3], %s6339_s2  ;;  %s6361_s20 = int_to_ptr.vmem [resolvable:$true] %s612_s20 }
 0x193   : > { %p5696_p8 = pneg %p6351_p11 }
 0x197   : > { %s7102_s25 = smov %s7101_s23  ;;  %s6359_s28 = scalar_lea.hbm %s7101_s23, %s4856_s17 }
 0x198   : > { %s5694_s4 = scalar_lea.hbm %s6359_s28, 1536  ;;  %s5699_s30 = scalar_lea.hbm %s7102_s25, 3072 }
 0x199   : > { %p5695_p12 = scmp.ne.s32.totalorder %s6359_s28, %s5694_s4  ;;  %p5700_p1 = scmp.lt.u32.totalorder %s6359_s28, %s7102_s25 }
 0x19a   : > { %p5701_p3 = scmp.lt.u32.totalorder %s5699_s30, %s5694_s4  ;;  %p5703_p6 = scmp.lt.u32.totalorder %s5694_s4, %s6359_s28 }
 0x19b   : > { %p5697_p13 = pnand %p5696_p8, %p5695_p12 }
 0x19c   : > { %p5702_p2 = por %p5701_p3, %p5700_p1 }
 0x19d   : > { %p5698_p0 = pneg %p5697_p13 }
 0x19e   : > { %p5704_p7 = por %p5703_p6, %p5702_p2 }
 0x1a0   : > { %p5705_p9 = pnand %p5704_p7, %p5698_p0 }
 0x1a2   : > { %5708 = shalt.err (!%p5705_p9)
}
 0x1a3   : > { %s5709_s1 = scalar_lea.vmem %s6361_s20, 1536  ;;  %s5876_s22 = smov [#allocation2]  }
 0x1a4   : > { %p5710_p12 = scmp.ne.s32.totalorder %s6361_s20, %s5709_s1  ;;  %s5714_s29 = sshll.u32 %s5876_s22, 4  ;;  %s5715_s29 = int_to_ptr.vmem [resolvable:$false] %s5714_s29 }
 0x1a5   : > { %s5716_s19 = scalar_lea.vmem %s5715_s29, 3072  ;;  %p5717_p4 = scmp.lt.s32.totalorder %s6361_s20, %s5715_s29 }
 0x1a6   : > { %p5712_p13 = pnand %p5710_p12, %p5696_p8  ;;  %p5718_p1 = scmp.lt.s32.totalorder %s5716_s19, %s5709_s1 }
 0x1a8   : > { %p5713_p10 = pneg %p5712_p13  ;;  %p5719_p3 = por %p5718_p1, %p5717_p4 }
 0x1aa   : > { %p5720_p2 = pnand %p5719_p3, %p5713_p10 }
 0x1ac   : > { %5723 = shalt.err (!%p5720_p2)
}
 0x1ad   : > { %s7103_s4 = smov 24   ;;  %s7104_s17 = smov 384  }
 0x1ae   : > { %4968 = dma.hbm_to_vmem [thread:$0]  (!%p6351_p11), %s6359_s28, 1536, %s6361_s20, %s601_s3, %s7104_s17, %s7104_s17, %s7103_s4  }
 0x1af   : > { %s4162_s30 = sshll.u32 %s6339_s2, 5  ;;  %s4378_s23 = sshll.u32 %s5856_s24, 9 }
 0x1b0   : > { %s7105_s29 = sld [smem:[#allocation46_spill]]  ;;  %s626_s5 = scalar_lea.vmem [#allocation5], %s4162_s30 }
 0x1b1   : > { %s634_s6 = sshll.u32 %s626_s5, 4  ;;  %s7106_s7 = sand.u32 1, %s5856_s24   ;;  %s6401_s6 = int_to_ptr.vmem [resolvable:$true] %s634_s6 }
 0x1b2   : > { %s6405_s8 = scalar_lea.sflag [#allocation6], %s7106_s7 }
 0x1b6   : > { %s6399_s19 = scalar_lea.hbm %s7105_s29, %s4378_s23  ;;  %s5729_s2 = scalar_lea.hbm %s7105_s29, 1024 }
 0x1b7   : > { %s5724_s9 = scalar_lea.hbm %s6399_s19, 512  ;;  %p5730_p6 = scmp.lt.u32.totalorder %s6399_s19, %s7105_s29 }
 0x1b8   : > { %p5725_p4 = scmp.ne.s32.totalorder %s6399_s19, %s5724_s9  ;;  %p5731_p7 = scmp.lt.u32.totalorder %s5729_s2, %s5724_s9 }
 0x1b9   : > { %p5733_p12 = scmp.lt.u32.totalorder %s5724_s9, %s6399_s19 }
 0x1ba   : > { %p5727_p10 = pnand %p5725_p4, %p5696_p8  ;;  %p5732_p9 = por %p5731_p7, %p5730_p6 }
 0x1bc   : > { %p5728_p0 = pneg %p5727_p10  ;;  %p5734_p13 = por %p5733_p12, %p5732_p9 }
 0x1be   : > { %p5735_p1 = pnand %p5734_p13, %p5728_p0 }
 0x1c0   : > { %5738 = shalt.err (!%p5735_p1)
}
 0x1c1   : > { %s5739_s5 = scalar_lea.vmem %s6401_s6, 512  ;;  %s5877_s7 = smov [#allocation5]  }
 0x1c2   : > { %p5740_p3 = scmp.ne.s32.totalorder %s6401_s6, %s5739_s5  ;;  %s5744_s17 = sshll.u32 %s5877_s7, 4  ;;  %s5745_s17 = int_to_ptr.vmem [resolvable:$false] %s5744_s17 }
 0x1c3   : > { %s5746_s30 = scalar_lea.vmem %s5745_s17, 1024  ;;  %p5747_p10 = scmp.lt.s32.totalorder %s6401_s6, %s5745_s17 }
 0x1c4   : > { %p5742_p2 = pnand %p5740_p3, %p5696_p8  ;;  %p5748_p6 = scmp.lt.s32.totalorder %s5746_s30, %s5739_s5 }
 0x1c6   : > { %p5743_p4 = pneg %p5742_p2  ;;  %p5749_p7 = por %p5748_p6, %p5747_p10 }
 0x1c8   : > { %p5750_p9 = pnand %p5749_p7, %p5743_p4 }
 0x1ca   : > { %5753 = shalt.err (!%p5750_p9)
}
 0x1cb   : > { %s5878_s9 = smov 128   ;;  %s5879_s23 = smov 8  }
 0x1cc   : > { %4971 = dma.hbm_to_vmem [thread:$0]  (!%p6351_p11), %s6399_s19, 512, %s6401_s6, %s6405_s8, %s5878_s9, %s5878_s9, %s5879_s23  }
 0x1cd   : > { %s7107_s1 = sld [smem:[#allocation44_spill]] }
 0x1d3   : > { %p7108_p8 = scmp.ne.s32.totalorder %s7107_s1, 0 }
 0x1d4   : > { %s7109_s22 = sld [smem:[#allocation41_spill]] (!%p7108_p8) }
 0x1d5   : > { %646 = sbr.rel (%p7108_p8) target bundleno = 3757 (0xead), region = 84 }
 0x1da   : > { %s6434_s3 = sand.u32 (!%p7108_p8), 1, %s7109_s22  }
 0x1db   : > { %s4857_s20 = smul.u32 (!%p7108_p8), 96, %s6434_s3  ;;  %s649_s2 = scalar_lea.sflag (!%p7108_p8), [#allocation3], %s6434_s3 }
 0x1dd   : > { %s6438_s28 = scalar_lea.vmem [#allocation2], %s4857_s20 }
 0x1de   : > { %5799 = dma.done.wait (%p6332_p5), %s649_s2, 1536  }
 0x1df   : > { %5801 = vsyncadd (%p6332_p5), %s649_s2, 4294965760  ;;  %s7110_s21 = sld [smem:[#allocation43_spill]]  ;;  %s4167_s8 = sshll.u32 %s6434_s3, 5 }
 0x1e0   : > { %s6446_s4 = scalar_lea.vmem [#allocation5], %s4167_s8 }
 0x1e5   : > { %s657_s6 = sand.u32 1, %s7110_s21  }
 0x1e6   : > { %s658_s19 = scalar_lea.sflag [#allocation6], %s657_s6 }
 0x1e7   : > { %5803 = dma.done.wait (%p6332_p5), %s658_s19, 512  }
 0x1e8   : > { %5805 = vsyncadd (%p6332_p5), %s658_s19, 4294966784  ;;  %p7111_p11 = scmp.eq.s32.totalorder %s7110_s21, 0 }
 0x1ea   : > { %5807 = dma.done.wait (%p7111_p11), [#allocation6], 6144   ;;  %p7112_p0 = pmov %p7111_p11 }
 0x1ec   : > { %5809 = vsyncadd (%p7112_p0), [#allocation6], 4294961152  ;;  %p7113_p12 = pmov %p7112_p0 }
 0x1ed   : > { %p7114_p13 = pmov %p7112_p0 }
 0x1ee   : > { %5811 = dma.done.wait (%p7113_p12), [#allocation9], 1040  }
 0x1ef   : > { %5813 = vsyncadd (%p7114_p13), [#allocation9], 4294966256  ;;  %p7115_p1 = pmov %p7112_p0 }
 0x1f0   : > { %p7116_p3 = pmov %p7112_p0 }
 0x1f1   : > { %5815 = dma.done.wait (%p7115_p1), [#allocation12], 1040  }
 0x1f2   : > { %5817 = vsyncadd (%p7116_p3), [#allocation12], 4294966256  ;;  %p7117_p5 = pmov %p7112_p0 }
 0x1f3   : > { %p7118_p2 = pmov %p7112_p0 }
 0x1f4   : > { %5819 = dma.done.wait (%p7117_p5), [#allocation15], 1040  }
 0x1f5   : > { %5821 = vsyncadd (%p7118_p2), [#allocation15], 4294966256  ;;  %p7119_p4 = pmov %p7112_p0 }
 0x1f6   : > { %p7120_p10 = pmov %p7112_p0 }
 0x1f7   : > { %5823 = dma.done.wait (%p7119_p4), [#allocation18], 1040  }
 0x1f8   : > { %5825 = vsyncadd (%p7120_p10), [#allocation18], 4294966256  ;;  %p7121_p6 = pmov %p7112_p0 }
 0x1f9   : > { %p7122_p7 = pmov %p7112_p0 }
 0x1fa   : > { %5827 = dma.done.wait (%p7121_p6), [#allocation21], 1040  }
 0x1fb   : > { %5829 = vsyncadd (%p7122_p7), [#allocation21], 4294966256  ;;  %p7123_p9 = pmov %p7112_p0 }
 0x1fc   : > { %p7124_p8 = pmov %p7112_p0 }
 0x1fd   : > { %5831 = dma.done.wait (%p7123_p9), [#allocation24], 6160  }
 0x1fe   : > { %5833 = vsyncadd (%p7124_p8), [#allocation24], 4294961136  ;;  %p7125_p11 = pmov %p7112_p0 }
 0x200   : > { %5835 = dma.done.wait (%p7125_p11), [#allocation27], 96  }
 0x201   : > { %5837 = vsyncadd (%p7112_p0), [#allocation27], 4294967200  ;;  %v6484_v0 = vld [vmem:[#allocation7 + $0x40] sm:$0xff]   ;;  %v6495_v4 = vld [vmem:[#allocation7 + $0x48] sm:$0xff]   ;;  %vm5881_vm0 = vmmov 0   ;;  %vm2014_vm1 = vcmask 261120  }
 0x202   : > { %v6486_v1 = vld [vmem:[#allocation7 + $0xc0] sm:$0xff]   ;;  %4379 = vmatprep.subr.bf16.mxu0 %v6484_v0  ;;  %v6498_v5 = vld [vmem:[#allocation7 + $0xc8] sm:$0xff]   ;;  %v6507_v8 = vld [vmem:[#allocation7 + $0x50] sm:$0xff]   ;;  %vm2109_vm2 = vcmask 130048   ;;  %s5882_s16 = smov 96   ;;  %s5883_s5 = smov 64  }
 0x203   : > { %v6489_v2 = vld [vmem:[#allocation7] sm:$0xff]   ;;  %4407 = vmatprep.subr.bf16.mxu1 %v6486_v1  ;;  %v6501_v6 = vld [vmem:[#allocation7 + $0x8] sm:$0xff]   ;;  %v6510_v9 = vld [vmem:[#allocation7 + $0xd0] sm:$0xff]   ;;  %s5884_s7 = smov 32   ;;  %s4858_s17 = smul.u32 192, %s6434_s3 }
 0x204   : > { %v6492_v3 = vld [vmem:[#allocation7 + $0x80] sm:$0xff]   ;;  %4380 = vmatpush3.bf16.msra.mxu0 %v6489_v2  ;;  %v6504_v7 = vld [vmem:[#allocation7 + $0x88] sm:$0xff]   ;;  %v6513_v10 = vld [vmem:[#allocation7 + $0x10] sm:$0xff]   ;;  %s4859_s9 = smul.u32 3072, %s7110_s21  ;;  %s7126_s20 = sld [smem:[#allocation55_spill]] }
 0x205   : > { %4408 = vmatpush3.bf16.msra.mxu1 %v6492_v3  ;;  %4381 = vmatprep.subr.bf16.mxu0 %v6495_v4  ;;  %v6516_v11 = vld [vmem:[#allocation7 + $0x90] sm:$0xff]   ;;  %v6519_v12 = vld [vmem:[#allocation7 + $0x58] sm:$0xff]   ;;  %v6531_v16 = vld [vmem:[#allocation7 + $0x60] sm:$0xff]   ;;  %s6952_s30 = scalar_lea.vmem [#allocation28], %s4858_s17  ;;  %p7127_p13 = scmp.ne.s32.totalorder %s7098_s26, 0 }
 0x206   : > { %4409 = vmatprep.subr.bf16.mxu1 %v6498_v5  ;;  %v6522_v13 = vld [vmem:[#allocation7 + $0xd8] sm:$0xff]   ;;  %v6534_v17 = vld [vmem:[#allocation7 + $0xe0] sm:$0xff]   ;;  %v6543_v20 = vld [vmem:[#allocation7 + $0x68] sm:$0xff]   ;;  %s3913_s23 = sshll.u32 %s6952_s30, 4  ;;  %s5886_s6 = smov [#allocation28]   ;;  %s6984_s23 = int_to_ptr.vmem [resolvable:$true] %s3913_s23 }
 0x207   : > { %v6525_v14 = vld [vmem:[#allocation7 + $0x18] sm:$0xff]   ;;  %v6537_v18 = vld [vmem:[#allocation7 + $0x20] sm:$0xff]   ;;  %v6546_v21 = vld [vmem:[#allocation7 + $0xe8] sm:$0xff]   ;;  %s5754_s21 = scalar_lea.vmem %s6984_s23, 3072  ;;  %s5758_s8 = sshll.u32 %s5886_s6, 4  ;;  %s5759_s8 = int_to_ptr.vmem [resolvable:$false] %s5758_s8 }
 0x208   : > { %4382 = vmatpush3.bf16.msra.mxu0 %v6501_v6  ;;  %v6528_v15 = vld [vmem:[#allocation7 + $0x98] sm:$0xff]   ;;  %v6540_v19 = vld [vmem:[#allocation7 + $0xa0] sm:$0xff]   ;;  %v6549_v22 = vld [vmem:[#allocation7 + $0x28] sm:$0xff]   ;;  %p5755_p12 = scmp.ne.s32.totalorder %s6984_s23, %s5754_s21  ;;  %s5760_s19 = scalar_lea.vmem %s5759_s8, 6144 }
 0x209   : > { %4410 = vmatpush3.bf16.msra.mxu1 %v6504_v7  ;;  %4383 = vmatprep.subr.bf16.mxu0 %v6507_v8  ;;  %v6552_v23 = vld [vmem:[#allocation7 + $0xa8] sm:$0xff]   ;;  %v6555_v24 = vld [vmem:[#allocation7 + $0x70] sm:$0xff]   ;;  %v6567_v28 = vld [vmem:[#allocation7 + $0x78] sm:$0xff]   ;;  %p5761_p5 = scmp.lt.s32.totalorder %s6984_s23, %s5759_s8  ;;  %p5762_p2 = scmp.lt.s32.totalorder %s5760_s19, %s5754_s21 }
 0x20a   : > { %4411 = vmatprep.subr.bf16.mxu1 %v6510_v9  ;;  %v6558_v25 = vld [vmem:[#allocation7 + $0xf0] sm:$0xff]   ;;  %v6570_v29 = vld [vmem:[#allocation7 + $0xf8] sm:$0xff]   ;;  %v775_v32 = vld [vmem:[%s6438_s28] sm:$0xff]  ;;  %s6982_s2 = scalar_lea.hbm %s7126_s20, %s4859_s9  ;;  %p5756_p1 = pnand %p5755_p12, %p7127_p13 }
 0x20b   : > { %v6561_v26 = vld [vmem:[#allocation7 + $0x30] sm:$0xff]   ;;  %v6573_v30 = vld [vmem:[#allocation7 + $0x38] sm:$0xff]   ;;  %v6583_v35 = vld [vmem:[%s6438_s28 + $0x8] sm:$0xff]  ;;  %p5763_p4 = por %p5762_p2, %p5761_p5 }
 0x20c   : > { %4384 = vmatpush3.bf16.msra.mxu0 %v6513_v10  ;;  %v6564_v27 = vld [vmem:[#allocation7 + $0xb0] sm:$0xff]   ;;  %v6576_v31 = vld [vmem:[#allocation7 + $0xb8] sm:$0xff]   ;;  %v6586_v36 = vld [vmem:[%s6438_s28 + $0x20] sm:$0xff]  ;;  %p5757_p3 = pneg %p5756_p1 }
 0x20d   : > { %4412 = vmatpush3.bf16.msra.mxu1 %v6516_v11  ;;  %4385 = vmatprep.subr.bf16.mxu0 %v6519_v12  ;;  %v778_v33 = vld [vmem:[%s6438_s28 + $0x18] sm:$0xff]  ;;  %v4186_v38 = vcombine.high %v6583_v35, %v6586_v36  ;;  %v6590_v39 = vld [vmem:[#allocation7 + $0x140] sm:$0xff]   ;;  %v4185_v40 = vcombine.low %v6583_v35, %v6586_v36  ;;  %v6597_v42 = vld [vmem:[#allocation7 + $0x148] sm:$0xff]  }
 0x20e   : > { %4413 = vmatprep.subr.bf16.mxu1 %v6522_v13  ;;  %v4184_v34 = vcombine.high %v775_v32, %v778_v33  ;;  %v4183_v37 = vcombine.low %v775_v32, %v778_v33  ;;  %v6595_v41 = vld [vmem:[#allocation7 + $0x100] sm:$0xff]   ;;  %v6602_v43 = vld [vmem:[#allocation7 + $0x108] sm:$0xff]   ;;  %v6606_v44 = vld [vmem:[#allocation7 + $0x150] sm:$0xff]   ;;  %p5764_p10 = pnand %p5763_p4, %p5757_p3 }
 0x20f   : > { %1355 = vmatprep.mubr.bf16.mxu1 %v4186_v38  ;;  %v6610_v45 = vld [vmem:[#allocation7 + $0x110] sm:$0xff]   ;;  %v6613_v46 = vld [vmem:[%s6446_s4] sm:$0xff]  ;;  %v6616_v47 = vld [vmem:[%s6446_s4 + $0x8] sm:$0xff] }
 0x210   : > { %4386 = vmatpush3.bf16.msra.mxu0 %v6525_v14  ;;  %1306 = vmatprep.mubr.bf16.mxu0 %v4184_v34  ;;  %v6620_v48 = vld [vmem:[#allocation7 + $0x158] sm:$0xff]   ;;  %v781_v50 = vld [vmem:[%s6438_s28 + $0x30] sm:$0xff]  ;;  %v784_v51 = vld [vmem:[%s6438_s28 + $0x48] sm:$0xff]  ;;  %v811_v57 = vmul.bf16 %v6613_v46, %v775_v32  ;;  %v814_v58 = vmul.bf16 %v6616_v47, %v778_v33 }
 0x211   : > { %4414 = vmatpush3.bf16.msra.mxu1 %v6528_v15  ;;  %4387 = vmatprep.subr.bf16.mxu0 %v6531_v16  ;;  %v6622_v49 = vld [vmem:[#allocation7 + $0x118] sm:$0xff]   ;;  %v6628_v52 = vld [vmem:[#allocation7 + $0x160] sm:$0xff]   ;;  %v4190_v53 = vcombine.high %v781_v50, %v784_v51  ;;  %v4189_v54 = vcombine.low %v781_v50, %v784_v51  ;;  %v6636_v56 = vld [vmem:[%s6438_s28 + $0x50] sm:$0xff] }
 0x212   : > { %4415 = vmatprep.subr.bf16.mxu1 %v6534_v17  ;;  %v6631_v55 = vld [vmem:[%s6438_s28 + $0x38] sm:$0xff]  ;;  %v6646_v61 = vld [vmem:[#allocation7 + $0x120] sm:$0xff]   ;;  %v6650_v62 = vld [vmem:[#allocation7 + $0x168] sm:$0xff]   ;;  %v4243_v33 = vcombine.low %v811_v57, %v814_v58 }
 0x213   : > { %v4192_v59 = vcombine.high %v6631_v55, %v6636_v56  ;;  %v4191_v60 = vcombine.low %v6631_v55, %v6636_v56  ;;  %v777_v63 = vld [vmem:[%s6438_s28 + $0x10] sm:$0xff] }
 0x214   : > { %4388 = vmatpush3.bf16.msra.mxu0 %v6537_v18 }
 0x215   : > { %4416 = vmatpush3.bf16.msra.mxu1 %v6540_v19  ;;  %4389 = vmatprep.subr.bf16.mxu0 %v6543_v20 }
 0x216   : > { %4417 = vmatprep.subr.bf16.mxu1 %v6546_v21 }
 0x218   : > { %4390 = vmatpush3.bf16.msra.mxu0 %v6549_v22 }
 0x219   : > { %4418 = vmatpush3.bf16.msra.mxu1 %v6552_v23  ;;  %4391 = vmatprep.subr.bf16.mxu0 %v6555_v24 }
 0x21a   : > { %4419 = vmatprep.subr.bf16.mxu1 %v6558_v25 }
 0x21c   : > { %4392 = vmatpush3.bf16.msra.mxu0 %v6561_v26 }
 0x21d   : > { %4420 = vmatpush3.bf16.msra.mxu1 %v6564_v27  ;;  %4393 = vmatprep.subr.bf16.mxu0 %v6567_v28 }
 0x21e   : > { %4421 = vmatprep.subr.bf16.mxu1 %v6570_v29 }
 0x220   : > { %4394 = vmatpush3.bf16.msra.mxu0 %v6573_v30 }
 0x221   : > { %4422 = vmatpush3.bf16.msra.mxu1 %v6576_v31  ;;  %4435 = vmatprep.subr.bf16.mxu0 %v6590_v39 }
 0x222   : > { %4463 = vmatprep.subr.bf16.mxu1 %v6484_v0  ;;  %v780_v0 = vld [vmem:[%s6438_s28 + $0x28] sm:$0xff] }
 0x223   : > { %1307 = vmatmul.mubr.bf16.vlgmr.msra.gmra.mrb[0].mxu0 %v4183_v37  ;;  %v4187_v34 = vcombine.low %v777_v63, %v780_v0  ;;  %v816_v38 = vmul.bf16 %v6616_v47, %v780_v0 }
 0x224   : > { %1356 = vmatmul.mubr.bf16.vlgmr.msra.gmra.mrb[0].mxu1 %v4185_v40  ;;  %4436 = vmatpush3.bf16.msra.mxu0 %v6595_v41  ;;  %v5130_v40 = vld [vmem:[#allocation13 + $0x20] sm:$0xff]  }
 0x225   : > { %4464 = vmatpush3.bf16.msra.mxu1 %v6489_v2  ;;  %4437 = vmatprep.subr.bf16.mxu0 %v6597_v42  ;;  %v6654_v2 = vld [vmem:[#allocation7 + $0x128] sm:$0xff]  }
 0x226   : > { %4465 = vmatprep.subr.bf16.mxu1 %v6495_v4  ;;  %1314 = vmatprep.mubr.bf16.mxu0 %v4190_v53  ;;  %v4188_v4 = vcombine.high %v777_v63, %v780_v0 }
 0x227   : > { %1363 = vmatprep.mubr.bf16.mxu1 %v4192_v59 }
 0x228   : > { %4438 = vmatpush3.bf16.msra.mxu0 %v6602_v43 }
 0x229   : > { %4466 = vmatpush3.bf16.msra.mxu1 %v6501_v6  ;;  %4439 = vmatprep.subr.bf16.mxu0 %v6606_v44  ;;  %v4244_v6 = vcombine.high %v811_v57, %v814_v58 }
 0x22a   : > { %4467 = vmatprep.subr.bf16.mxu1 %v6507_v8  ;;  %v6656_v8 = vld [vmem:[#allocation7 + $0x170] sm:$0xff]  }
 0x22b   : > { %1315 = vmatmul.mubr.bf16.gmra.mrb[4].mxu0 %v4189_v54 }
 0x22c   : > { %4440 = vmatpush3.bf16.msra.mxu0 %v6610_v45  ;;  %1364 = vmatmul.mubr.bf16.gmra.mrb[4].mxu1 %v4191_v60 }
 0x22d   : > { %4468 = vmatpush3.bf16.msra.mxu1 %v6513_v10  ;;  %4441 = vmatprep.subr.bf16.mxu0 %v6620_v48  ;;  %v6662_v10 = vld [vmem:[#allocation7 + $0x130] sm:$0xff]  }
 0x22e   : > { %4469 = vmatprep.subr.bf16.mxu1 %v6519_v12  ;;  %1404 = vmatprep.mubr.bf16.mxu0 %v4188_v4  ;;  %v6664_v12 = vld [vmem:[#allocation7 + $0x178] sm:$0xff]  }
 0x22f   : > { %1513 = vmatprep.mubr.bf16.mxu1 %v4244_v6 }
 0x230   : > { %4442 = vmatpush3.bf16.msra.mxu0 %v6622_v49 }
 0x231   : > { %4470 = vmatpush3.bf16.msra.mxu1 %v6525_v14  ;;  %4443 = vmatprep.subr.bf16.mxu0 %v6628_v52  ;;  %v6671_v14 = vld [vmem:[%s6446_s4 + $0x10] sm:$0xff] }
 0x232   : > { %4471 = vmatprep.subr.bf16.mxu1 %v6531_v16  ;;  %v6674_v16 = vld [vmem:[%s6446_s4 + $0x18] sm:$0xff]  ;;  %v817_v32 = vmul.bf16 %v6671_v14, %v781_v50 }
 0x233   : > { %v5140_v50 = vld [vmem:[#allocation10 + $0x30] sm:$0xff]  }
 0x234   : > { %4444 = vmatpush3.bf16.msra.mxu0 %v6646_v61 }
 0x235   : > { %4472 = vmatpush3.bf16.msra.mxu1 %v6537_v18  ;;  %4445 = vmatprep.subr.bf16.mxu0 %v6650_v62  ;;  %v6676_v18 = vld [vmem:[#allocation7 + $0x138] sm:$0xff]  }
 0x236   : > { %4473 = vmatprep.subr.bf16.mxu1 %v6543_v20  ;;  %v783_v20 = vld [vmem:[%s6438_s28 + $0x40] sm:$0xff] }
 0x238   : > { %4446 = vmatpush3.bf16.msra.mxu0 %v6654_v2 }
 0x239   : > { %4474 = vmatpush3.bf16.msra.mxu1 %v6549_v22  ;;  %4447 = vmatprep.subr.bf16.mxu0 %v6656_v8  ;;  %v786_v22 = vld [vmem:[%s6438_s28 + $0x58] sm:$0xff]  ;;  %s3899_s28 = scalar_lea.sflag [#allocation4], %s6434_s3 }
 0x23a   : > { %4475 = vmatprep.subr.bf16.mxu1 %v6555_v24  ;;  %v820_v24 = vmul.bf16 %v6674_v16, %v784_v51  ;;  %v5141_v51 = vld [vmem:[#allocation10 + $0x38] sm:$0xff]  }
 0x23c   : > { %4448 = vmatpush3.bf16.msra.mxu0 %v6662_v10  ;;  %v4250_v37 = vcombine.high %v817_v32, %v820_v24 }
 0x23d   : > { %4476 = vmatpush3.bf16.msra.mxu1 %v6561_v26  ;;  %4449 = vmatprep.subr.bf16.mxu0 %v6664_v12  ;;  %v4194_v26 = vcombine.high %v783_v20, %v786_v22 }
 0x23e   : > { %4477 = vmatprep.subr.bf16.mxu1 %v6567_v28  ;;  %v812_v28 = vmul.bf16 %v6613_v46, %v6583_v35 }
 0x240   : > { %4450 = vmatpush3.bf16.msra.mxu0 %v6676_v18 }
 0x241   : > { %4478 = vmatpush3.bf16.msra.mxu1 %v6573_v30  ;;  %4491 = vmatprep.subr.bf16.mxu0 %v6486_v1  ;;  %v815_v1 = vmul.bf16 %v6616_v47, %v6586_v36  ;;  %v813_v30 = vmul.bf16 %v6613_v46, %v777_v63  ;;  %v5128_v36 = vld [vmem:[#allocation13 + $0x10] sm:$0xff]  }
 0x242   : > { %4519 = vmatprep.subr.bf16.mxu1 %v6590_v39  ;;  %v4193_v39 = vcombine.low %v783_v20, %v786_v22  ;;  %v5136_v46 = vld [vmem:[#allocation10 + $0x10] sm:$0xff]   ;;  %v5137_v47 = vld [vmem:[#allocation10 + $0x18] sm:$0xff]  }
 0x243   : > { %1405 = vmatmul.mubr.bf16.vlgmr.msra.gmra.mrb[8].mxu0 %v4187_v34  ;;  %v4248_v35 = vcombine.high %v813_v30, %v816_v38 }
 0x244   : > { %1514 = vmatmul.mubr.bf16.vlgmr.msra.gmra.mrb[8].mxu1 %v4243_v33  ;;  %4492 = vmatpush3.bf16.msra.mxu0 %v6492_v3  ;;  %v4249_v3 = vcombine.low %v817_v32, %v820_v24 }
 0x245   : > { %4520 = vmatpush3.bf16.msra.mxu1 %v6595_v41  ;;  %4493 = vmatprep.subr.bf16.mxu0 %v6498_v5  ;;  %v4246_v5 = vcombine.high %v812_v28, %v815_v1  ;;  %v5131_v41 = vld [vmem:[#allocation13 + $0x28] sm:$0xff]  }
 0x246   : > { %4521 = vmatprep.subr.bf16.mxu1 %v6597_v42  ;;  %1412 = vmatprep.mubr.bf16.mxu0 %v4194_v26  ;;  %v5132_v42 = vld [vmem:[#allocation13 + $0x30] sm:$0xff]  }
 0x247   : > { %1521 = vmatprep.mubr.bf16.mxu1 %v4250_v37 }
 0x248   : > { %4494 = vmatpush3.bf16.msra.mxu0 %v6504_v7  ;;  %v818_v7 = vmul.bf16 %v6671_v14, %v6631_v55  ;;  %v6735_v55 = vld [vmem:[#allocation8] ss:$0 sm:$0xff] }
 0x249   : > { %4522 = vmatpush3.bf16.msra.mxu1 %v6602_v43  ;;  %4495 = vmatprep.subr.bf16.mxu0 %v6510_v9  ;;  %v821_v9 = vmul.bf16 %v6674_v16, %v6636_v56  ;;  %v5133_v43 = vld [vmem:[#allocation13 + $0x38] sm:$0xff]  }
 0x24a   : > { %4523 = vmatprep.subr.bf16.mxu1 %v6606_v44  ;;  %v5134_v44 = vld [vmem:[#allocation10] sm:$0xff]  }
 0x24b   : > { %1413 = vmatmul.mubr.bf16.gmra.mrb[12].mxu0 %v4193_v39 }
 0x24c   : > { %1522 = vmatmul.mubr.bf16.gmra.mrb[12].mxu1 %v4249_v3  ;;  %4496 = vmatpush3.bf16.msra.mxu0 %v6516_v11  ;;  %v819_v11 = vmul.bf16 %v6671_v14, %v783_v20 }
 0x24d   : > { %4524 = vmatpush3.bf16.msra.mxu1 %v6610_v45  ;;  %4497 = vmatprep.subr.bf16.mxu0 %v6522_v13  ;;  %v822_v13 = vmul.bf16 %v6674_v16, %v786_v22  ;;  %v5135_v45 = vld [vmem:[#allocation10 + $0x8] sm:$0xff]  }
 0x24e   : > { %4525 = vmatprep.subr.bf16.mxu1 %v6620_v48  ;;  %1562 = vmatprep.mubr.bf16.mxu0 %v4246_v5  ;;  %v5138_v48 = vld [vmem:[#allocation10 + $0x20] sm:$0xff]  }
 0x24f   : > { %1611 = vmatprep.mubr.bf16.mxu1 %v4248_v35 }
 0x250   : > { %4498 = vmatpush3.bf16.msra.mxu0 %v6528_v15  ;;  %v4245_v15 = vcombine.low %v812_v28, %v815_v1 }
 0x251   : > { %4526 = vmatpush3.bf16.msra.mxu1 %v6622_v49  ;;  %4499 = vmatprep.subr.bf16.mxu0 %v6534_v17  ;;  %v4247_v17 = vcombine.low %v813_v30, %v816_v38  ;;  %v5139_v49 = vld [vmem:[#allocation10 + $0x28] sm:$0xff]  }
 0x252   : > { %4527 = vmatprep.subr.bf16.mxu1 %v6628_v52  ;;  %v6732_v52 = vld [vmem:[#allocation16] sm:$0xff]  }
 0x254   : > { %4500 = vmatpush3.bf16.msra.mxu0 %v6540_v19  ;;  %v4252_v19 = vcombine.high %v818_v7, %v821_v9 }
 0x255   : > { %4528 = vmatpush3.bf16.msra.mxu1 %v6646_v61  ;;  %4501 = vmatprep.subr.bf16.mxu0 %v6546_v21  ;;  %v4254_v21 = vcombine.high %v819_v11, %v822_v13 }
 0x256   : > { %4529 = vmatprep.subr.bf16.mxu1 %v6650_v62 }
 0x258   : > { %4502 = vmatpush3.bf16.msra.mxu0 %v6552_v23  ;;  %v4251_v23 = vcombine.low %v818_v7, %v821_v9 }
 0x259   : > { %4530 = vmatpush3.bf16.msra.mxu1 %v6654_v2  ;;  %4503 = vmatprep.subr.bf16.mxu0 %v6558_v25  ;;  %v4253_v25 = vcombine.low %v819_v11, %v822_v13 }
 0x25a   : > { %4531 = vmatprep.subr.bf16.mxu1 %v6656_v8 }
 0x25c   : > { %4504 = vmatpush3.bf16.msra.mxu0 %v6564_v27  ;;  %v5126_v27 = vld [vmem:[#allocation13] sm:$0xff]  }
 0x25d   : > { %4532 = vmatpush3.bf16.msra.mxu1 %v6662_v10  ;;  %4505 = vmatprep.subr.bf16.mxu0 %v6570_v29  ;;  %v5127_v29 = vld [vmem:[#allocation13 + $0x8] sm:$0xff]  }
 0x25e   : > { %4533 = vmatprep.subr.bf16.mxu1 %v6664_v12 }
 0x260   : > { %4506 = vmatpush3.bf16.msra.mxu0 %v6576_v31  ;;  %v5129_v31 = vld [vmem:[#allocation13 + $0x18] sm:$0xff]  }
 0x261   : > { %4534 = vmatpush3.bf16.msra.mxu1 %v6676_v18  ;;  %4635 = vmatprep.subr.bf16.mxu0 %v5134_v44 }
 0x262   : > { %4655 = vmatprep.subr.bf16.mxu1 %v5126_v27 }
 0x263   : > { %1563 = vmatmul.mubr.bf16.vlgmr.msra.gmra.mrb[16].mxu0 %v4245_v15 }
 0x264   : > { %1612 = vmatmul.mubr.bf16.vlgmr.msra.gmra.mrb[16].mxu1 %v4247_v17  ;;  %1570 = vmatprep.mubr.bf16.mxu0 %v4252_v19 }
 0x265   : > { %1619 = vmatprep.mubr.bf16.mxu1 %v4254_v21  ;;  %4656 = vmatpush3.bf16.msra.mxu1 %v5126_v27 }
 0x266   : > { %4657 = vmatprep.subr.bf16.mxu1 %v5127_v29  ;;  %4636 = vmatpush3.bf16.msra.mxu0 %v5134_v44 }
 0x267   : > { %4637 = vmatprep.subr.bf16.mxu0 %v5135_v45 }
 0x269   : > { %4658 = vmatpush3.bf16.msra.mxu1 %v5127_v29 }
 0x26a   : > { %4659 = vmatprep.subr.bf16.mxu1 %v5128_v36  ;;  %4638 = vmatpush3.bf16.msra.mxu0 %v5135_v45 }
 0x26b   : > { %1571 = vmatmul.mubr.bf16.gmra.mrb[20].mxu0 %v4251_v23  ;;  %4639 = vmatprep.subr.bf16.mxu0 %v5136_v46 }
 0x26c   : > { %1620 = vmatmul.mubr.bf16.gmra.mrb[20].mxu1 %v4253_v25 }
 0x26d   : > { %4660 = vmatpush3.bf16.msra.mxu1 %v5128_v36 }
 0x26e   : > { %4661 = vmatprep.subr.bf16.mxu1 %v5129_v31  ;;  %4640 = vmatpush3.bf16.msra.mxu0 %v5136_v46 }
 0x26f   : > { %4641 = vmatprep.subr.bf16.mxu0 %v5137_v47 }
 0x271   : > { %4662 = vmatpush3.bf16.msra.mxu1 %v5129_v31 }
 0x272   : > { %4663 = vmatprep.subr.bf16.mxu1 %v5130_v40  ;;  %4642 = vmatpush3.bf16.msra.mxu0 %v5137_v47 }
 0x273   : > { %4643 = vmatprep.subr.bf16.mxu0 %v5138_v48 }
 0x275   : > { %4664 = vmatpush3.bf16.msra.mxu1 %v5130_v40 }
 0x276   : > { %4665 = vmatprep.subr.bf16.mxu1 %v5131_v41  ;;  %4644 = vmatpush3.bf16.msra.mxu0 %v5138_v48 }
 0x277   : > { %4645 = vmatprep.subr.bf16.mxu0 %v5139_v49 }
 0x279   : > { %4666 = vmatpush3.bf16.msra.mxu1 %v5131_v41 }
 0x27a   : > { %4667 = vmatprep.subr.bf16.mxu1 %v5132_v42  ;;  %4646 = vmatpush3.bf16.msra.mxu0 %v5139_v49 }
 0x27b   : > { %4647 = vmatprep.subr.bf16.mxu0 %v5140_v50 }
 0x27d   : > { %4668 = vmatpush3.bf16.msra.mxu1 %v5132_v42 }
 0x27e   : > { %4669 = vmatprep.subr.bf16.mxu1 %v5133_v43  ;;  %4648 = vmatpush3.bf16.msra.mxu0 %v5140_v50 }
 0x27f   : > { %4649 = vmatprep.subr.bf16.mxu0 %v5141_v51 }
 0x281   : > { %4670 = vmatpush3.bf16.msra.mxu1 %v5133_v43 }
 0x282   : > { %4650 = vmatpush3.bf16.msra.mxu0 %v5141_v51 }
 0x283   : > { %4675 = vmatprep.subr.bf16.mxu0 %v6732_v52 }
 0x2f6   : > { %v4395_v53 = vpop.f32.mrb[0].mxu0 }
 0x2f7   : > { %v4423_v54 = vpop.f32.mrb[0].mxu1  ;;  %v4396_v56 = vpop.f32.mrb[1].mxu0 }
 0x2f8   : > { %v4397_v57 = vadd.f32 %v4396_v56, %v4395_v53  ;;  %v4424_v58 = vpop.f32.mrb[1].mxu1  ;;  %v4398_v59 = vpop.f32.mrb[2].mxu0 }
 0x2f9   : > { %v4425_v60 = vadd.f32 %v4424_v58, %v4423_v54  ;;  %v4426_v61 = vpop.f32.mrb[2].mxu1  ;;  %v4399_v62 = vpop.f32.mrb[3].mxu0 }
 0x2fa   : > { %v1309_v63 = vadd.f32 %v4397_v57, %v6735_v55  ;;  %v4400_v0 = vadd.f32 %v4399_v62, %v4398_v59  ;;  %v4427_v2 = vpop.f32.mrb[3].mxu1 }
 0x2fb   : > { %v4428_v4 = vadd.f32 %v4427_v2, %v4426_v61 }
 0x2fc   : > { %v1358_v6 = vadd.f32 %v4425_v60, %v1309_v63  ;;  %v1312_v8 = vadd.f32 %v4400_v0, %v6735_v55 }
 0x2fe   : > { %v1361_v10 = vadd.f32 %v4428_v4, %v1312_v8  ;;  %v4401_v12 = vpop.f32.mrb[4].mxu0 }
 0x2ff   : > { %v4402_v14 = vpop.f32.mrb[5].mxu0  ;;  %v4429_v32 = vpop.f32.mrb[4].mxu1 }
 0x300   : > { %v4403_v16 = vadd.f32 %v4402_v14, %v4401_v12  ;;  %v4404_v18 = vpop.f32.mrb[6].mxu0  ;;  %v4430_v33 = vpop.f32.mrb[5].mxu1 }
 0x301   : > { %v4405_v20 = vpop.f32.mrb[7].mxu0  ;;  %v4431_v26 = vadd.f32 %v4430_v33, %v4429_v32  ;;  %v4432_v37 = vpop.f32.mrb[6].mxu1 }
 0x302   : > { %v1317_v22 = vadd.f32 %v4403_v16, %v6735_v55  ;;  %v4406_v24 = vadd.f32 %v4405_v20, %v4404_v18  ;;  %v4433_v28 = vpop.f32.mrb[7].mxu1 }
 0x303   : > { %v4434_v30 = vadd.f32 %v4433_v28, %v4432_v37 }
 0x304   : > { %v1320_v34 = vadd.f32 %v4406_v24, %v6735_v55  ;;  %v1366_v1 = vadd.f32 %v4431_v26, %v1317_v22 }
 0x306   : > { %v1369_v38 = vadd.f32 %v4434_v30, %v1320_v34 }
 0x316   : > { %v4451_v39 = vpop.f32.mrb[8].mxu0 }
 0x317   : > { %v4479_v3 = vpop.f32.mrb[8].mxu1  ;;  %v4452_v5 = vpop.f32.mrb[9].mxu0 }
 0x318   : > { %v4480_v35 = vpop.f32.mrb[9].mxu1  ;;  %v4453_v7 = vadd.f32 %v4452_v5, %v4451_v39  ;;  %v4454_v11 = vpop.f32.mrb[10].mxu0 }
 0x319   : > { %v4481_v9 = vadd.f32 %v4480_v35, %v4479_v3  ;;  %v4482_v13 = vpop.f32.mrb[10].mxu1  ;;  %v4455_v15 = vpop.f32.mrb[11].mxu0 }
 0x31a   : > { %v4483_v17 = vpop.f32.mrb[11].mxu1  ;;  %v1407_v19 = vadd.f32 %v4453_v7, %v1358_v6  ;;  %v4456_v21 = vadd.f32 %v4455_v15, %v4454_v11  ;;  %v5143_v11 = vld [vmem:[#allocation16 + $0x8] sm:$0xff]   ;;  %v5145_v15 = vld [vmem:[#allocation16 + $0x18] sm:$0xff]  }
 0x31b   : > { %v4484_v23 = vadd.f32 %v4483_v17, %v4482_v13  ;;  %v1516_v58 = vadd.f32 %v4481_v9, %v6735_v55  ;;  %v5144_v13 = vld [vmem:[#allocation16 + $0x10] sm:$0xff]   ;;  %v5147_v17 = vld [vmem:[#allocation16 + $0x28] sm:$0xff]  }
 0x31c   : > { %v1410_v25 = vadd.f32 %v4456_v21, %v1361_v10  ;;  %v5149_v21 = vld [vmem:[#allocation16 + $0x38] sm:$0xff]  }
 0x31d   : > { %v1519_v2 = vadd.f32 %v4484_v23, %v6735_v55 }
 0x31e   : > { %v4457_v27 = vpop.f32.mrb[12].mxu0  ;;  %v1628_v29 = vpack.c.bf16 %v1410_v25, %v1407_v19  ;;  %v5148_v19 = vld [vmem:[#allocation16 + $0x30] sm:$0xff]   ;;  %v4264_v25 = vld [vmem:[#allocation14] ss:$0 sm:$0xff] }
 0x31f   : > { %v4485_v36 = vpop.f32.mrb[12].mxu1  ;;  %v4458_v31 = vpop.f32.mrb[13].mxu0 }
 0x320   : > { %v4486_v40 = vpop.f32.mrb[13].mxu1  ;;  %v4459_v41 = vadd.f32 %v4458_v31, %v4457_v27  ;;  %v4460_v42 = vpop.f32.mrb[14].mxu0  ;;  %4671 = vmatprep.mubr.bf16.mxu1 %v1628_v29 }
 0x321   : > { %v4487_v43 = vadd.f32 %v4486_v40, %v4485_v36  ;;  %v4488_v44 = vpop.f32.mrb[14].mxu1  ;;  %v4461_v45 = vpop.f32.mrb[15].mxu0 }
 0x322   : > { %v4489_v46 = vpop.f32.mrb[15].mxu1  ;;  %v1415_v47 = vadd.f32 %v4459_v41, %v1366_v1  ;;  %v4462_v48 = vadd.f32 %v4461_v45, %v4460_v42 }
 0x323   : > { %v4490_v49 = vadd.f32 %v4489_v46, %v4488_v44  ;;  %v1524_v32 = vadd.f32 %v4487_v43, %v6735_v55 }
 0x324   : > { %v1418_v50 = vadd.f32 %v4462_v48, %v1369_v38 }
 0x325   : > { %v1527_v30 = vadd.f32 %v4490_v49, %v6735_v55  ;;  %v5146_v55 = vld [vmem:[#allocation16 + $0x20] sm:$0xff]  }
 0x326   : > { %v6741_v51 = vpack.c.bf16 %v1418_v50, %v1415_v47  ;;  %v4255_v47 = vld [vmem:[#allocation11] ss:$0 sm:$0xff] }
 0x328   : > { %4672 = vmatmul.mubr.bf16.vlgmr.msra.gmra.mrb[24].mxu1 %v6741_v51 }
 0x336   : > { %v4507_v53 = vpop.f32.mrb[16].mxu0 }
 0x337   : > { %v4535_v54 = vpop.f32.mrb[16].mxu1  ;;  %v4508_v56 = vpop.f32.mrb[17].mxu0 }
 0x338   : > { %v4536_v57 = vpop.f32.mrb[17].mxu1  ;;  %v4509_v59 = vadd.f32 %v4508_v56, %v4507_v53  ;;  %v4510_v61 = vpop.f32.mrb[18].mxu0 }
 0x339   : > { %v4537_v60 = vadd.f32 %v4536_v57, %v4535_v54  ;;  %v4538_v62 = vpop.f32.mrb[18].mxu1  ;;  %v4511_v63 = vpop.f32.mrb[19].mxu0 }
 0x33a   : > { %v4539_v0 = vpop.f32.mrb[19].mxu1  ;;  %v1565_v4 = vadd.f32 %v4509_v59, %v1516_v58  ;;  %v4512_v6 = vadd.f32 %v4511_v63, %v4510_v61 }
 0x33b   : > { %v4540_v8 = vadd.f32 %v4539_v0, %v4538_v62 }
 0x33c   : > { %v1614_v10 = vadd.f32 %v4537_v60, %v1565_v4  ;;  %v1568_v12 = vadd.f32 %v4512_v6, %v1519_v2  ;;  %v4273_v60 = vld [vmem:[#allocation17] ss:$0 sm:$0xff] }
 0x33e   : > { %v1617_v14 = vadd.f32 %v4540_v8, %v1568_v12  ;;  %v4513_v16 = vpop.f32.mrb[20].mxu0 }
 0x33f   : > { %v4541_v18 = vpop.f32.mrb[20].mxu1  ;;  %v4514_v20 = vpop.f32.mrb[21].mxu0 }
 0x340   : > { %v4542_v22 = vpop.f32.mrb[21].mxu1  ;;  %v4515_v24 = vadd.f32 %v4514_v20, %v4513_v16  ;;  %v4516_v34 = vpop.f32.mrb[22].mxu0  ;;  %v1630_v37 = vpack.c.bf16 %v1617_v14, %v1614_v10 }
 0x341   : > { %v4543_v33 = vadd.f32 %v4542_v22, %v4541_v18  ;;  %v4544_v26 = vpop.f32.mrb[22].mxu1  ;;  %v4517_v28 = vpop.f32.mrb[23].mxu0 }
 0x342   : > { %v4545_v1 = vpop.f32.mrb[23].mxu1  ;;  %v1573_v38 = vadd.f32 %v4515_v24, %v1524_v32  ;;  %v4518_v39 = vadd.f32 %v4517_v28, %v4516_v34  ;;  %4651 = vmatprep.mubr.bf16.mxu0 %v1630_v37 }
 0x343   : > { %v4546_v3 = vadd.f32 %v4545_v1, %v4544_v26 }
 0x344   : > { %v1622_v5 = vadd.f32 %v4543_v33, %v1573_v38  ;;  %v1576_v35 = vadd.f32 %v4518_v39, %v1527_v30 }
 0x346   : > { %v1625_v7 = vadd.f32 %v4546_v3, %v1576_v35 }
 0x348   : > { %v1631_v9 = vpack.c.bf16 %v1625_v7, %v1622_v5 }
 0x34a   : > { %4652 = vmatmul.mubr.bf16.vlgmr.msra.gmra.mrb[24].mxu0 %v1631_v9 }
 0x34b   : > { %4676 = vmatpush3.bf16.msra.mxu0 %v6732_v52  ;;  %4691 = vmatprep.mubr.bf16.mxu0 %v1628_v29  ;;  %v5880_v52 = vmov 0.0  }
 0x34c   : > { %4677 = vmatprep.subr.bf16.mxu0 %v5143_v11  ;;  %4695 = vmatprep.subr.bf16.mxu1 %v5880_v52 }
 0x34d   : > { %4697 = vmatprep.mubr.msk.bf16.mxu1 %vm5881_vm0, %v5880_v52 }
 0x34f   : > { %4678 = vmatpush3.bf16.msra.mxu0 %v5143_v11 }
 0x350   : > { %4679 = vmatprep.subr.bf16.mxu0 %v5144_v13 }
 0x353   : > { %4680 = vmatpush3.bf16.msra.mxu0 %v5144_v13 }
 0x354   : > { %4681 = vmatprep.subr.bf16.mxu0 %v5145_v15 }
 0x357   : > { %4682 = vmatpush3.bf16.msra.mxu0 %v5145_v15 }
 0x358   : > { %4683 = vmatprep.subr.bf16.mxu0 %v5146_v55 }
 0x35b   : > { %4684 = vmatpush3.bf16.msra.mxu0 %v5146_v55 }
 0x35c   : > { %4685 = vmatprep.subr.bf16.mxu0 %v5147_v17 }
 0x35f   : > { %4686 = vmatpush3.bf16.msra.mxu0 %v5147_v17 }
 0x360   : > { %4687 = vmatprep.subr.bf16.mxu0 %v5148_v19 }
 0x363   : > { %4688 = vmatpush3.bf16.msra.mxu0 %v5148_v19 }
 0x364   : > { %4689 = vmatprep.subr.bf16.mxu0 %v5149_v21 }
 0x367   : > { %4690 = vmatpush3.bf16.msra.mxu0 %v5149_v21 }
 0x368   : > { %4731 = vmatprep.subr.bf16.mxu0 %v5880_v52 }
 0x36a   : > { %4692 = vmatmul.mubr.bf16.vlgmr.msra.gmra.mrb[28].mxu0 %v6741_v51 }
 0x36b   : > { %4733 = vmatprep.mubr.msk.bf16.mxu0 %vm5881_vm0, %v5880_v52 }
 0x3fb   : > { %v4673_v23 = vpop.f32.mrb[24].mxu1 }
 0x3fc   : > { %v1857_v27 = vpop.f32.mrb[25].mxu1  ;;  %v1866_v36 = vadd.f32 %v4673_v23, %v4264_v25 }
 0x3fd   : > { %v4674_v29 = vpop.f32.mrb[26].mxu1  ;;  %v1858_v41 = vadd.f32 %v4264_v25, %v1857_v27 }
 0x3fe   : > { %v1869_v31 = vadd.f32 %v4674_v29, %v4264_v25  ;;  %v1860_v40 = vpop.f32.mrb[27].mxu1 }
 0x3ff   : > { %v1861_v42 = vadd.f32 %v4264_v25, %v1860_v40 }
 0x400   : > { %v6756_v43 = vpack.c.bf16 %v1869_v31, %v1866_v36 }
 0x401   : > { %v6758_v44 = vpack.c.bf16 %v1861_v42, %v1858_v41 }
 0x402   : > { %v2066_v59 = vsel %vm2014_vm1, %v6756_v43, 0 }
 0x403   : > { %v2019_v45 = vsel %vm2014_vm1, %v6758_v44, 0 }
 0x404   : > { %4696 = vmatpush3.bf16.xpose.msra.mxu1 %v2019_v45 }
 0x405   : > { %4701 = vmatprep.subr.bf16.mxu1 %v5880_v52 }
 0x41d   : > { %v4653_v46 = vpop.f32.mrb[24].mxu0 }
 0x41e   : > { %v1737_v48 = vpop.f32.mrb[25].mxu0  ;;  %v1746_v50 = vadd.f32 %v4653_v46, %v4255_v47 }
 0x41f   : > { %v4654_v49 = vpop.f32.mrb[26].mxu0  ;;  %v1738_v54 = vadd.f32 %v4255_v47, %v1737_v48 }
 0x420   : > { %v1749_v51 = vadd.f32 %v4654_v49, %v4255_v47  ;;  %v1740_v53 = vpop.f32.mrb[27].mxu0 }
 0x421   : > { %v1741_v56 = vadd.f32 %v4255_v47, %v1740_v53 }
 0x422   : > { %v6763_v57 = vpack.c.bf16 %v1749_v51, %v1746_v50 }
 0x423   : > { %v6765_v58 = vpack.c.bf16 %v1741_v56, %v1738_v54 }
 0x425   : > { %4698 = vmatmul.mubr.msk.bf16.vlgmr.msra.gmra.mrb[28].mxu1 %vm2014_vm1, %v6765_v58 }
 0x426   : > { %4702 = vmatpush3.bf16.xpose.msra.mxu1 %v2066_v59  ;;  %4703 = vmatprep.mubr.msk.bf16.mxu1 %vm5881_vm0, %v5880_v52 }
 0x427   : > { %4707 = vmatprep.subr.bf16.mxu1 %v5880_v52 }
 0x42d   : > { %4704 = vmatmul.mubr.msk.bf16.vlgmr.msra.gmra.mrb[32].mxu1 %vm2014_vm1, %v6763_v57 }
 0x42e   : > { %4709 = vmatprep.mubr.msk.bf16.mxu1 %vm5881_vm0, %v5880_v52 }
 0x43d   : > { %v4693_v61 = vpop.f32.mrb[28].mxu0 }
 0x43e   : > { %v1986_v62 = vadd.f32 %v4693_v61, %v4273_v60  ;;  %v1977_v63 = vpop.f32.mrb[29].mxu0 }
 0x43f   : > { %v4694_v0 = vpop.f32.mrb[30].mxu0  ;;  %v1978_v6 = vadd.f32 %v4273_v60, %v1977_v63 }
 0x440   : > { %v1989_v2 = vadd.f32 %v4694_v0, %v4273_v60  ;;  %v1980_v4 = vpop.f32.mrb[31].mxu0 }
 0x441   : > { %v1981_v8 = vadd.f32 %v4273_v60, %v1980_v4 }
 0x442   : > { %v6778_v10 = vpack.c.bf16 %v1989_v2, %v1986_v62 }
 0x443   : > { %v6780_v12 = vpack.c.bf16 %v1981_v8, %v1978_v6 }
 0x445   : > { %4708 = vmatpush3.bf16.msra.mxu1 %v6780_v12 }
 0x446   : > { %4713 = vmatprep.subr.bf16.mxu1 %v5880_v52 }
 0x4f8   : > { %v2055_v14 = vpop.f32.mrb[28].mxu1 }
 0x4f9   : > { %v4699_v16 = vpop.f32.mrb[29].mxu1  ;;  %v2110_v18 = vsel %vm2109_vm2, %v2055_v14, -inf }
 0x4fa   : > { %2111 = vmax.xlane.f32.xlu0 %v2110_v18  ;;  %v2058_v20 = vpop.f32.mrb[30].mxu1 }
 0x4fb   : > { %v4700_v22 = vpop.f32.mrb[31].mxu1  ;;  %v2113_v32 = vsel %vm2109_vm2, %v2058_v20, -inf }
 0x4fe   : > { %2114 = vmax.xlane.f32.xlu0 %v2113_v32 }
 0x500   : > { %v2102_v24 = vpop.f32.mrb[32].mxu1 }
 0x501   : > { %v4705_v33 = vpop.f32.mrb[33].mxu1  ;;  %v2116_v34 = vsel %vm2109_vm2, %v2102_v24, -inf }
 0x502   : > { %2117 = vmax.xlane.f32.xlu1 %v2116_v34  ;;  %v2105_v26 = vpop.f32.mrb[34].mxu1 }
 0x503   : > { %v4706_v37 = vpop.f32.mrb[35].mxu1  ;;  %v2119_v28 = vsel %vm2109_vm2, %v2105_v26, -inf }
 0x506   : > { %2120 = vmax.xlane.f32.xlu1 %v2119_v28 }
 0x514   : > { %2250 = vrot.lane.b32.xlu0 %v6758_v44, %s5882_s16 }
 0x517   : > { %2247 = vrot.lane.b32.xlu1 %v6765_v58, %s5882_s16 }
 0x51b   : > { %2303 = vrot.lane.b32.xlu1 %v6756_v43, %s5882_s16 }
 0x51f   : > { %2300 = vrot.lane.b32.xlu1 %v6763_v57, %s5882_s16 }
 0x587   : > { %v2112_v1 = vpop.xlane.xlu0 %2111 }
 0x588   : > { %v2122_v30 = vsub.f32 %v2055_v14, %v2112_v1 }
 0x58a   : > { %v2126_v38 = vmul.f32 1.442695, %v2122_v30 }
 0x58b   : > { %v2115_v39 = vpop.xlane.xlu0 %2114 }
 0x58c   : > { %v2123_v3 = vsub.f32 %v2058_v20, %v2115_v39  ;;  %5238 = vpow2.f32 %v2126_v38 }
 0x58e   : > { %v2128_v5 = vmul.f32 1.442695, %v2123_v3 }
 0x58f   : > { %v2118_v35 = vpop.xlane.xlu1 %2117  ;;  %v2251_v25 = vpop.permute.xlu0 %2250 }
 0x590   : > { %5240 = vpow2.f32 %v2128_v5  ;;  %v2124_v7 = vsub.f32 %v2102_v24, %v2118_v35  ;;  %v2256_v36 = vsel %vm2014_vm1, %v2251_v25, 0 }
 0x592   : > { %v2130_v9 = vmul.f32 1.442695, %v2124_v7 }
 0x593   : > { %v2121_v11 = vpop.xlane.xlu1 %2120 }
 0x594   : > { %v2125_v13 = vsub.f32 %v2105_v26, %v2121_v11  ;;  %5242 = vpow2.f32 %v2130_v9 }
 0x596   : > { %v2132_v15 = vmul.f32 1.442695, %v2125_v13  ;;  %v5239_v55 = vpop.eup %5238 }
 0x597   : > { %v2248_v29 = vpop.permute.xlu1 %2247  ;;  %v2134_v8 = vsel %vm2109_vm2, %v5239_v55, 0.0 }
 0x598   : > { %5244 = vpow2.f32 %v2132_v15 }
 0x59a   : > { %v5241_v17 = vpop.eup %5240 }
 0x59b   : > { %v2146_v19 = vpack.c.bf16 %v5241_v17, %v5239_v55  ;;  %v2304_v31 = vpop.permute.xlu1 %2303  ;;  %v2137_v18 = vsel %vm2109_vm2, %v5241_v17, 0.0 }
 0x59c   : > { %v2309_v40 = vsel %vm2014_vm1, %v2304_v31, 0 }
 0x59d   : > { %4710 = vmatmul.mubr.msk.bf16.vlgmr.msra.gmra.mrb[36].mxu1 %vm2109_vm2, %v2146_v19 }
 0x59e   : > { %4714 = vmatpush3.bf16.msra.mxu1 %v6778_v10  ;;  %4715 = vmatprep.mubr.msk.bf16.mxu1 %vm5881_vm0, %v5880_v52  ;;  %v5243_v21 = vpop.eup %5242 }
 0x59f   : > { %4719 = vmatprep.subr.bf16.mxu1 %v5880_v52  ;;  %v2301_v41 = vpop.permute.xlu1 %2300  ;;  %v2140_v14 = vsel %vm2109_vm2, %v5243_v21, 0.0 }
 0x5a2   : > { %v5245_v23 = vpop.eup %5244 }
 0x5a3   : > { %v2147_v27 = vpack.c.bf16 %v5245_v23, %v5243_v21  ;;  %v2143_v16 = vsel %vm2109_vm2, %v5245_v23, 0.0 }
 0x5a5   : > { %4716 = vmatmul.mubr.msk.bf16.vlgmr.msra.gmra.mrb[40].mxu1 %vm2109_vm2, %v2147_v27 }
 0x5a6   : > { %4721 = vmatprep.mubr.msk.bf16.mxu1 %vm5881_vm0, %v5880_v52 }
 0x5a7   : > { %4720 = vmatpush3.bf16.xpose.msra.mxu1 %v2256_v36 }
 0x5a8   : > { %4725 = vmatprep.subr.bf16.mxu1 %v5880_v52 }
 0x5ae   : > { %4722 = vmatmul.mubr.msk.bf16.vlgmr.msra.gmra.mrb[44].mxu1 %vm2014_vm1, %v2248_v29 }
 0x5af   : > { %4726 = vmatpush3.bf16.xpose.msra.mxu1 %v2309_v40  ;;  %4727 = vmatprep.mubr.msk.bf16.mxu1 %vm5881_vm0, %v5880_v52 }
 0x5b0   : > { %4737 = vmatprep.subr.bf16.mxu1 %v5880_v52 }
 0x5b6   : > { %4728 = vmatmul.mubr.msk.bf16.vlgmr.msra.gmra.mrb[48].mxu1 %vm2014_vm1, %v2301_v41 }
 0x5b7   : > { %4739 = vmatprep.mubr.msk.bf16.mxu1 %vm5881_vm0, %v5880_v52 }
 0x670   : > { %v6814_v42 = vpop.f32.mrb[36].mxu1 }
 0x671   : > { %v4711_v45 = vpop.f32.mrb[37].mxu1 }
 0x672   : > { %v6816_v46 = vpop.f32.mrb[38].mxu1 }
 0x673   : > { %v4712_v47 = vpop.f32.mrb[39].mxu1 }
 0x678   : > { %v6818_v48 = vpop.f32.mrb[40].mxu1 }
 0x679   : > { %v4717_v49 = vpop.f32.mrb[41].mxu1 }
 0x67a   : > { %v6820_v50 = vpop.f32.mrb[42].mxu1 }
 0x67b   : > { %v4718_v51 = vpop.f32.mrb[43].mxu1 }
 0x681   : > { %v6822_v53 = vpop.f32.mrb[44].mxu1 }
 0x682   : > { %v4723_v54 = vpop.f32.mrb[45].mxu1  ;;  %v2352_v4 = vsel %vm2109_vm2, %v6822_v53, -inf }
 0x683   : > { %v6824_v56 = vpop.f32.mrb[46].mxu1 }
 0x684   : > { %v4724_v59 = vpop.f32.mrb[47].mxu1  ;;  %v2355_v6 = vsel %vm2109_vm2, %v6824_v56, -inf }
 0x689   : > { %v2345_v60 = vpop.f32.mrb[48].mxu1 }
 0x68a   : > { %v4729_v61 = vpop.f32.mrb[49].mxu1  ;;  %v2358_v62 = vsel %vm2109_vm2, %v2345_v60, -inf }
 0x68b   : > { %2359 = vmax.xlane.f32.xlu0 %v2358_v62  ;;  %v2348_v63 = vpop.f32.mrb[50].mxu1  ;;  %v5150_v62 = vld [vmem:[#allocation19 + $0x10] sm:$0xff]  }
 0x68c   : > { %v4730_v0 = vpop.f32.mrb[51].mxu1  ;;  %v2361_v2 = vsel %vm2109_vm2, %v2348_v63, -inf }
 0x68d   : > { %2362 = vmax.xlane.f32.xlu1 %v2361_v2  ;;  %v5152_v0 = vld [vmem:[#allocation19] sm:$0xff]  }
 0x69e   : > { %2632 = vrot.lane.b32.xlu1 %v6758_v44, %s5883_s5 }
 0x6a1   : > { %2439 = vrot.lane.b32.xlu0 %v6778_v10, %s5882_s16 }
 0x6a2   : > { %2683 = vrot.lane.b32.xlu1 %v6756_v43, %s5883_s5 }
 0x6a5   : > { %2630 = vrot.lane.b32.xlu0 %v6765_v58, %s5883_s5 }
 0x6a9   : > { %2681 = vrot.lane.b32.xlu0 %v6763_v57, %s5883_s5 }
 0x6c6   : > { %2353 = vmax.xlane.f32.xlu1 %v2352_v4 }
 0x6c8   : > { %2356 = vmax.xlane.f32.xlu0 %v2355_v6 }
 0x6ca   : > { %2135 = vadd.xlane.f32.xlu1 %v2134_v8 }
 0x6ce   : > { %2141 = vadd.xlane.f32.xlu1 %v2140_v14 }
 0x6d2   : > { %2144 = vadd.xlane.f32.xlu1 %v2143_v16 }
 0x6de   : > { %2391 = vrot.lane.b32.xlu0 %v6780_v12, %s5882_s16 }
 0x6fd   : > { %2138 = vadd.xlane.f32.xlu0 %v2137_v18 }
 0x713   : > { %2817 = vrot.lane.b32.xlu0 %v6778_v10, %s5883_s5 }
 0x718   : > { %v2360_v20 = vpop.xlane.xlu0 %2359 }
 0x719   : > { %v2366_v22 = vsub.f32 %v2345_v60, %v2360_v20 }
 0x71a   : > { %v2363_v32 = vpop.xlane.xlu1 %2362 }
 0x71b   : > { %v2372_v24 = vmul.f32 1.442695, %v2366_v22  ;;  %v2367_v33 = vsub.f32 %v2348_v63, %v2363_v32  ;;  %v5151_v63 = vld [vmem:[#allocation19 + $0x18] sm:$0xff]  }
 0x71c   : > { %v2440_v34 = vpop.permute.xlu0 %2439 }
 0x71d   : > { %v2374_v26 = vmul.f32 1.442695, %v2367_v33  ;;  %4738 = vmatpush3.bf16.msra.mxu1 %v2440_v34  ;;  %5246 = vpow2.f32 %v2372_v24 }
 0x71e   : > { %4759 = vmatprep.subr.bf16.mxu1 %v5880_v52  ;;  %v2633_v1 = vpop.permute.xlu1 %2632 }
 0x71f   : > { %5248 = vpow2.f32 %v2374_v26  ;;  %v2638_v38 = vsel %vm2014_vm1, %v2633_v1, 0 }
 0x720   : > { %v2631_v3 = vpop.permute.xlu0 %2630 }
 0x722   : > { %v2684_v39 = vpop.permute.xlu1 %2683 }
 0x723   : > { %v2689_v5 = vsel %vm2014_vm1, %v2684_v39, 0 }
 0x724   : > { %v2682_v35 = vpop.permute.xlu0 %2681 }
 0x727   : > { %v5247_v37 = vpop.eup %5246 }
 0x728   : > { %v2382_v49 = vsel %vm2109_vm2, %v5247_v37, 0.0 }
 0x729   : > { %v5249_v28 = vpop.eup %5248 }
 0x72a   : > { %v2389_v30 = vpack.c.bf16 %v5249_v28, %v5247_v37 }
 0x72c   : > { %4740 = vmatmul.mubr.msk.bf16.vlgmr.msra.gmra.mrb[52].mxu1 %vm2109_vm2, %v2389_v30 }
 0x72d   : > { %4760 = vmatpush3.bf16.xpose.msra.mxu1 %v2638_v38  ;;  %4761 = vmatprep.mubr.msk.bf16.mxu1 %vm5881_vm0, %v5880_v52 }
 0x72e   : > { %4765 = vmatprep.subr.bf16.mxu1 %v5880_v52 }
 0x734   : > { %4762 = vmatmul.mubr.msk.bf16.vlgmr.msra.gmra.mrb[56].mxu1 %vm2014_vm1, %v2631_v3 }
 0x735   : > { %4766 = vmatpush3.bf16.xpose.msra.mxu1 %v2689_v5  ;;  %4767 = vmatprep.mubr.msk.bf16.mxu1 %vm5881_vm0, %v5880_v52 }
 0x736   : > { %4777 = vmatprep.subr.bf16.mxu1 %v5880_v52 }
 0x73c   : > { %4768 = vmatmul.mubr.msk.bf16.vlgmr.msra.gmra.mrb[60].mxu1 %vm2014_vm1, %v2682_v35 }
 0x73d   : > { %4779 = vmatprep.mubr.msk.bf16.mxu1 %vm5881_vm0, %v5880_v52 }
 0x753   : > { %v2354_v7 = vpop.xlane.xlu1 %2353 }
 0x754   : > { %v2364_v9 = vsub.f32 %v6822_v53, %v2354_v7  ;;  %v2385_v53 = vsel %vm2109_vm2, %v5249_v28, 0.0 }
 0x755   : > { %v2357_v11 = vpop.xlane.xlu0 %2356 }
 0x756   : > { %v2368_v13 = vmul.f32 1.442695, %v2364_v9  ;;  %v2365_v15 = vsub.f32 %v6824_v56, %v2357_v11 }
 0x757   : > { %v2136_v55 = vpop.xlane.xlu1 %2135 }
 0x758   : > { %5250 = vpow2.f32 %v2368_v13  ;;  %v2370_v17 = vmul.f32 1.442695, %v2365_v15 }
 0x759   : > { %v2392_v19 = vpop.permute.xlu0 %2391 }
 0x75a   : > { %5252 = vpow2.f32 %v2370_v17  ;;  %4732 = vmatpush3.bf16.msra.mxu0 %v2392_v19 }
 0x75b   : > { %v2142_v21 = vpop.xlane.xlu1 %2141  ;;  %4743 = vmatprep.subr.bf16.mxu0 %v5150_v62 }
 0x75c   : > { %5254 = vrcp.f32 %v2142_v21 }
 0x75f   : > { %v2145_v23 = vpop.xlane.xlu1 %2144 }
 0x760   : > { %5256 = vrcp.f32 %v2145_v23  ;;  %v5153_v23 = vld [vmem:[#allocation19 + $0x8] sm:$0xff]  }
 0x761   : > { %5258 = vrcp.f32 %v2136_v55 }
 0x762   : > { %v5251_v25 = vpop.eup %5250 }
 0x763   : > { %v2376_v27 = vsel %vm2109_vm2, %v5251_v25, 0.0 }
 0x764   : > { %v5253_v29 = vpop.eup %5252  ;;  %2377 = vadd.xlane.f32.xlu1 %v2376_v27 }
 0x765   : > { %v2388_v36 = vpack.c.bf16 %v5253_v29, %v5251_v25  ;;  %v2379_v31 = vsel %vm2109_vm2, %v5253_v29, 0.0 }
 0x766   : > { %v5255_v40 = vpop.eup %5254 }
 0x767   : > { %4734 = vmatmul.mubr.msk.bf16.vlgmr.msra.gmra.mrb[32].mxu0 %vm2109_vm2, %v2388_v36  ;;  %v6870_v45 = vmul.f32 %v5255_v40, %v6818_v48 }
 0x768   : > { %2380 = vadd.xlane.f32.xlu1 %v2379_v31  ;;  %4744 = vmatpush3.bf16.msra.mxu0 %v5150_v62 }
 0x769   : > { %4745 = vmatprep.subr.bf16.mxu0 %v5151_v63 }
 0x76a   : > { %v5257_v41 = vpop.eup %5256 }
 0x76b   : > { %v6873_v47 = vmul.f32 %v5257_v41, %v6820_v50  ;;  %v5259_v48 = vpop.eup %5258 }
 0x76c   : > { %2383 = vadd.xlane.f32.xlu1 %v2382_v49  ;;  %v2240_v50 = vmul.f32 %v5259_v48, %v6814_v42  ;;  %4746 = vmatpush3.bf16.msra.mxu0 %v5151_v63 }
 0x76d   : > { %v2245_v51 = vpack.c.bf16 %v6873_v47, %v6870_v45  ;;  %4751 = vmatprep.subr.bf16.mxu0 %v5152_v0 }
 0x770   : > { %2386 = vadd.xlane.f32.xlu1 %v2385_v53 }
 0x78a   : > { %v2139_v54 = vpop.xlane.xlu0 %2138 }
 0x78b   : > { %5260 = vrcp.f32 %v2139_v54 }
 0x78e   : > { %v2818_v56 = vpop.permute.xlu0 %2817 }
 0x78f   : > { %4778 = vmatpush3.bf16.msra.mxu1 %v2818_v56 }
 0x790   : > { %4791 = vmatprep.subr.bf16.mxu1 %v5880_v52 }
 0x795   : > { %v5261_v59 = vpop.eup %5260 }
 0x796   : > { %v2241_v60 = vmul.f32 %v5261_v59, %v6816_v46 }
 0x798   : > { %v2244_v61 = vpack.c.bf16 %v2241_v60, %v2240_v50 }
 0x7f1   : > { %v2378_v2 = vpop.xlane.xlu1 %2377 }
 0x7f5   : > { %v2381_v4 = vpop.xlane.xlu1 %2380 }
 0x7f9   : > { %v2384_v6 = vpop.xlane.xlu1 %2383 }
 0x7fa   : > { %5262 = vrcp.f32 %v2384_v6  ;;  %v5155_v6 = vld [vmem:[#allocation19 + $0x28] sm:$0xff]  }
 0x7fd   : > { %v2387_v8 = vpop.xlane.xlu1 %2386 }
 0x7fe   : > { %5264 = vrcp.f32 %v2387_v8 }
 0x7ff   : > { %v2479_v14 = vpop.f32.mrb[52].mxu1  ;;  %5266 = vrcp.f32 %v2378_v2 }
 0x800   : > { %v4741_v16 = vpop.f32.mrb[53].mxu1  ;;  %5268 = vrcp.f32 %v2381_v4  ;;  %v5154_v4 = vld [vmem:[#allocation19 + $0x20] sm:$0xff]  }
 0x801   : > { %v2482_v42 = vpop.f32.mrb[54].mxu1 }
 0x802   : > { %v4742_v18 = vpop.f32.mrb[55].mxu1 }
 0x804   : > { %v5263_v46 = vpop.eup %5262 }
 0x805   : > { %v2492_v33 = vmul.f32 %v5263_v46, %v2479_v14 }
 0x807   : > { %v2674_v20 = vpop.f32.mrb[56].mxu1 }
 0x808   : > { %v5265_v22 = vpop.eup %5264  ;;  %v4763_v32 = vpop.f32.mrb[57].mxu1  ;;  %v2732_v24 = vsel %vm2109_vm2, %v2674_v20, -inf }
 0x809   : > { %v2493_v34 = vmul.f32 %v5265_v22, %v2482_v42  ;;  %2733 = vmax.xlane.f32.xlu1 %v2732_v24  ;;  %v2677_v26 = vpop.f32.mrb[58].mxu1  ;;  %v5267_v9 = vpop.eup %5266 }
 0x80a   : > { %v4764_v37 = vpop.f32.mrb[59].mxu1  ;;  %v2735_v1 = vsel %vm2109_vm2, %v2677_v26, -inf  ;;  %v5269_v13 = vpop.eup %5268 }
 0x80b   : > { %v2495_v28 = vpack.c.bf16 %v2493_v34, %v2492_v33 }
 0x80d   : > { %2736 = vmax.xlane.f32.xlu1 %v2735_v1 }
 0x80f   : > { %v2725_v30 = vpop.f32.mrb[60].mxu1 }
 0x810   : > { %v4769_v38 = vpop.f32.mrb[61].mxu1  ;;  %v2738_v39 = vsel %vm2109_vm2, %v2725_v30, -inf }
 0x811   : > { %2739 = vmax.xlane.f32.xlu1 %v2738_v39  ;;  %v2728_v3 = vpop.f32.mrb[62].mxu1 }
 0x812   : > { %v4770_v5 = vpop.f32.mrb[63].mxu1  ;;  %v2741_v35 = vsel %vm2109_vm2, %v2728_v3, -inf }
 0x815   : > { %2742 = vmax.xlane.f32.xlu1 %v2741_v35 }
 0x826   : > { %2770 = vrot.lane.b32.xlu1 %v6780_v12, %s5883_s5 }
 0x83a   : > { %v2431_v7 = vpop.f32.mrb[32].mxu0 }
 0x83b   : > { %v4735_v11 = vpop.f32.mrb[33].mxu0  ;;  %v2490_v55 = vmul.f32 %v5267_v9, %v2431_v7 }
 0x83c   : > { %v2434_v15 = vpop.f32.mrb[34].mxu0 }
 0x83d   : > { %v2491_v17 = vmul.f32 %v5269_v13, %v2434_v15  ;;  %v4736_v19 = vpop.f32.mrb[35].mxu0 }
 0x83f   : > { %v2494_v21 = vpack.c.bf16 %v2491_v17, %v2490_v55 }
 0x841   : > { %4747 = vmatprep.mubr.msk.bf16.mxu0 %vm2014_vm1, %v2494_v21 }
 0x842   : > { %4748 = vmatmul.mubr.msk.bf16.vlgmr.msra.gmra.mrb[36].mxu0 %vm2014_vm1, %v2495_v28 }
 0x843   : > { %4755 = vmatprep.mubr.msk.bf16.mxu0 %vm2014_vm1, %v2244_v61  ;;  %4752 = vmatpush3.bf16.msra.mxu0 %v5152_v0 }
 0x844   : > { %4753 = vmatprep.subr.bf16.mxu0 %v5153_v23 }
 0x847   : > { %4754 = vmatpush3.bf16.msra.mxu0 %v5153_v23 }
 0x848   : > { %4771 = vmatprep.subr.bf16.mxu0 %v5880_v52 }
 0x84e   : > { %4756 = vmatmul.mubr.msk.bf16.vlgmr.msra.gmra.mrb[36].mxu0 %vm2014_vm1, %v2245_v51 }
 0x84f   : > { %4773 = vmatprep.mubr.msk.bf16.mxu0 %vm5881_vm0, %v5880_v52 }
 0x896   : > { %v2734_v25 = vpop.xlane.xlu1 %2733 }
 0x897   : > { %v2744_v27 = vsub.f32 %v2674_v20, %v2734_v25 }
 0x899   : > { %v2748_v29 = vmul.f32 1.442695, %v2744_v27 }
 0x89a   : > { %v2737_v36 = vpop.xlane.xlu1 %2736 }
 0x89b   : > { %5270 = vpow2.f32 %v2748_v29  ;;  %v2745_v31 = vsub.f32 %v2677_v26, %v2737_v36 }
 0x89d   : > { %v2750_v40 = vmul.f32 1.442695, %v2745_v31 }
 0x89e   : > { %v2740_v41 = vpop.xlane.xlu1 %2739 }
 0x89f   : > { %5272 = vpow2.f32 %v2750_v40  ;;  %v2746_v49 = vsub.f32 %v2725_v30, %v2740_v41 }
 0x8a1   : > { %v2752_v53 = vmul.f32 1.442695, %v2746_v49 }
 0x8a2   : > { %v2743_v54 = vpop.xlane.xlu1 %2742 }
 0x8a3   : > { %v2747_v56 = vsub.f32 %v2728_v3, %v2743_v54  ;;  %5274 = vpow2.f32 %v2752_v53 }
 0x8a5   : > { %v5271_v48 = vpop.eup %5270  ;;  %v2754_v45 = vmul.f32 1.442695, %v2747_v56 }
 0x8a6   : > { %v2771_v47 = vpop.permute.xlu1 %2770  ;;  %v2756_v51 = vsel %vm2109_vm2, %v5271_v48, 0.0 }
 0x8a7   : > { %5276 = vpow2.f32 %v2754_v45  ;;  %2757 = vadd.xlane.f32.xlu1 %v2756_v51  ;;  %4772 = vmatpush3.bf16.msra.mxu0 %v2771_v47 }
 0x8a8   : > { %4783 = vmatprep.subr.bf16.mxu0 %v5154_v4 }
 0x8a9   : > { %v5273_v59 = vpop.eup %5272 }
 0x8aa   : > { %v2759_v50 = vsel %vm2109_vm2, %v5273_v59, 0.0  ;;  %v2768_v60 = vpack.c.bf16 %v5273_v59, %v5271_v48 }
 0x8ab   : > { %2760 = vadd.xlane.f32.xlu0 %v2759_v50 }
 0x8ac   : > { %4774 = vmatmul.mubr.msk.bf16.vlgmr.msra.gmra.mrb[40].mxu0 %vm2109_vm2, %v2768_v60 }
 0x8ad   : > { %v5275_v61 = vpop.eup %5274  ;;  %4784 = vmatpush3.bf16.msra.mxu0 %v5154_v4 }
 0x8ae   : > { %v2762_v0 = vsel %vm2109_vm2, %v5275_v61, 0.0  ;;  %4785 = vmatprep.subr.bf16.mxu0 %v5155_v6 }
 0x8b1   : > { %v5277_v62 = vpop.eup %5276  ;;  %4786 = vmatpush3.bf16.msra.mxu0 %v5155_v6 }
 0x8b2   : > { %v2769_v63 = vpack.c.bf16 %v5277_v62, %v5275_v61  ;;  %v2765_v2 = vsel %vm2109_vm2, %v5277_v62, 0.0  ;;  %4797 = vmatprep.subr.bf16.mxu0 %v5880_v52 }
 0x8b4   : > { %4780 = vmatmul.mubr.msk.bf16.vlgmr.msra.gmra.mrb[64].mxu1 %vm2109_vm2, %v2769_v63 }
 0x8b5   : > { %4793 = vmatprep.mubr.msk.bf16.mxu1 %vm5881_vm0, %v5880_v52 }
 0x8b8   : > { %2998 = vrot.lane.b32.xlu1 %v6756_v43, %s5884_s7 }
 0x8c1   : > { %2947 = vrot.lane.b32.xlu0 %v6758_v44, %s5884_s7 }
 0x8c5   : > { %2996 = vrot.lane.b32.xlu0 %v6763_v57, %s5884_s7 }
 0x8dc   : > { %2763 = vadd.xlane.f32.xlu1 %v2762_v0 }
 0x8e0   : > { %2766 = vadd.xlane.f32.xlu1 %v2765_v2 }
 0x8f1   : > { %2945 = vrot.lane.b32.xlu1 %v6765_v58, %s5884_s7 }
 0x934   : > { %v2758_v8 = vpop.xlane.xlu1 %2757 }
 0x935   : > { %5278 = vrcp.f32 %v2758_v8  ;;  %v5159_v8 = vld [vmem:[#allocation22 + $0x8] sm:$0xff]  }
 0x938   : > { %v2761_v43 = vpop.xlane.xlu0 %2760  ;;  %v2999_v14 = vpop.permute.xlu1 %2998 }
 0x939   : > { %5280 = vrcp.f32 %v2761_v43  ;;  %v3004_v7 = vsel %vm2014_vm1, %v2999_v14, 0  ;;  %v5156_v43 = vld [vmem:[#allocation19 + $0x30] sm:$0xff]  }
 0x93a   : > { %v5160_v14 = vld [vmem:[#allocation22 + $0x10] sm:$0xff]  }
 0x93c   : > { %v2948_v44 = vpop.permute.xlu0 %2947 }
 0x93d   : > { %v2953_v57 = vsel %vm2014_vm1, %v2948_v44, 0  ;;  %v5157_v44 = vld [vmem:[#allocation19 + $0x38] sm:$0xff]  }
 0x93e   : > { %4792 = vmatpush3.bf16.xpose.msra.mxu1 %v2953_v57  ;;  %v5158_v57 = vld [vmem:[#allocation22] sm:$0xff]  }
 0x93f   : > { %4803 = vmatprep.subr.bf16.mxu1 %v5880_v52  ;;  %v5279_v46 = vpop.eup %5278 }
 0x940   : > { %v2997_v9 = vpop.permute.xlu0 %2996 }
 0x943   : > { %v5281_v22 = vpop.eup %5280 }
 0x969   : > { %v2764_v16 = vpop.xlane.xlu1 %2763 }
 0x96a   : > { %5282 = vrcp.f32 %v2764_v16  ;;  %v5161_v16 = vld [vmem:[#allocation22 + $0x18] sm:$0xff]  }
 0x96d   : > { %v2767_v42 = vpop.xlane.xlu1 %2766 }
 0x96e   : > { %5284 = vrcp.f32 %v2767_v42  ;;  %v5162_v42 = vld [vmem:[#allocation22 + $0x20] sm:$0xff]  }
 0x971   : > { %v2946_v58 = vpop.permute.xlu1 %2945 }
 0x972   : > { %4794 = vmatmul.mubr.msk.bf16.vlgmr.msra.gmra.mrb[68].mxu1 %vm2014_vm1, %v2946_v58  ;;  %v5163_v58 = vld [vmem:[#allocation22 + $0x28] sm:$0xff]  }
 0x973   : > { %4805 = vmatprep.mubr.msk.bf16.mxu1 %vm5881_vm0, %v5880_v52 }
 0x974   : > { %v5283_v28 = vpop.eup %5282 }
 0x978   : > { %v5285_v30 = vpop.eup %5284 }
 0x97f   : > { %v2810_v18 = vpop.f32.mrb[40].mxu0 }
 0x980   : > { %v4775_v20 = vpop.f32.mrb[41].mxu0  ;;  %v2868_v24 = vmul.f32 %v5279_v46, %v2810_v18 }
 0x981   : > { %v2813_v32 = vpop.f32.mrb[42].mxu0 }
 0x982   : > { %v2869_v33 = vmul.f32 %v5281_v22, %v2813_v32  ;;  %v4776_v34 = vpop.f32.mrb[43].mxu0 }
 0x984   : > { %v2872_v26 = vpack.c.bf16 %v2869_v33, %v2868_v24 }
 0x986   : > { %4787 = vmatprep.mubr.msk.bf16.mxu0 %vm2014_vm1, %v2872_v26 }
 0x987   : > { %v2857_v37 = vpop.f32.mrb[64].mxu1 }
 0x988   : > { %v4781_v1 = vpop.f32.mrb[65].mxu1  ;;  %v2870_v39 = vmul.f32 %v5283_v28, %v2857_v37 }
 0x989   : > { %v2860_v38 = vpop.f32.mrb[66].mxu1 }
 0x98a   : > { %v2871_v3 = vmul.f32 %v5285_v30, %v2860_v38  ;;  %v4782_v5 = vpop.f32.mrb[67].mxu1 }
 0x98c   : > { %v2873_v35 = vpack.c.bf16 %v2871_v3, %v2870_v39 }
 0x98e   : > { %4788 = vmatmul.mubr.msk.bf16.vlgmr.msra.gmra.mrb[36].mxu0 %vm2014_vm1, %v2873_v35 }
 0x98f   : > { %4798 = vmatpush3.bf16.xpose.msra.mxu0 %v3004_v7  ;;  %4799 = vmatprep.mubr.msk.bf16.mxu0 %vm5881_vm0, %v5880_v52 }
 0x990   : > { %4809 = vmatprep.subr.bf16.mxu0 %v5880_v52 }
 0x996   : > { %4800 = vmatmul.mubr.msk.bf16.vlgmr.msra.gmra.mrb[44].mxu0 %vm2014_vm1, %v2997_v9 }
 0x997   : > { %4811 = vmatprep.mubr.msk.bf16.mxu0 %vm5881_vm0, %v5880_v52 }
 0xa45   : > { %v2989_v11 = vpop.f32.mrb[68].mxu1 }
 0xa46   : > { %v4795_v13 = vpop.f32.mrb[69].mxu1  ;;  %v3047_v15 = vsel %vm2109_vm2, %v2989_v11, -inf }
 0xa47   : > { %3048 = vmax.xlane.f32.xlu1 %v3047_v15  ;;  %v2992_v55 = vpop.f32.mrb[70].mxu1  ;;  %v5164_v15 = vld [vmem:[#allocation22 + $0x30] sm:$0xff]  }
 0xa48   : > { %v4796_v17 = vpop.f32.mrb[71].mxu1  ;;  %v3050_v19 = vsel %vm2109_vm2, %v2992_v55, -inf }
 0xa49   : > { %3051 = vmax.xlane.f32.xlu0 %v3050_v19  ;;  %v5166_v17 = vld [vmem:[#allocation25] ss:$24 sps:$4 sm:$0xff]   ;;  %v5168_v19 = vld [vmem:[#allocation25 + $0x4] ss:$24 sps:$4 sm:$0xff]  }
 0xa69   : > { %v3040_v21 = vpop.f32.mrb[44].mxu0 }
 0xa6a   : > { %v4801_v23 = vpop.f32.mrb[45].mxu0  ;;  %v3053_v25 = vsel %vm2109_vm2, %v3040_v21, -inf }
 0xa6b   : > { %v3043_v27 = vpop.f32.mrb[46].mxu0  ;;  %3054 = vmax.xlane.f32.xlu0 %v3053_v25  ;;  %v5174_v23 = vld [vmem:[#allocation25 + $0x34] ss:$24 sps:$4 sm:$0xff]   ;;  %v5172_v25 = vld [vmem:[#allocation25 + $0x30] ss:$24 sps:$4 sm:$0xff]  }
 0xa6c   : > { %v4802_v29 = vpop.f32.mrb[47].mxu0  ;;  %v3056_v36 = vsel %vm2109_vm2, %v3043_v27, -inf }
 0xa6d   : > { %3057 = vmax.xlane.f32.xlu1 %v3056_v36  ;;  %v5178_v29 = vld [vmem:[#allocation25 + $0x60] ss:$24 sps:$4 sm:$0xff]   ;;  %v5186_v36 = vld [vmem:[#allocation25 + $0x94] ss:$24 sps:$4 sm:$0xff]  }
 0xa7e   : > { %3132 = vrot.lane.b32.xlu1 %v6778_v10, %s5884_s7 }
 0xa81   : > { %3085 = vrot.lane.b32.xlu0 %v6780_v12, %s5884_s7 }
 0xad4   : > { %v3049_v52 = vpop.xlane.xlu1 %3048 }
 0xad5   : > { %v3059_v31 = vsub.f32 %v2989_v11, %v3049_v52  ;;  %v5184_v52 = vld [vmem:[#allocation25 + $0x90] ss:$24 sps:$4 sm:$0xff]  }
 0xad6   : > { %v3052_v40 = vpop.xlane.xlu0 %3051 }
 0xad7   : > { %v3063_v41 = vmul.f32 1.442695, %v3059_v31  ;;  %v3060_v49 = vsub.f32 %v2992_v55, %v3052_v40  ;;  %v5165_v55 = vld [vmem:[#allocation22 + $0x38] sm:$0xff]  }
 0xad8   : > { %v5192_v31 = vld [vmem:[#allocation25 + $0xc4] ss:$24 sps:$4 sm:$0xff]   ;;  %v5190_v40 = vld [vmem:[#allocation25 + $0xc0] ss:$24 sps:$4 sm:$0xff]  }
 0xad9   : > { %5286 = vpow2.f32 %v3063_v41  ;;  %v3065_v53 = vmul.f32 1.442695, %v3060_v49  ;;  %v5198_v41 = vld [vmem:[#allocation25 + $0xf4] ss:$24 sps:$4 sm:$0xff]   ;;  %v5196_v49 = vld [vmem:[#allocation25 + $0xf0] ss:$24 sps:$4 sm:$0xff]  }
 0xadb   : > { %5288 = vpow2.f32 %v3065_v53  ;;  %v5204_v53 = vld [vmem:[#allocation25 + $0x124] ss:$24 sps:$4 sm:$0xff]  }
 0xae3   : > { %v5287_v54 = vpop.eup %5286 }
 0xae4   : > { %v3071_v56 = vsel %vm2109_vm2, %v5287_v54, 0.0 }
 0xae5   : > { %v5289_v48 = vpop.eup %5288  ;;  %3072 = vadd.xlane.f32.xlu1 %v3071_v56 }
 0xae6   : > { %v3074_v45 = vsel %vm2109_vm2, %v5289_v48, 0.0  ;;  %v3083_v47 = vpack.c.bf16 %v5289_v48, %v5287_v54  ;;  %v5202_v54 = vld [vmem:[#allocation25 + $0x120] ss:$24 sps:$4 sm:$0xff]   ;;  %v4314_v48 = vld [vmem:[#allocation20] ss:$0 sm:$0xff] }
 0xae7   : > { %3075 = vadd.xlane.f32.xlu0 %v3074_v45 }
 0xaf8   : > { %v3055_v10 = vpop.xlane.xlu0 %3054 }
 0xaf9   : > { %v3061_v51 = vsub.f32 %v3040_v21, %v3055_v10  ;;  %v5171_v21 = vld [vmem:[#allocation25 + $0xc] ss:$24 sps:$4 sm:$0xff]  }
 0xafa   : > { %v3058_v12 = vpop.xlane.xlu1 %3057 }
 0xafb   : > { %v3067_v59 = vmul.f32 1.442695, %v3061_v51  ;;  %v3062_v50 = vsub.f32 %v3043_v27, %v3058_v12  ;;  %v5180_v27 = vld [vmem:[#allocation25 + $0x64] ss:$24 sps:$4 sm:$0xff]  }
 0xafc   : > { %v3086_v60 = vpop.permute.xlu0 %3085 }
 0xafd   : > { %5290 = vpow2.f32 %v3067_v59  ;;  %v3069_v61 = vmul.f32 1.442695, %v3062_v50  ;;  %4804 = vmatpush3.bf16.msra.mxu1 %v3086_v60 }
 0xafe   : > { %v3133_v62 = vpop.permute.xlu1 %3132  ;;  %4823 = vmatprep.subr.bf16.mxu1 %v5158_v57 }
 0xaff   : > { %5292 = vpow2.f32 %v3069_v61  ;;  %4810 = vmatpush3.bf16.msra.mxu0 %v3133_v62  ;;  %v5169_v62 = vld [vmem:[#allocation25 + $0x8] ss:$24 sps:$4 sm:$0xff]  }
 0xb00   : > { %4806 = vmatmul.mubr.msk.bf16.vlgmr.msra.gmra.mrb[72].mxu1 %vm2109_vm2, %v3083_v47  ;;  %4815 = vmatprep.subr.bf16.mxu0 %v5156_v43 }
 0xb01   : > { %4824 = vmatpush3.bf16.msra.mxu1 %v5158_v57  ;;  %v5193_v57 = vld [vmem:[#allocation25 + $0xc8] ss:$24 sps:$4 sm:$0xff]  }
 0xb02   : > { %4825 = vmatprep.subr.bf16.mxu1 %v5159_v8 }
 0xb05   : > { %4826 = vmatpush3.bf16.msra.mxu1 %v5159_v8  ;;  %v5201_v8 = vld [vmem:[#allocation25 + $0xfc] ss:$24 sps:$4 sm:$0xff]  }
 0xb06   : > { %4827 = vmatprep.subr.bf16.mxu1 %v5160_v14 }
 0xb07   : > { %v5291_v63 = vpop.eup %5290 }
 0xb08   : > { %v3077_v0 = vsel %vm2109_vm2, %v5291_v63, 0.0 }
 0xb09   : > { %v5293_v2 = vpop.eup %5292  ;;  %3078 = vadd.xlane.f32.xlu0 %v3077_v0  ;;  %4828 = vmatpush3.bf16.msra.mxu1 %v5160_v14  ;;  %v5175_v0 = vld [vmem:[#allocation25 + $0x38] ss:$24 sps:$4 sm:$0xff]  }
 0xb0a   : > { %v3080_v4 = vsel %vm2109_vm2, %v5293_v2, 0.0  ;;  %v3084_v6 = vpack.c.bf16 %v5293_v2, %v5291_v63  ;;  %4829 = vmatprep.subr.bf16.mxu1 %v5161_v16  ;;  %v5177_v63 = vld [vmem:[#allocation25 + $0x3c] ss:$24 sps:$4 sm:$0xff]   ;;  %v5183_v2 = vld [vmem:[#allocation25 + $0x6c] ss:$24 sps:$4 sm:$0xff]  }
 0xb0b   : > { %3081 = vadd.xlane.f32.xlu1 %v3080_v4  ;;  %v5181_v4 = vld [vmem:[#allocation25 + $0x68] ss:$24 sps:$4 sm:$0xff]   ;;  %v5199_v14 = vld [vmem:[#allocation25 + $0xf8] ss:$24 sps:$4 sm:$0xff]  }
 0xb0c   : > { %4812 = vmatmul.mubr.msk.bf16.vlgmr.msra.gmra.mrb[48].mxu0 %vm2109_vm2, %v3084_v6  ;;  %v5189_v6 = vld [vmem:[#allocation25 + $0x9c] ss:$24 sps:$4 sm:$0xff]  }
 0xb0d   : > { %4816 = vmatpush3.bf16.msra.mxu0 %v5156_v43  ;;  %4830 = vmatpush3.bf16.msra.mxu1 %v5161_v16  ;;  %v5187_v43 = vld [vmem:[#allocation25 + $0x98] ss:$24 sps:$4 sm:$0xff]   ;;  %v5207_v16 = vld [vmem:[#allocation25 + $0x12c] ss:$24 sps:$4 sm:$0xff]  }
 0xb0e   : > { %4817 = vmatprep.subr.bf16.mxu0 %v5157_v44  ;;  %4831 = vmatprep.subr.bf16.mxu1 %v5162_v42 }
 0xb11   : > { %4818 = vmatpush3.bf16.msra.mxu0 %v5157_v44  ;;  %4832 = vmatpush3.bf16.msra.mxu1 %v5162_v42  ;;  %v5195_v44 = vld [vmem:[#allocation25 + $0xcc] ss:$24 sps:$4 sm:$0xff]   ;;  %v5205_v42 = vld [vmem:[#allocation25 + $0x128] ss:$24 sps:$4 sm:$0xff]  }
 0xb12   : > { %4833 = vmatprep.subr.bf16.mxu1 %v5163_v58  ;;  %3715 = vmatprep.subr.bf16.mxu0 %v5168_v19  ;;  %v5231_v19 = vld [vmem:[#allocation25 + $0x104] ss:$24 sps:$4 sm:$0xff]  }
 0xb15   : > { %4834 = vmatpush3.bf16.msra.mxu1 %v5163_v58  ;;  %v5210_v58 = vld [vmem:[#allocation25 + $0x154] ss:$24 sps:$4 sm:$0xff]  }
 0xb16   : > { %4835 = vmatprep.subr.bf16.mxu1 %v5164_v15 }
 0xb19   : > { %4836 = vmatpush3.bf16.msra.mxu1 %v5164_v15  ;;  %v5223_v15 = vld [vmem:[#allocation25 + $0xa0] ss:$24 sps:$4 sm:$0xff]  }
 0xb1a   : > { %4837 = vmatprep.subr.bf16.mxu1 %v5165_v55 }
 0xb1d   : > { %4838 = vmatpush3.bf16.msra.mxu1 %v5165_v55  ;;  %v5228_v55 = vld [vmem:[#allocation25 + $0xd4] ss:$24 sps:$4 sm:$0xff]  }
 0xb1e   : > { %3768 = vmatprep.subr.bf16.mxu1 %v5171_v21  ;;  %v5229_v21 = vld [vmem:[#allocation25 + $0x100] ss:$24 sps:$4 sm:$0xff]  }
 0xb72   : > { %v3073_v18 = vpop.xlane.xlu1 %3072 }
 0xb73   : > { %5294 = vrcp.f32 %v3073_v18  ;;  %v5208_v18 = vld [vmem:[#allocation25 + $0x150] ss:$24 sps:$4 sm:$0xff]  }
 0xb74   : > { %v3076_v46 = vpop.xlane.xlu0 %3075 }
 0xb75   : > { %5296 = vrcp.f32 %v3076_v46  ;;  %v5213_v46 = vld [vmem:[#allocation25 + $0x15c] ss:$24 sps:$4 sm:$0xff]  }
 0xb7d   : > { %v5295_v32 = vpop.eup %5294 }
 0xb7f   : > { %v5297_v34 = vpop.eup %5296 }
 0xb96   : > { %v3079_v20 = vpop.xlane.xlu0 %3078 }
 0xb97   : > { %5298 = vrcp.f32 %v3079_v20  ;;  %v5211_v20 = vld [vmem:[#allocation25 + $0x158] ss:$24 sps:$4 sm:$0xff]  }
 0xb98   : > { %v3082_v24 = vpop.xlane.xlu1 %3081 }
 0xb99   : > { %5300 = vrcp.f32 %v3082_v24 }
 0xba1   : > { %v5299_v39 = vpop.eup %5298 }
 0xba3   : > { %v5301_v5 = vpop.eup %5300 }
 0xbd3   : > { %v3125_v22 = vpop.f32.mrb[72].mxu1 }
 0xbd4   : > { %v4807_v33 = vpop.f32.mrb[73].mxu1  ;;  %v3183_v37 = vmul.f32 %v5295_v32, %v3125_v22  ;;  %v5216_v22 = vld [vmem:[#allocation25 + $0x14] ss:$24 sps:$4 sm:$0xff]   ;;  %v5885_v32 = vmov 0  }
 0xbd5   : > { %v3128_v26 = vpop.f32.mrb[74].mxu1  ;;  %v4315_v33 = vld [vmem:[#allocation23] ss:$0 sm:$0xff] }
 0xbd6   : > { %v3184_v28 = vmul.f32 %v5297_v34, %v3128_v26  ;;  %v4808_v1 = vpop.f32.mrb[75].mxu1 }
 0xbd8   : > { %v3187_v30 = vpack.c.bf16 %v3184_v28, %v3183_v37 }
 0xbda   : > { %4819 = vmatprep.mubr.msk.bf16.mxu0 %vm2014_vm1, %v3187_v30 }
 0xbdf   : > { %v3172_v38 = vpop.f32.mrb[48].mxu0 }
 0xbe0   : > { %v4813_v3 = vpop.f32.mrb[49].mxu0  ;;  %v3185_v7 = vmul.f32 %v5299_v39, %v3172_v38 }
 0xbe1   : > { %v3175_v35 = vpop.f32.mrb[50].mxu0  ;;  %v5214_v3 = vld [vmem:[#allocation25 + $0x10] ss:$24 sps:$4 sm:$0xff]  }
 0xbe2   : > { %v3186_v9 = vmul.f32 %v5301_v5, %v3175_v35  ;;  %v4814_v11 = vpop.f32.mrb[51].mxu0  ;;  %v5219_v35 = vld [vmem:[#allocation25 + $0x44] ss:$24 sps:$4 sm:$0xff]  }
 0xbe3   : > { %v5220_v11 = vld [vmem:[#allocation25 + $0x70] ss:$24 sps:$4 sm:$0xff]  }
 0xbe4   : > { %v3188_v13 = vpack.c.bf16 %v3186_v9, %v3185_v7  ;;  %v5217_v7 = vld [vmem:[#allocation25 + $0x40] ss:$24 sps:$4 sm:$0xff]   ;;  %v5222_v9 = vld [vmem:[#allocation25 + $0x74] ss:$24 sps:$4 sm:$0xff]  }
 0xbe6   : > { %4820 = vmatmul.mubr.msk.bf16.vlgmr.msra.gmra.mrb[36].mxu0 %vm2014_vm1, %v3188_v13  ;;  %v5225_v13 = vld [vmem:[#allocation25 + $0xa4] ss:$24 sps:$4 sm:$0xff]  }
 0xbe7   : > { %3716 = vmatpush1.bf16.msra.mxu0 %v5166_v17  ;;  %3747 = vmatprep.mubr.bf16.mxu0 %v5885_v32  ;;  %v5226_v17 = vld [vmem:[#allocation25 + $0xd0] ss:$24 sps:$4 sm:$0xff]  }
 0xbe8   : > { %3717 = vmatprep.subr.bf16.mxu0 %v5174_v23  ;;  %v5234_v23 = vld [vmem:[#allocation25 + $0x134] ss:$24 sps:$4 sm:$0xff]  }
 0xbeb   : > { %3718 = vmatpush1.bf16.msra.mxu0 %v5172_v25  ;;  %v5232_v25 = vld [vmem:[#allocation25 + $0x130] ss:$24 sps:$4 sm:$0xff]  }
 0xbec   : > { %3719 = vmatprep.subr.bf16.mxu0 %v5180_v27  ;;  %v5237_v27 = vld [vmem:[#allocation25 + $0x164] ss:$24 sps:$4 sm:$0xff]  }
 0xbef   : > { %3720 = vmatpush1.bf16.msra.mxu0 %v5178_v29  ;;  %v5235_v29 = vld [vmem:[#allocation25 + $0x160] ss:$24 sps:$4 sm:$0xff]  }
 0xbf0   : > { %3721 = vmatprep.subr.bf16.mxu0 %v5186_v36  ;;  %v3445_v36 = vlaneseq }
 0xbf3   : > { %3722 = vmatpush1.bf16.msra.mxu0 %v5184_v52  ;;  %v6945_v52 = vshrl.u32 %v3445_v36, 7 }
 0xbf4   : > { %3723 = vmatprep.subr.bf16.mxu0 %v5192_v31 }
 0xbf5   : > { %v3447_v31 = vsub.s32 0, %v6945_v52 }
 0xbf7   : > { %3724 = vmatpush1.bf16.msra.mxu0 %v5190_v40  ;;  %v3455_v40 = vsub.s32 2, %v6945_v52 }
 0xbf8   : > { %3725 = vmatprep.subr.bf16.mxu0 %v5198_v41  ;;  %v3443_v41 = vld [vmem:[#allocation26] sm:$0x3f] }
 0xbfb   : > { %3726 = vmatpush1.bf16.msra.mxu0 %v5196_v49  ;;  %v3451_v49 = vsub.s32 1, %v6945_v52 }
 0xbfc   : > { %3727 = vmatprep.subr.bf16.mxu0 %v5204_v53  ;;  %v3459_v53 = vsub.s32 3, %v6945_v52 }
 0xbff   : > { %3728 = vmatpush1.bf16.msra.mxu0 %v5202_v54  ;;  %v3448_v54 = vrot.slane %v3443_v41, %v3447_v31 }
 0xc00   : > { %3729 = vmatprep.subr.bf16.mxu0 %v5210_v58 }
 0xc03   : > { %3730 = vmatpush1.bf16.msra.mxu0 %v5208_v18 }
 0xc04   : > { %3821 = vmatprep.subr.bf16.mxu0 %v5216_v22 }
 0xcb9   : > { %v4821_v56 = vpop.f32.mrb[36].mxu0 }
 0xcba   : > { %v3241_v45 = vpop.f32.mrb[37].mxu0  ;;  %v3269_v10 = vadd.f32 %v4821_v56, %v4314_v48  ;;  %v3456_v56 = vrot.slane %v3443_v41, %v3455_v40 }
 0xcbb   : > { %v4822_v47 = vpop.f32.mrb[38].mxu0  ;;  %v3267_v59 = vadd.f32 %v4314_v48, %v3241_v45  ;;  %v3460_v45 = vrot.slane %v3443_v41, %v3459_v53 }
 0xcbc   : > { %v3270_v51 = vadd.f32 %v4822_v47, %v4314_v48  ;;  %v3244_v12 = vpop.f32.mrb[39].mxu0 }
 0xcbd   : > { %v3268_v50 = vadd.f32 %v4314_v48, %v3244_v12  ;;  %v3452_v48 = vrot.slane %v3443_v41, %v3451_v49 }
 0xcbe   : > { %v3272_v60 = vpack.c.bf16 %v3270_v51, %v3269_v10 }
 0xcbf   : > { %v3271_v61 = vpack.c.bf16 %v3268_v50, %v3267_v59 }
 0xcc1   : > { %4839 = vmatprep.mubr.bf16.mxu1 %v3271_v61 }
 0xcc2   : > { %4840 = vmatmul.mubr.bf16.vlgmr.msra.gmra.mrb[76].mxu1 %v3272_v60 }
 0xcc3   : > { %3769 = vmatpush1.bf16.msra.mxu1 %v5169_v62  ;;  %3800 = vmatprep.mubr.bf16.mxu1 %v5885_v32 }
 0xcc4   : > { %3770 = vmatprep.subr.bf16.mxu1 %v5177_v63 }
 0xcc7   : > { %3771 = vmatpush1.bf16.msra.mxu1 %v5175_v0 }
 0xcc8   : > { %3772 = vmatprep.subr.bf16.mxu1 %v5183_v2 }
 0xccb   : > { %3773 = vmatpush1.bf16.msra.mxu1 %v5181_v4 }
 0xccc   : > { %3774 = vmatprep.subr.bf16.mxu1 %v5189_v6 }
 0xccf   : > { %3775 = vmatpush1.bf16.msra.mxu1 %v5187_v43 }
 0xcd0   : > { %3776 = vmatprep.subr.bf16.mxu1 %v5195_v44 }
 0xcd3   : > { %3777 = vmatpush1.bf16.msra.mxu1 %v5193_v57 }
 0xcd4   : > { %3778 = vmatprep.subr.bf16.mxu1 %v5201_v8 }
 0xcd7   : > { %3779 = vmatpush1.bf16.msra.mxu1 %v5199_v14 }
 0xcd8   : > { %3780 = vmatprep.subr.bf16.mxu1 %v5207_v16 }
 0xcdb   : > { %3781 = vmatpush1.bf16.msra.mxu1 %v5205_v42 }
 0xcdc   : > { %3782 = vmatprep.subr.bf16.mxu1 %v5213_v46 }
 0xcdf   : > { %3783 = vmatpush1.bf16.msra.mxu1 %v5211_v20 }
 0xd95   : > { %v4841_v24 = vpop.f32.mrb[76].mxu1 }
 0xd96   : > { %v3378_v34 = vpop.f32.mrb[77].mxu1  ;;  %v3387_v37 = vadd.f32 %v4841_v24, %v4315_v33 }
 0xd97   : > { %v4842_v26 = vpop.f32.mrb[78].mxu1  ;;  %v3379_v30 = vadd.f32 %v4315_v33, %v3378_v34 }
 0xd98   : > { %v3390_v28 = vadd.f32 %v4842_v26, %v4315_v33  ;;  %v3381_v1 = vpop.f32.mrb[79].mxu1 }
 0xd99   : > { %v3382_v38 = vadd.f32 %v4315_v33, %v3381_v1  ;;  %v3467_v1 = vsub.s32 5, %v6945_v52 }
 0xd9a   : > { %v3394_v39 = vpack.c.bf16 %v3390_v28, %v3387_v37  ;;  %v3463_v28 = vsub.s32 4, %v6945_v52 }
 0xd9b   : > { %v3393_v5 = vpack.c.bf16 %v3382_v38, %v3379_v30  ;;  %v3468_v38 = vrot.slane %v3443_v41, %v3467_v1 }
 0xd9c   : > { %v3464_v30 = vrot.slane %v3443_v41, %v3463_v28 }
 0xd9d   : > { %3748 = vmatmul.mubr.bf16.vlgmr.msra.gmra.mrb[52].mxu0 %v3393_v5  ;;  %3801 = vmatmul.mubr.bf16.vlgmr.msra.gmra.mrb[80].mxu1 %v3393_v5 }
 0xd9e   : > { %3822 = vmatpush1.bf16.msra.mxu0 %v5214_v3  ;;  %3757 = vmatprep.mubr.bf16.mxu0 %v5885_v32 }
 0xd9f   : > { %3823 = vmatprep.subr.bf16.mxu0 %v5219_v35  ;;  %3810 = vmatprep.mubr.bf16.mxu1 %v5885_v32 }
 0xda2   : > { %3824 = vmatpush1.bf16.msra.mxu0 %v5217_v7 }
 0xda3   : > { %3825 = vmatprep.subr.bf16.mxu0 %v5222_v9 }
 0xda5   : > { %3758 = vmatmul.mubr.bf16.gmra.mrb[56].mxu0 %v3394_v39  ;;  %3811 = vmatmul.mubr.bf16.gmra.mrb[84].mxu1 %v3394_v39 }
 0xda6   : > { %3826 = vmatpush1.bf16.msra.mxu0 %v5220_v11  ;;  %3853 = vmatprep.mubr.bf16.mxu0 %v5885_v32 }
 0xda7   : > { %3827 = vmatprep.subr.bf16.mxu0 %v5225_v13 }
 0xdaa   : > { %3828 = vmatpush1.bf16.msra.mxu0 %v5223_v15 }
 0xdab   : > { %3829 = vmatprep.subr.bf16.mxu0 %v5228_v55 }
 0xdae   : > { %3830 = vmatpush1.bf16.msra.mxu0 %v5226_v17 }
 0xdaf   : > { %3831 = vmatprep.subr.bf16.mxu0 %v5231_v19 }
 0xdb2   : > { %3832 = vmatpush1.bf16.msra.mxu0 %v5229_v21 }
 0xdb3   : > { %3833 = vmatprep.subr.bf16.mxu0 %v5234_v23 }
 0xdb6   : > { %3834 = vmatpush1.bf16.msra.mxu0 %v5232_v25 }
 0xdb7   : > { %3835 = vmatprep.subr.bf16.mxu0 %v5237_v27 }
 0xdba   : > { %3836 = vmatpush1.bf16.msra.mxu0 %v5235_v29 }
 0xdbd   : > { %3854 = vmatmul.mubr.bf16.vlgmr.msra.gmra.mrb[60].mxu0 %v3393_v5 }
 0xdbe   : > { %3863 = vmatprep.mubr.bf16.mxu0 %v5885_v32 }
 0xdc5   : > { %3864 = vmatmul.mubr.bf16.gmra.mrb[64].mxu0 %v3394_v39 }
 0xe70   : > { %v3749_v47 = vpop.f32.mrb[52].mxu0  ;;  %v3802_v10 = vpop.f32.mrb[80].mxu1 }
 0xe71   : > { %v3750_v51 = vadd.f32 %v3749_v47, %v3448_v54  ;;  %v3803_v12 = vadd.f32 %v3802_v10, %v3456_v56  ;;  %v3751_v59 = vpop.f32.mrb[53].mxu0  ;;  %v3804_v50 = vpop.f32.mrb[81].mxu1 }
 0xe72   : > { %v3752_v60 = vadd.f32 %v3751_v59, %v3452_v48  ;;  %v3805_v61 = vadd.f32 %v3804_v50, %v3460_v45  ;;  %v3753_v62 = vpop.f32.mrb[54].mxu0  ;;  %v3806_v63 = vpop.f32.mrb[82].mxu1 }
 0xe73   : > { %3874 = vst [vmem:[%s6952_s30] sm:$0xff] %v3750_v51  ;;  %3876 = vst [vmem:[%s6952_s30 + $0x10] sm:$0xff] %v3803_v12  ;;  %v3754_v0 = vadd.f32 %v3753_v62, %v3448_v54  ;;  %v3807_v2 = vadd.f32 %v3806_v63, %v3456_v56  ;;  %v3755_v4 = vpop.f32.mrb[55].mxu0  ;;  %v3808_v6 = vpop.f32.mrb[83].mxu1 }
 0xe74   : > { %3875 = vst [vmem:[%s6952_s30 + $0x8] sm:$0xff] %v3752_v60  ;;  %3877 = vst [vmem:[%s6952_s30 + $0x18] sm:$0xff] %v3805_v61  ;;  %v3756_v43 = vadd.f32 %v3755_v4, %v3452_v48  ;;  %v3809_v44 = vadd.f32 %v3808_v6, %v3460_v45 }
 0xe75   : > { %3880 = vst [vmem:[%s6952_s30 + $0x30] sm:$0xff] %v3754_v0  ;;  %3882 = vst [vmem:[%s6952_s30 + $0x40] sm:$0xff] %v3807_v2 }
 0xe76   : > { %3881 = vst [vmem:[%s6952_s30 + $0x38] sm:$0xff] %v3756_v43  ;;  %3883 = vst [vmem:[%s6952_s30 + $0x48] sm:$0xff] %v3809_v44 }
 0xe78   : > { %v3759_v57 = vpop.f32.mrb[56].mxu0  ;;  %v3812_v8 = vpop.f32.mrb[84].mxu1 }
 0xe79   : > { %v3760_v14 = vadd.f32 %v3759_v57, %v3448_v54  ;;  %v3813_v16 = vadd.f32 %v3812_v8, %v3456_v56  ;;  %v3761_v42 = vpop.f32.mrb[57].mxu0  ;;  %v3814_v58 = vpop.f32.mrb[85].mxu1 }
 0xe7a   : > { %v3762_v18 = vadd.f32 %v3761_v42, %v3452_v48  ;;  %v3815_v46 = vadd.f32 %v3814_v58, %v3460_v45  ;;  %v3763_v20 = vpop.f32.mrb[58].mxu0  ;;  %v3816_v22 = vpop.f32.mrb[86].mxu1 }
 0xe7b   : > { %3886 = vst [vmem:[%s6952_s30 + $0x60] sm:$0xff] %v3760_v14  ;;  %3888 = vst [vmem:[%s6952_s30 + $0x70] sm:$0xff] %v3813_v16  ;;  %v3764_v32 = vadd.f32 %v3763_v20, %v3448_v54  ;;  %v3817_v24 = vadd.f32 %v3816_v22, %v3456_v56  ;;  %v3765_v33 = vpop.f32.mrb[59].mxu0  ;;  %v3818_v34 = vpop.f32.mrb[87].mxu1 }
 0xe7c   : > { %3887 = vst [vmem:[%s6952_s30 + $0x68] sm:$0xff] %v3762_v18  ;;  %3889 = vst [vmem:[%s6952_s30 + $0x78] sm:$0xff] %v3815_v46  ;;  %v3766_v26 = vadd.f32 %v3765_v33, %v3452_v48  ;;  %v3819_v37 = vadd.f32 %v3818_v34, %v3460_v45 }
 0xe7d   : > { %3892 = vst [vmem:[%s6952_s30 + $0x90] sm:$0xff] %v3764_v32  ;;  %3894 = vst [vmem:[%s6952_s30 + $0xa0] sm:$0xff] %v3817_v24 }
 0xe7e   : > { %3893 = vst [vmem:[%s6952_s30 + $0x98] sm:$0xff] %v3766_v26  ;;  %3895 = vst [vmem:[%s6952_s30 + $0xa8] sm:$0xff] %v3819_v37 }
 0xe90   : > { %v3855_v39 = vpop.f32.mrb[60].mxu0 }
 0xe91   : > { %v3856_v3 = vadd.f32 %v3855_v39, %v3464_v30  ;;  %v3857_v5 = vpop.f32.mrb[61].mxu0 }
 0xe92   : > { %v3858_v35 = vadd.f32 %v3857_v5, %v3468_v38  ;;  %v3859_v7 = vpop.f32.mrb[62].mxu0 }
 0xe93   : > { %3878 = vst [vmem:[%s6952_s30 + $0x20] sm:$0xff] %v3856_v3  ;;  %v3860_v9 = vadd.f32 %v3859_v7, %v3464_v30  ;;  %v3861_v11 = vpop.f32.mrb[63].mxu0 }
 0xe94   : > { %3879 = vst [vmem:[%s6952_s30 + $0x28] sm:$0xff] %v3858_v35  ;;  %v3862_v13 = vadd.f32 %v3861_v11, %v3468_v38 }
 0xe95   : > { %3884 = vst [vmem:[%s6952_s30 + $0x50] sm:$0xff] %v3860_v9 }
 0xe96   : > { %3885 = vst [vmem:[%s6952_s30 + $0x58] sm:$0xff] %v3862_v13 }
 0xe98   : > { %v3865_v15 = vpop.f32.mrb[64].mxu0 }
 0xe99   : > { %v3866_v55 = vadd.f32 %v3865_v15, %v3464_v30  ;;  %v3867_v17 = vpop.f32.mrb[65].mxu0 }
 0xe9a   : > { %v3868_v19 = vadd.f32 %v3867_v17, %v3468_v38  ;;  %v3869_v21 = vpop.f32.mrb[66].mxu0 }
 0xe9b   : > { %3890 = vst [vmem:[%s6952_s30 + $0x80] sm:$0xff] %v3866_v55  ;;  %v3870_v23 = vadd.f32 %v3869_v21, %v3464_v30  ;;  %v3871_v25 = vpop.f32.mrb[67].mxu0 }
 0xe9c   : > { %3891 = vst [vmem:[%s6952_s30 + $0x88] sm:$0xff] %v3868_v19  ;;  %v3872_v27 = vadd.f32 %v3871_v25, %v3468_v38 }
 0xe9d   : > { %3896 = vst [vmem:[%s6952_s30 + $0xb0] sm:$0xff] %v3870_v23 }
 0xe9e   : > { %3897 = vst [vmem:[%s6952_s30 + $0xb8] sm:$0xff] %v3872_v27 }
 0xe9f   : > { %5767 = shalt.err (!%p5764_p10)
}
 0xea0   : > { %s5768_s4 = scalar_lea.hbm %s6982_s2, 3072  ;;  %s5772_s7 = scalar_lea.hbm %s7126_s20, 6144 }
 0xea1   : > { %p5769_p6 = scmp.ne.s32.totalorder %s6982_s2, %s5768_s4  ;;  %p5773_p8 = scmp.lt.u32.totalorder %s6982_s2, %s7126_s20 }
 0xea2   : > { %p5774_p11 = scmp.lt.u32.totalorder %s5772_s7, %s5768_s4  ;;  %p5776_p12 = scmp.lt.u32.totalorder %s5768_s4, %s6982_s2 }
 0xea3   : > { %p5770_p7 = pnand %p5769_p6, %p7127_p13 }
 0xea4   : > { %p5775_p0 = por %p5774_p11, %p5773_p8 }
 0xea5   : > { %p5771_p9 = pneg %p5770_p7 }
 0xea6   : > { %p5777_p1 = por %p5776_p12, %p5775_p0 }
 0xea8   : > { %p5778_p3 = pnand %p5777_p1, %p5771_p9 }
 0xeaa   : > { %5781 = shalt.err (!%p5778_p3)
}
 0xeab   : > { %s5887_s9 = smov 768   ;;  %s5888_s1 = smov 48  }
 0xeac   : > { %4920 = dma.vmem_to_hbm [thread:$0]  (%p7127_p13), %s6984_s23, 3072, %s6982_s2, %s3899_s28, %s5887_s9, %s5887_s9, %s5888_s1  }
 0xead PF: > { %s7128_s22 = sld [smem:[#allocation40_spill]]  ;;  %p7129_p5 = scmp.ne.s32.totalorder %s7099_s18, 0 }
 0xeae   : > { %p7130_p2 = scmp.ge.s32.totalorder %s5856_s24, 2 }
 0xeb0   : > { %p4973_p4 = pnand %p7130_p2, %p7129_p5 }
 0xeb3   : > { %s3928_s21 = sand.u32 1, %s7128_s22  }
 0xeb4   : > { %s3929_s6 = scalar_lea.sflag [#allocation4], %s3928_s21 }
 0xeb5   : > { %5839 = dma.done.wait (!%p4973_p4), %s3929_s6, 3072  }
 0xeb6   : > { %5841 = vsyncadd (!%p4973_p4), %s3929_s6, 4294964224  ;;  %s7131_s21 = sld [smem:[#allocation41_spill]]  ;;  %s7132_s22 = sld [smem:[#allocation42_spill]] }
 0xeb7   : > { %p39_p10 = scmp.ge.s32.totalorder %s6317_s0, 4   ;;  %s7133_s23 = smov %s6328_s27 }
 0xeb8   : > { %s7134_s24 = smov %s6317_s0 }
 0xeb9   :  { %41 = sbr.rel (!%p39_p10) target bundleno = 26 (0x1a), region = 198 }
 0xec0   :  { %3934 = vsyncpa [#allocation3], 1 }
 0xec1   :  { %3936 = vsyncpa [#allocation3 + $0x1], 1 }
 0xec2   :  { %3937 = vsyncpa [#allocation6], 1 }
 0xec3   :  { %3939 = vsyncpa [#allocation6 + $0x1], 1 }
 0xec4   :  { %3940 = vsyncpa [#allocation9], 1 }
 0xec5   :  { %3941 = vsyncpa [#allocation12], 1 }
 0xec6   :  { %3942 = vsyncpa [#allocation15], 1 }
 0xec7   :  { %3943 = vsyncpa [#allocation18], 1 }
 0xec8   :  { %3944 = vsyncpa [#allocation21], 1 }
 0xec9   :  { %3945 = vsyncpa [#allocation24], 1 }
 0xeca   :  { %3946 = vsyncpa [#allocation27], 1 }
 0xecb   :  { %3947 = vsyncpa [#allocation4], 1 }
 0xecc   :  { %3949 = vsyncpa [#allocation4 + $0x1], 1 }

</bundles_post_ra>
